<compile_context>
chip_gen: v5e
topology: v5e:2x2
jax: 0.10.0
libtpu: 0.0.40
codegen_flags: <defaults>
</compile_context>

<pallas_src>
import functools

import numpy as np

import jax
import jax.numpy as jnp
from jax.experimental import pallas as pl
from jax.experimental.pallas import tpu as pltpu


A_STEP = 0.1     # TODO(synk): placeholder LSQ activation step (learnable in the repo)
EPS = 1e-5
LANE = 128


# ------------------------------- small helpers ------------------------------ #

def _round_up(v, m):
    return ((v + m - 1) // m) * m


def _pick_tile(dim, target, unit=LANE):
    """Largest multiple of `unit` that divides `dim` (a multiple of unit) and is <= target."""
    q = dim // unit
    best = 1
    for d in range(1, q + 1):
        if q % d == 0 and d * unit <= target:
            best = d
    return best * unit


def _pad1d(v, n):
    return jnp.pad(v.astype(jnp.float32), (0, n - v.shape[0]))


@functools.lru_cache(maxsize=1)
def _vmem_limit_bytes():
    """Per-generation VMEM budget: ~3/4 of physical capacity, capped at 96 MiB.

    v5e/v6e (128 MiB) -> 96 MiB; v7x (64 MiB) or unknown -> 48 MiB.
    """
    cap = 64 * 1024 * 1024
    try:
        c = int(getattr(pltpu.get_tpu_info(), "vmem_capacity_bytes", 0))
        if c > 0:
            cap = c
    except Exception:
        pass
    return int(min(cap * 3 // 4, 96 * 1024 * 1024))


def _int8_mxu_probe():
    """Check that s8 x s8 -> s32 MXU matmul + int8 store lowers/runs on this backend."""
    def kern(a_ref, b_ref, o_ref):
        acc = jnp.dot(a_ref[...], b_ref[...], preferred_element_type=jnp.int32)
        o_ref[...] = jnp.clip(acc, -127, 127).astype(jnp.int8)

    try:
        a = jnp.ones((256, 128), jnp.int8)
        b = jnp.ones((128, 128), jnp.int8)
        out = pl.pallas_call(
            kern, out_shape=jax.ShapeDtypeStruct((256, 128), jnp.int8))(a, b)
        jax.block_until_ready(out)
        return bool(int(out[0, 0]) == 127)        # 128 ones clipped to 127
    except Exception:
        return False


@functools.lru_cache(maxsize=None)
def _code_dtype_for_backend(abit, wbit):
    """int8 MXU fast path on v5e/v6e; bf16 elsewhere (v7x MXU has no integer path)."""
    if abit > 7 or wbit > 8:          # codes would not fit int8 exactly
        return jnp.bfloat16
    kind = ""
    try:
        kind = jax.devices()[0].device_kind.lower()
    except Exception:
        pass
    if "v7" in kind or "7x" in kind:
        return jnp.bfloat16
    return jnp.int8 if _int8_mxu_probe() else jnp.bfloat16


# ------------------------------- Pallas kernels ------------------------------ #

def _quant_kernel(x_ref, s_ref, b_ref, o_ref, *, qp):
    """Fused bn0 + unsigned LSQ act quant: codes = clip(round(x*s + b), 0, qp)."""
    y = x_ref[...] * s_ref[...] + b_ref[...]
    o_ref[...] = jnp.clip(jnp.round(y), 0.0, qp).astype(o_ref.dtype)


def _conv_mm_kernel(*refs, epilogue, qp):
    """Tiled matmul on low-bit codes with a fused epilogue.

    refs layout: a, b, post_scale, [post_bias], [residual], o, acc
      epilogue "quant": o = clip(round(acc * post_s + post_b), 0, qp)   (code dtype)
      epilogue "add":   o = acc * post_s + residual                      (f32)
      epilogue "scale": o = acc * post_s                                 (f32)
    """
    it = iter(refs)
    a_ref = next(it)
    b_ref = next(it)
    post_s_ref = next(it)
    post_b_ref = next(it) if epilogue == "quant" else None
    res_ref = next(it) if epilogue == "add" else None
    o_ref = next(it)
    acc_ref = next(it)

    k = pl.program_id(2)

    @pl.when(k == 0)
    def _init():
        acc_ref[...] = jnp.zeros_like(acc_ref)

    # int8 codes -> int32 acc on v5e/v6e; bf16 codes -> f32 acc otherwise.
    acc_ref[...] += jnp.dot(a_ref[...], b_ref[...],
                            preferred_element_type=acc_ref.dtype)

    @pl.when(k == pl.num_programs(2) - 1)
    def _finalize():
        acc = acc_ref[...].astype(jnp.float32)
        if epilogue == "quant":
            y = acc * post_s_ref[...] + post_b_ref[...]
            o_ref[...] = jnp.clip(jnp.round(y), 0.0, qp).astype(o_ref.dtype)
        elif epilogue == "add":
            o_ref[...] = (acc * post_s_ref[...] + res_ref[...]).astype(o_ref.dtype)
        else:  # "scale"
            o_ref[...] = (acc * post_s_ref[...]).astype(o_ref.dtype)


# ----------------------------- Pallas call wrappers -------------------------- #

def _quantize_codes(x2d, scale, bias, *, qp, code_dtype):
    """Materialize bn0+act0 activation codes once (lane-dense, code dtype)."""
    M, C = x2d.shape
    assert C % LANE == 0
    limit = _vmem_limit_bytes()
    budget = int(limit * 0.85)
    obytes = np.dtype(code_dtype).itemsize

    tm = min(1024, _round_up(M, LANE))
    while tm > LANE and 2 * tm * C * (4 + obytes) > budget:
        tm -= LANE
    Mp = _round_up(M, tm)
    if Mp // tm < 2 and tm >= 2 * LANE:        # let the v7x megacore split the M axis
        tm //= 2
        Mp = _round_up(M, tm)

    xp = jnp.pad(x2d, ((0, Mp - M), (0, 0))) if Mp != M else x2d
    out = pl.pallas_call(
        functools.partial(_quant_kernel, qp=float(qp)),
        out_shape=jax.ShapeDtypeStruct((Mp, C), code_dtype),
        grid=(Mp // tm,),
        in_specs=[pl.BlockSpec((tm, C), lambda i: (i, 0)),
                  pl.BlockSpec((1, C), lambda i: (0, 0)),
                  pl.BlockSpec((1, C), lambda i: (0, 0))],
        out_specs=pl.BlockSpec((tm, C), lambda i: (i, 0)),
        compiler_params=pltpu.CompilerParams(
            dimension_semantics=("parallel",),
            vmem_limit_bytes=limit),
    )(xp, scale.reshape(1, C), bias.reshape(1, C))
    return out[:M] if Mp != M else out


def _tiled_conv_mm(a, b, per_n, residual=None, *, epilogue, qp, out_dtype):
    """Tiled, pipelined (M,K)@(K,N) on code operands with a fused epilogue."""
    M, K = a.shape
    Kb, N = b.shape
    assert K == Kb and K % LANE == 0 and N % LANE == 0

    limit = _vmem_limit_bytes()
    budget = int(limit * 0.85)
    abytes = a.dtype.itemsize
    bbytes = b.dtype.itemsize
    obytes = np.dtype(out_dtype).itemsize
    acc_dtype = jnp.int32 if a.dtype == jnp.int8 else jnp.float32

    # Full-N weight residency whenever it fits; tile K only when very large.
    tn = N if N <= 1024 else _pick_tile(N, 1024)
    tk = K if K <= 2048 else _pick_tile(K, 2048)

    def footprint(tm):
        f = 2 * tm * tk * abytes            # A, double-buffered
        f += 2 * tk * tn * bbytes           # B, double-buffered
        f += tm * tn * 4                    # accumulator scratch
        f += 2 * tm * tn * obytes           # output, double-buffered
        f += 4 * tn * 4                     # per-N scale / bias
        if residual is not None:
            f += 2 * tm * tn * 4            # residual, double-buffered
        return f

    tm = min(1024, _round_up(M, LANE))
    while tm > LANE and footprint(tm) > budget:
        tm -= LANE
    Mp = _round_up(M, tm)
    if Mp // tm < 2 and tm >= 2 * LANE:      # keep >= 2 parallel M blocks for v7x megacore
        tm //= 2
        Mp = _round_up(M, tm)

    if Mp != M:
        a = jnp.pad(a, ((0, Mp - M), (0, 0)))
        if residual is not None:
            residual = jnp.pad(residual, ((0, Mp - M), (0, 0)))

    grid = (Mp // tm, N // tn, K // tk)
    kern = functools.partial(_conv_mm_kernel, epilogue=epilogue, qp=float(qp))

    args = [a, b]
    in_specs = [pl.BlockSpec((tm, tk), lambda i, j, k: (i, k)),
                pl.BlockSpec((tk, tn), lambda i, j, k: (k, j))]
    for v in per_n:
        args.append(v.reshape(1, N).astype(jnp.float32))
        in_specs.append(pl.BlockSpec((1, tn), lambda i, j, k: (0, j)))
    if residual is not None:
        args.append(residual.astype(jnp.float32))
        in_specs.append(pl.BlockSpec((tm, tn), lambda i, j, k: (i, j)))

    out = pl.pallas_call(
        kern,
        out_shape=jax.ShapeDtypeStruct((Mp, N), out_dtype),
        grid=grid,
        in_specs=in_specs,
        out_specs=pl.BlockSpec((tm, tn), lambda i, j, k: (i, j)),
        scratch_shapes=[pltpu.VMEM((tm, tn), acc_dtype)],
        compiler_params=pltpu.CompilerParams(
            dimension_semantics=("parallel", "parallel", "arbitrary"),
            vmem_limit_bytes=limit),
    )(*args)
    return out[:M] if Mp != M else out


# ---------------------------- pure-JAX reference ops ------------------------- #

def _ref_quantize(x2d, scale, bias, *, qp, code_dtype):
    y = x2d * scale[None, :] + bias[None, :]
    return jnp.clip(jnp.round(y), 0.0, qp).astype(code_dtype)


def _ref_conv_mm(a, b, per_n, residual=None, *, epilogue, qp, out_dtype):
    acc = jnp.dot(a.astype(jnp.float32), b.astype(jnp.float32))
    s = per_n[0][None, :]
    if epilogue == "quant":
        return jnp.clip(jnp.round(acc * s + per_n[1][None, :]), 0.0, qp).astype(out_dtype)
    if epilogue == "add":
        return (acc * s + residual).astype(out_dtype)
    return (acc * s).astype(out_dtype)


# --------------------------------- JAX glue ---------------------------------- #

def _im2col(x_nhwc, ksize, stride, padding):
    """Patch extraction (pure slicing). Rows (kh,kw,ci)-ordered. Returns (N*Ho*Wo, k*k*C)."""
    N, H, W, C = x_nhwc.shape
    xp = jnp.pad(x_nhwc, ((0, 0), (padding, padding), (padding, padding), (0, 0)))
    Ho = (H + 2 * padding - ksize) // stride + 1
    Wo = (W + 2 * padding - ksize) // stride + 1
    cols = []
    for kh in range(ksize):
        for kw in range(ksize):
            cols.append(xp[:, kh:kh + stride * Ho:stride, kw:kw + stride * Wo:stride, :])
    return jnp.concatenate(cols, axis=-1).reshape(N * Ho * Wo, ksize * ksize * C)


def _bn_affine(bn):
    scale = bn["gamma"] / jnp.sqrt(bn["var"] + EPS)
    bias = bn["beta"] - bn["mean"] * scale
    return scale, bias


def _lsq_weight_codes(w, wbit):
    """Signed per-output-channel LSQ fake quant -> (integer codes, per-channel scale)."""
    qp = 2.0 ** (wbit - 1) - 1.0
    qn = -(2.0 ** (wbit - 1))
    s = 2.0 * jnp.mean(jnp.abs(w), axis=(1, 2, 3)) / jnp.sqrt(qp)       # (Cout,)
    codes = jnp.clip(jnp.round(w / s[:, None, None, None]), qn, qp)
    return codes, s


def _weight_to_matmul_codes(codes, k_pad, cout_pad, dtype):
    """(Cout,Cin,KH,KW) codes -> (k_pad, cout_pad), rows (kh,kw,ci)-ordered, jointly padded."""
    Cout, Cin, KH, KW = codes.shape
    w = jnp.transpose(codes, (2, 3, 1, 0)).reshape(KH * KW * Cin, Cout)
    w = jnp.pad(w, ((0, k_pad - KH * KW * Cin), (0, cout_pad - Cout)))
    return w.astype(dtype)


def prepare_bottleneck(params, *, wbit, abit, code_dtype):
    """Once-per-model preprocessing: weight fake-quant, matmul layout, folded scales."""
    Cin = params["bn0"]["gamma"].shape[0]
    mid = params["w_conv0"].shape[0]
    Cexp = params["w_conv2"].shape[0]
    Cin_p, mid_p, Cexp_p = (_round_up(c, LANE) for c in (Cin, mid, Cexp))
    K1_p = _round_up(9 * mid, LANE)          # joint (kh,kw,ci) padding for the 3x3 conv
    qp_a = float(2 ** abit - 1)
    a_step = A_STEP

    s0, b0 = _bn_affine(params["bn0"])
    s1, b1 = _bn_affine(params["bn1"])
    s2, b2 = _bn_affine(params["bn2"])
    c0, sw0 = _lsq_weight_codes(params["w_conv0"], wbit)
    c1, sw1 = _lsq_weight_codes(params["w_conv1"], wbit)
    c2, sw2 = _lsq_weight_codes(params["w_conv2"], wbit)

    prep = {
        "Cin": Cin, "mid": mid, "Cexp": Cexp,
        "Cin_p": Cin_p, "mid_p": mid_p, "Cexp_p": Cexp_p, "K1_p": K1_p,
        "qp_a": qp_a, "code_dtype": code_dtype,
        # bn0 + act0 folded into per-input-channel scale/bias (codes = clip(round(x*s+b),0,qp))
        "pre_s0": _pad1d(s0 / a_step, Cin_p),
        "pre_b0": _pad1d(b0 / a_step, Cin_p),
        # conv0 codes + folded (w_scale*bn1/act1) epilogue -> next-layer activation codes
        "W0": _weight_to_matmul_codes(c0, Cin_p, mid_p, code_dtype),
        "post_s0": _pad1d(sw0 * s1, mid_p),          # the a_step factors cancel
        "post_b0": _pad1d(b1 / a_step, mid_p),
        # conv1 (3x3): joint K layout (kh,kw,ci) padded to K1_p
        "W1": _weight_to_matmul_codes(c1, K1_p, mid_p, code_dtype),
        "post_s1": _pad1d(sw1 * s2, mid_p),
        "post_b1": _pad1d(b2 / a_step, mid_p),
        # conv2 (expansion) -> real values, residual added in-kernel
        "W2": _weight_to_matmul_codes(c2, mid_p, Cexp_p, code_dtype),
        "post_s2": _pad1d(a_step * sw2, Cexp_p),
        "skip": None,
    }
    if params.get("w_skip") is not None:
        cs, sws = _lsq_weight_codes(params["w_skip"], wbit)
        prep["skip"] = {"W": _weight_to_matmul_codes(cs, Cin_p, Cexp_p, code_dtype),
                        "post_s": _pad1d(a_step * sws, Cexp_p)}
    return prep


# ------------------------------ PreActBottleneckQ ---------------------------- #

def _forward(x_nchw, prep, *, stride, quant_fn, mm_fn):
    x = jnp.transpose(x_nchw, (0, 2, 3, 1)).astype(jnp.float32)          # NCHW -> NHWC
    N, H, W, Cin = x.shape
    assert Cin == prep["Cin"]
    Cin_p, mid, mid_p, Cexp_p = prep["Cin_p"], prep["mid"], prep["mid_p"], prep["Cexp_p"]
    K1_p, qp_a, cdt = prep["K1_p"], prep["qp_a"], prep["code_dtype"]
    Ho = (H - 1) // stride + 1
    Wo = (W - 1) // stride + 1

    xpad = jnp.pad(x, ((0, 0), (0, 0), (0, 0), (0, Cin_p - Cin)))
    x2d = xpad.reshape(N * H * W, Cin_p)

    # out0 = act0(bn0(x)): codes materialized ONCE (low-bit), shared by conv0 and skip_conv.
    codes0 = quant_fn(x2d, prep["pre_s0"], prep["pre_b0"], qp=qp_a, code_dtype=cdt)

    # Note: skip_conv is not fused into conv0's matmul because with stride != 1 the two
    # matmuls have different M; sharing the materialized codes already removes the
    # duplicated prologue / f32 A reads.
    if prep["skip"] is not None:
        if stride == 1:
            codes0_s = codes0
        else:
            codes0_s = (codes0.reshape(N, H, W, Cin_p)[:, ::stride, ::stride, :]
                        .reshape(N * Ho * Wo, Cin_p))
        shortcut = mm_fn(codes0_s, prep["skip"]["W"], (prep["skip"]["post_s"],),
                         epilogue="scale", qp=qp_a, out_dtype=jnp.float32)
    else:
        assert stride == 1 and Cin == prep["Cexp"], \
            "identity shortcut requires stride == 1 and in_planes == out_planes * expansion"
        shortcut = x2d                                 # identity uses the *raw* input (as in PyTorch)

    # conv0 (1x1): bn1+act1 quantizing epilogue -> activation codes
    codes1 = mm_fn(codes0, prep["W0"], (prep["post_s0"], prep["post_b0"]),
                   epilogue="quant", qp=qp_a, out_dtype=cdt)

    # conv1 (3x3, stride, pad 1): im2col with JOINT K padding, bn2+act2 quantizing epilogue.
    # TODO(synk): replace JAX-side im2col with an in-kernel 9-tap shifted-window reduction.
    c1_nhwc = codes1[:, :mid].reshape(N, H, W, mid)
    p1 = _im2col(c1_nhwc, 3, stride, 1)                                  # (N*Ho*Wo, 9*mid)
    p1 = jnp.pad(p1, ((0, 0), (0, K1_p - 9 * mid)))
    codes2 = mm_fn(p1, prep["W1"], (prep["post_s1"], prep["post_b1"]),
                   epilogue="quant", qp=qp_a, out_dtype=cdt)

    # conv2 (1x1 expansion): residual add fused in the epilogue
    out2d = mm_fn(codes2, prep["W2"], (prep["post_s2"],), residual=shortcut,
                  epilogue="add", qp=qp_a, out_dtype=jnp.float32)

    out = out2d.reshape(N, Ho, Wo, Cexp_p)[..., :prep["Cexp"]]
    return jnp.transpose(out, (0, 3, 1, 2))                              # NHWC -> NCHW


def preact_bottleneck_q(x_nchw, prep, *, stride):
    return _forward(x_nchw, prep, stride=stride,
                    quant_fn=_quantize_codes, mm_fn=_tiled_conv_mm)


def preact_bottleneck_q_ref(x_nchw, prep, *, stride):
    return _forward(x_nchw, prep, stride=stride,
                    quant_fn=_ref_quantize, mm_fn=_ref_conv_mm)


# ------------------------------------ main ------------------------------------ #

def _bn_params(key, c):
    k1, k2, k3, k4 = jax.random.split(key, 4)
    return {
        "gamma": 1.0 + 0.1 * jax.random.normal(k1, (c,), jnp.float32),
        "beta": 0.1 * jax.random.normal(k2, (c,), jnp.float32),
        "mean": 0.1 * jax.random.normal(k3, (c,), jnp.float32),
        "var": 0.5 + jax.nn.softplus(jax.random.normal(k4, (c,), jnp.float32)),
    }


def _make_block_params(key, in_planes, out_planes, expansion, stride):
    ks = jax.random.split(key, 8)
    cexp = out_planes * expansion
    params = {
        "bn0": _bn_params(ks[0], in_planes),
        "w_conv0": 0.1 * jax.random.normal(ks[1], (out_planes, in_planes, 1, 1), jnp.float32),
        "bn1": _bn_params(ks[2], out_planes),
        "w_conv1": 0.1 * jax.random.normal(ks[3], (out_planes, out_planes, 3, 3), jnp.float32),
        "bn2": _bn_params(ks[4], out_planes),
        "w_conv2": 0.1 * jax.random.normal(ks[5], (cexp, out_planes, 1, 1), jnp.float32),
        "w_skip": None,
    }
    if stride != 1 or in_planes != cexp:
        params["w_skip"] = 0.1 * jax.random.normal(ks[6], (cexp, in_planes, 1, 1), jnp.float32)
    return params


if __name__ == "__main__":
    bit_list = (2, 4)
    wbit = abit = bit_list[-1]
    _vmem_limit_bytes()                                  # warm the trace-time HW query
    code_dtype = _code_dtype_for_backend(abit, wbit)     # int8 on v5e/v6e, bf16 otherwise

    key = jax.random.PRNGKey(0)
    k_p1, k_x1, k_p2, k_x2 = jax.random.split(key, 4)

    # (name, in_planes, out_planes(mid), stride, key_params, key_x)
    configs = [
        ("stride2_skip", 4, 8, 2, k_p1, k_x1),            # skip_conv branch
        ("stride1_identity", 32, 8, 1, k_p2, k_x2),       # identity-shortcut branch
    ]

    for name, cin, mid, stride, kp, kx in configs:
        params = _make_block_params(kp, cin, mid, 4, stride)
        prep = prepare_bottleneck(params, wbit=wbit, abit=abit, code_dtype=code_dtype)
        x = jax.random.normal(kx, (2, cin, 16, 16), jnp.float32)

        fwd = jax.jit(lambda xx, _p=prep, _s=stride: preact_bottleneck_q(xx, _p, stride=_s))
        out = jax.block_until_ready(fwd(x))

        # Pure-JAX reference with identical (folded, exact-integer) math.
        ref = jax.block_until_ready(preact_bottleneck_q_ref(x, prep, stride=stride))

        cexp = mid * 4
        ho = (16 - 1) // stride + 1
        assert out.shape == (2, cexp, ho, ho), (name, out.shape)
        assert out.dtype == jnp.float32
        diff = jnp.abs(out - ref)
        max_err = float(jnp.max(diff))
        bad_frac = float(jnp.mean((diff > 1e-2).astype(jnp.float32)))
        # The integer fast path is exact; allow only isolated round-at-.5 boundary flips.
        assert max_err < 0.25 and bad_frac < 1e-3, (name, max_err, bad_frac)

    print("KERNEL_OK")
</pallas_src>

<mosaic_0001>
module attributes {stable_mosaic.version = 11 : i64} {
  func.func @kern(%arg0: memref<256x128xi8, #tpu.memory_space<vmem>>, %arg1: memref<128x128xi8, #tpu.memory_space<vmem>>, %arg2: memref<256x128xi8, #tpu.memory_space<vmem>>) attributes {dimension_semantics = [], scalar_prefetch = 0 : i64, scratch_operands = 0 : i64, tpu.core_type = #tpu.core_type<tc>} {
    %c0 = arith.constant 0 : index
    %c0_0 = arith.constant 0 : index
    %0 = vector.load %arg0[%c0, %c0_0] : memref<256x128xi8, #tpu.memory_space<vmem>>, vector<256x128xi8>
    %c0_1 = arith.constant 0 : index
    %c0_2 = arith.constant 0 : index
    %1 = vector.load %arg1[%c0_1, %c0_2] : memref<128x128xi8, #tpu.memory_space<vmem>>, vector<128x128xi8>
    %cst = arith.constant dense<0> : vector<256x128xi32>
    %2 = tpu.matmul %0, %1, %cst {dimension_numbers = #tpu.dot_dimension_numbers<[1], [0], [0], [1], [0, 0, 1, 1], [], []>} : vector<256x128xi8>, vector<128x128xi8>, vector<256x128xi32> -> vector<256x128xi32>
    %c-127_i32 = arith.constant -127 : i32
    %c127_i32 = arith.constant 127 : i32
    %3 = vector.broadcast %c-127_i32 : i32 to vector<256x128xi32>
    %4 = arith.maxsi %3, %2 : vector<256x128xi32>
    %5 = vector.broadcast %c127_i32 : i32 to vector<256x128xi32>
    %6 = arith.minsi %5, %4 : vector<256x128xi32>
    %7 = arith.trunci %6 : vector<256x128xi32> to vector<256x128xi8>
    %c0_3 = arith.constant 0 : index
    %c0_4 = arith.constant 0 : index
    %8 = vector.load %arg2[%c0_3, %c0_4] : memref<256x128xi8, #tpu.memory_space<vmem>>, vector<256x128xi8>
    tpu.vector_store %arg2[%c0_3, %c0_4], %7 {strides = array<i32>} : memref<256x128xi8, #tpu.memory_space<vmem>>, vector<256x128xi8>,
    return
  }
}

module attributes {stable_mosaic.version = 11 : i64} {
  func.func @_quant_kernel(%arg0: i32, %arg1: memref<256x128xf32, #tpu.memory_space<vmem>>, %arg2: memref<1x128xf32, #tpu.memory_space<vmem>>, %arg3: memref<1x128xf32, #tpu.memory_space<vmem>>, %arg4: memref<256x128xbf16, #tpu.memory_space<vmem>>) attributes {dimension_semantics = [#tpu.dimension_semantics<parallel>], iteration_bounds = array<i64: 2>, scalar_prefetch = 0 : i64, scratch_operands = 0 : i64, tpu.core_type = #tpu.core_type<tc>, window_params = [{transform_indices = @transform_0, window_bounds = array<i64: 256, 128>}, {pipeline_mode = #tpu.pipeline_mode<synchronous>, transform_indices = @transform_1, window_bounds = array<i64: 1, 128>}, {pipeline_mode = #tpu.pipeline_mode<synchronous>, transform_indices = @transform_2, window_bounds = array<i64: 1, 128>}, {transform_indices = @transform_3, window_bounds = array<i64: 256, 128>}]} {
    %c0 = arith.constant 0 : index
    %c0_0 = arith.constant 0 : index
    %0 = vector.load %arg1[%c0, %c0_0] : memref<256x128xf32, #tpu.memory_space<vmem>>, vector<256x128xf32>
    %c0_1 = arith.constant 0 : index
    %c0_2 = arith.constant 0 : index
    %1 = vector.load %arg2[%c0_1, %c0_2] : memref<1x128xf32, #tpu.memory_space<vmem>>, vector<1x128xf32>
    %2 = vector.broadcast %1 : vector<1x128xf32> to vector<256x128xf32>
    %3 = arith.mulf %0, %2 : vector<256x128xf32>
    %c0_3 = arith.constant 0 : index
    %c0_4 = arith.constant 0 : index
    %4 = vector.load %arg3[%c0_3, %c0_4] : memref<1x128xf32, #tpu.memory_space<vmem>>, vector<1x128xf32>
    %5 = vector.broadcast %4 : vector<1x128xf32> to vector<256x128xf32>
    %6 = arith.addf %3, %5 : vector<256x128xf32>
    %7 = math.roundeven %6 : vector<256x128xf32>
    %cst = arith.constant 0.000000e+00 : f32
    %cst_5 = arith.constant 1.500000e+01 : f32
    %8 = vector.broadcast %cst : f32 to vector<256x128xf32>
    %9 = arith.maximumf %8, %7 : vector<256x128xf32>
    %10 = vector.broadcast %cst_5 : f32 to vector<256x128xf32>
    %11 = arith.minimumf %10, %9 : vector<256x128xf32>
    %12 = arith.truncf %11 : vector<256x128xf32> to vector<256x128xbf16>
    %c0_6 = arith.constant 0 : index
    %c0_7 = arith.constant 0 : index
    %13 = vector.load %arg4[%c0_6, %c0_7] : memref<256x128xbf16, #tpu.memory_space<vmem>>, vector<256x128xbf16>
    tpu.vector_store %arg4[%c0_6, %c0_7], %12 {strides = array<i32>} : memref<256x128xbf16, #tpu.memory_space<vmem>>, vector<256x128xbf16>,
    return
  }
  func.func @transform_0(%arg0: i32) -> (i32, i32) {
    %c0_i32 = arith.constant 0 : i32
    %c0_i32_0 = arith.constant 0 : i32
    return %arg0, %c0_i32 : i32, i32
  }
  func.func @transform_1(%arg0: i32) -> (i32, i32) {
    %c0_i32 = arith.constant 0 : i32
    %c0_i32_0 = arith.constant 0 : i32
    %c0_i32_1 = arith.constant 0 : i32
    return %c0_i32, %c0_i32_0 : i32, i32
  }
  func.func @transform_2(%arg0: i32) -> (i32, i32) {
    %c0_i32 = arith.constant 0 : i32
    %c0_i32_0 = arith.constant 0 : i32
    %c0_i32_1 = arith.constant 0 : i32
    return %c0_i32, %c0_i32_0 : i32, i32
  }
  func.func @transform_3(%arg0: i32) -> (i32, i32) {
    %c0_i32 = arith.constant 0 : i32
    %c0_i32_0 = arith.constant 0 : i32
    return %arg0, %c0_i32 : i32, i32
  }
}

module attributes {stable_mosaic.version = 11 : i64} {
  func.func @_conv_mm_kernel(%arg0: i32, %arg1: i32, %arg2: i32, %arg3: memref<128x128xbf16, #tpu.memory_space<vmem>>, %arg4: memref<128x128xbf16, #tpu.memory_space<vmem>>, %arg5: memref<1x128xf32, #tpu.memory_space<vmem>>, %arg6: memref<128x128xf32, #tpu.memory_space<vmem>>, %arg7: memref<128x128xf32, #tpu.memory_space<vmem>>) attributes {dimension_semantics = [#tpu.dimension_semantics<parallel>, #tpu.dimension_semantics<parallel>, #tpu.dimension_semantics<arbitrary>], iteration_bounds = array<i64: 1, 1, 1>, scalar_prefetch = 0 : i64, scratch_operands = 1 : i64, tpu.core_type = #tpu.core_type<tc>, window_params = [{transform_indices = @transform_0, window_bounds = array<i64: 128, 128>}, {transform_indices = @transform_1, window_bounds = array<i64: 128, 128>}, {transform_indices = @transform_2, window_bounds = array<i64: 1, 128>}, {transform_indices = @transform_3, window_bounds = array<i64: 128, 128>}]} {
    %c0_i32 = arith.constant 0 : i32
    %0 = arith.cmpi eq, %arg2, %c0_i32 : i32
    %1 = arith.extui %0 : i1 to i32
    %c0_i32_0 = arith.constant 0 : i32
    %2 = arith.cmpi ne, %1, %c0_i32_0 : i32
    scf.if %2 {
      %cst_10 = arith.constant 0.000000e+00 : f32
      %12 = vector.broadcast %cst_10 : f32 to vector<128x128xf32>
      %c0_11 = arith.constant 0 : index
      %c0_12 = arith.constant 0 : index
      %13 = vector.load %arg7[%c0_11, %c0_12] : memref<128x128xf32, #tpu.memory_space<vmem>>, vector<128x128xf32>
      tpu.vector_store %arg7[%c0_11, %c0_12], %12 {strides = array<i32>} : memref<128x128xf32, #tpu.memory_space<vmem>>, vector<128x128xf32>,
    } else {
    }
    %c0 = arith.constant 0 : index
    %c0_1 = arith.constant 0 : index
    %3 = vector.load %arg7[%c0, %c0_1] : memref<128x128xf32, #tpu.memory_space<vmem>>, vector<128x128xf32>
    %c0_2 = arith.constant 0 : index
    %c0_3 = arith.constant 0 : index
    %4 = vector.load %arg3[%c0_2, %c0_3] : memref<128x128xbf16, #tpu.memory_space<vmem>>, vector<128x128xbf16>
    %c0_4 = arith.constant 0 : index
    %c0_5 = arith.constant 0 : index
    %5 = vector.load %arg4[%c0_4, %c0_5] : memref<128x128xbf16, #tpu.memory_space<vmem>>, vector<128x128xbf16>
    %cst = arith.constant dense<0.000000e+00> : vector<128x128xf32>
    %6 = tpu.matmul %4, %5, %cst {dimension_numbers = #tpu.dot_dimension_numbers<[1], [0], [0], [1], [0, 0, 1, 1], [], []>} : vector<128x128xbf16>, vector<128x128xbf16>, vector<128x128xf32> -> vector<128x128xf32>
    %7 = arith.addf %3, %6 : vector<128x128xf32>
    %c0_6 = arith.constant 0 : index
    %c0_7 = arith.constant 0 : index
    %8 = vector.load %arg7[%c0_6, %c0_7] : memref<128x128xf32, #tpu.memory_space<vmem>>, vector<128x128xf32>
    tpu.vector_store %arg7[%c0_6, %c0_7], %7 {strides = array<i32>} : memref<128x128xf32, #tpu.memory_space<vmem>>, vector<128x128xf32>,
    %c0_i32_8 = arith.constant 0 : i32
    %9 = arith.cmpi eq, %arg2, %c0_i32_8 : i32
    %10 = arith.extui %9 : i1 to i32
    %c0_i32_9 = arith.constant 0 : i32
    %11 = arith.cmpi ne, %10, %c0_i32_9 : i32
    scf.if %11 {
      %c0_10 = arith.constant 0 : index
      %c0_11 = arith.constant 0 : index
      %12 = vector.load %arg7[%c0_10, %c0_11] : memref<128x128xf32, #tpu.memory_space<vmem>>, vector<128x128xf32>
      %c0_12 = arith.constant 0 : index
      %c0_13 = arith.constant 0 : index
      %13 = vector.load %arg5[%c0_12, %c0_13] : memref<1x128xf32, #tpu.memory_space<vmem>>, vector<1x128xf32>
      %14 = vector.broadcast %13 : vector<1x128xf32> to vector<128x128xf32>
      %15 = arith.mulf %12, %14 : vector<128x128xf32>
      %c0_14 = arith.constant 0 : index
      %c0_15 = arith.constant 0 : index
      %16 = vector.load %arg6[%c0_14, %c0_15] : memref<128x128xf32, #tpu.memory_space<vmem>>, vector<128x128xf32>
      tpu.vector_store %arg6[%c0_14, %c0_15], %15 {strides = array<i32>} : memref<128x128xf32, #tpu.memory_space<vmem>>, vector<128x128xf32>,
    } else {
    }
    return
  }
  func.func @transform_0(%arg0: i32, %arg1: i32, %arg2: i32) -> (i32, i32) {
    %c0_i32 = arith.constant 0 : i32
    return %arg0, %arg2 : i32, i32
  }
  func.func @transform_1(%arg0: i32, %arg1: i32, %arg2: i32) -> (i32, i32) {
    %c0_i32 = arith.constant 0 : i32
    return %arg2, %arg1 : i32, i32
  }
  func.func @transform_2(%arg0: i32, %arg1: i32, %arg2: i32) -> (i32, i32) {
    %c0_i32 = arith.constant 0 : i32
    %c0_i32_0 = arith.constant 0 : i32
    return %c0_i32, %arg1 : i32, i32
  }
  func.func @transform_3(%arg0: i32, %arg1: i32, %arg2: i32) -> (i32, i32) {
    %c0_i32 = arith.constant 0 : i32
    return %arg0, %arg1 : i32, i32
  }
}

module attributes {stable_mosaic.version = 11 : i64} {
  func.func @_conv_mm_kernel(%arg0: i32, %arg1: i32, %arg2: i32, %arg3: memref<256x128xbf16, #tpu.memory_space<vmem>>, %arg4: memref<128x128xbf16, #tpu.memory_space<vmem>>, %arg5: memref<1x128xf32, #tpu.memory_space<vmem>>, %arg6: memref<1x128xf32, #tpu.memory_space<vmem>>, %arg7: memref<256x128xbf16, #tpu.memory_space<vmem>>, %arg8: memref<256x128xf32, #tpu.memory_space<vmem>>) attributes {dimension_semantics = [#tpu.dimension_semantics<parallel>, #tpu.dimension_semantics<parallel>, #tpu.dimension_semantics<arbitrary>], iteration_bounds = array<i64: 2, 1, 1>, scalar_prefetch = 0 : i64, scratch_operands = 1 : i64, tpu.core_type = #tpu.core_type<tc>, window_params = [{transform_indices = @transform_0, window_bounds = array<i64: 256, 128>}, {transform_indices = @transform_1, window_bounds = array<i64: 128, 128>}, {transform_indices = @transform_2, window_bounds = array<i64: 1, 128>}, {transform_indices = @transform_3, window_bounds = array<i64: 1, 128>}, {transform_indices = @transform_4, window_bounds = array<i64: 256, 128>}]} {
    %c0_i32 = arith.constant 0 : i32
    %0 = arith.cmpi eq, %arg2, %c0_i32 : i32
    %1 = arith.extui %0 : i1 to i32
    %c0_i32_0 = arith.constant 0 : i32
    %2 = arith.cmpi ne, %1, %c0_i32_0 : i32
    scf.if %2 {
      %cst_10 = arith.constant 0.000000e+00 : f32
      %12 = vector.broadcast %cst_10 : f32 to vector<256x128xf32>
      %c0_11 = arith.constant 0 : index
      %c0_12 = arith.constant 0 : index
      %13 = vector.load %arg8[%c0_11, %c0_12] : memref<256x128xf32, #tpu.memory_space<vmem>>, vector<256x128xf32>
      tpu.vector_store %arg8[%c0_11, %c0_12], %12 {strides = array<i32>} : memref<256x128xf32, #tpu.memory_space<vmem>>, vector<256x128xf32>,
    } else {
    }
    %c0 = arith.constant 0 : index
    %c0_1 = arith.constant 0 : index
    %3 = vector.load %arg8[%c0, %c0_1] : memref<256x128xf32, #tpu.memory_space<vmem>>, vector<256x128xf32>
    %c0_2 = arith.constant 0 : index
    %c0_3 = arith.constant 0 : index
    %4 = vector.load %arg3[%c0_2, %c0_3] : memref<256x128xbf16, #tpu.memory_space<vmem>>, vector<256x128xbf16>
    %c0_4 = arith.constant 0 : index
    %c0_5 = arith.constant 0 : index
    %5 = vector.load %arg4[%c0_4, %c0_5] : memref<128x128xbf16, #tpu.memory_space<vmem>>, vector<128x128xbf16>
    %cst = arith.constant dense<0.000000e+00> : vector<256x128xf32>
    %6 = tpu.matmul %4, %5, %cst {dimension_numbers = #tpu.dot_dimension_numbers<[1], [0], [0], [1], [0, 0, 1, 1], [], []>} : vector<256x128xbf16>, vector<128x128xbf16>, vector<256x128xf32> -> vector<256x128xf32>
    %7 = arith.addf %3, %6 : vector<256x128xf32>
    %c0_6 = arith.constant 0 : index
    %c0_7 = arith.constant 0 : index
    %8 = vector.load %arg8[%c0_6, %c0_7] : memref<256x128xf32, #tpu.memory_space<vmem>>, vector<256x128xf32>
    tpu.vector_store %arg8[%c0_6, %c0_7], %7 {strides = array<i32>} : memref<256x128xf32, #tpu.memory_space<vmem>>, vector<256x128xf32>,
    %c0_i32_8 = arith.constant 0 : i32
    %9 = arith.cmpi eq, %arg2, %c0_i32_8 : i32
    %10 = arith.extui %9 : i1 to i32
    %c0_i32_9 = arith.constant 0 : i32
    %11 = arith.cmpi ne, %10, %c0_i32_9 : i32
    scf.if %11 {
      %c0_10 = arith.constant 0 : index
      %c0_11 = arith.constant 0 : index
      %12 = vector.load %arg8[%c0_10, %c0_11] : memref<256x128xf32, #tpu.memory_space<vmem>>, vector<256x128xf32>
      %c0_12 = arith.constant 0 : index
      %c0_13 = arith.constant 0 : index
      %13 = vector.load %arg5[%c0_12, %c0_13] : memref<1x128xf32, #tpu.memory_space<vmem>>, vector<1x128xf32>
      %14 = vector.broadcast %13 : vector<1x128xf32> to vector<256x128xf32>
      %15 = arith.mulf %12, %14 : vector<256x128xf32>
      %c0_14 = arith.constant 0 : index
      %c0_15 = arith.constant 0 : index
      %16 = vector.load %arg6[%c0_14, %c0_15] : memref<1x128xf32, #tpu.memory_space<vmem>>, vector<1x128xf32>
      %17 = vector.broadcast %16 : vector<1x128xf32> to vector<256x128xf32>
      %18 = arith.addf %15, %17 : vector<256x128xf32>
      %19 = math.roundeven %18 : vector<256x128xf32>
      %cst_16 = arith.constant 0.000000e+00 : f32
      %cst_17 = arith.constant 1.500000e+01 : f32
      %20 = vector.broadcast %cst_16 : f32 to vector<256x128xf32>
      %21 = arith.maximumf %20, %19 : vector<256x128xf32>
      %22 = vector.broadcast %cst_17 : f32 to vector<256x128xf32>
      %23 = arith.minimumf %22, %21 : vector<256x128xf32>
      %24 = arith.truncf %23 : vector<256x128xf32> to vector<256x128xbf16>
      %c0_18 = arith.constant 0 : index
      %c0_19 = arith.constant 0 : index
      %25 = vector.load %arg7[%c0_18, %c0_19] : memref<256x128xbf16, #tpu.memory_space<vmem>>, vector<256x128xbf16>
      tpu.vector_store %arg7[%c0_18, %c0_19], %24 {strides = array<i32>} : memref<256x128xbf16, #tpu.memory_space<vmem>>, vector<256x128xbf16>,
    } else {
    }
    return
  }
  func.func @transform_0(%arg0: i32, %arg1: i32, %arg2: i32) -> (i32, i32) {
    %c0_i32 = arith.constant 0 : i32
    return %arg0, %arg2 : i32, i32
  }
  func.func @transform_1(%arg0: i32, %arg1: i32, %arg2: i32) -> (i32, i32) {
    %c0_i32 = arith.constant 0 : i32
    return %arg2, %arg1 : i32, i32
  }
  func.func @transform_2(%arg0: i32, %arg1: i32, %arg2: i32) -> (i32, i32) {
    %c0_i32 = arith.constant 0 : i32
    %c0_i32_0 = arith.constant 0 : i32
    return %c0_i32, %arg1 : i32, i32
  }
  func.func @transform_3(%arg0: i32, %arg1: i32, %arg2: i32) -> (i32, i32) {
    %c0_i32 = arith.constant 0 : i32
    %c0_i32_0 = arith.constant 0 : i32
    return %c0_i32, %arg1 : i32, i32
  }
  func.func @transform_4(%arg0: i32, %arg1: i32, %arg2: i32) -> (i32, i32) {
    %c0_i32 = arith.constant 0 : i32
    return %arg0, %arg1 : i32, i32
  }
}

module attributes {stable_mosaic.version = 11 : i64} {
  func.func @_conv_mm_kernel(%arg0: i32, %arg1: i32, %arg2: i32, %arg3: memref<128x128xbf16, #tpu.memory_space<vmem>>, %arg4: memref<128x128xbf16, #tpu.memory_space<vmem>>, %arg5: memref<1x128xf32, #tpu.memory_space<vmem>>, %arg6: memref<1x128xf32, #tpu.memory_space<vmem>>, %arg7: memref<128x128xbf16, #tpu.memory_space<vmem>>, %arg8: memref<128x128xf32, #tpu.memory_space<vmem>>) attributes {dimension_semantics = [#tpu.dimension_semantics<parallel>, #tpu.dimension_semantics<parallel>, #tpu.dimension_semantics<arbitrary>], iteration_bounds = array<i64: 1, 1, 1>, scalar_prefetch = 0 : i64, scratch_operands = 1 : i64, tpu.core_type = #tpu.core_type<tc>, window_params = [{transform_indices = @transform_0, window_bounds = array<i64: 128, 128>}, {transform_indices = @transform_1, window_bounds = array<i64: 128, 128>}, {transform_indices = @transform_2, window_bounds = array<i64: 1, 128>}, {transform_indices = @transform_3, window_bounds = array<i64: 1, 128>}, {transform_indices = @transform_4, window_bounds = array<i64: 128, 128>}]} {
    %c0_i32 = arith.constant 0 : i32
    %0 = arith.cmpi eq, %arg2, %c0_i32 : i32
    %1 = arith.extui %0 : i1 to i32
    %c0_i32_0 = arith.constant 0 : i32
    %2 = arith.cmpi ne, %1, %c0_i32_0 : i32
    scf.if %2 {
      %cst_10 = arith.constant 0.000000e+00 : f32
      %12 = vector.broadcast %cst_10 : f32 to vector<128x128xf32>
      %c0_11 = arith.constant 0 : index
      %c0_12 = arith.constant 0 : index
      %13 = vector.load %arg8[%c0_11, %c0_12] : memref<128x128xf32, #tpu.memory_space<vmem>>, vector<128x128xf32>
      tpu.vector_store %arg8[%c0_11, %c0_12], %12 {strides = array<i32>} : memref<128x128xf32, #tpu.memory_space<vmem>>, vector<128x128xf32>,
    } else {
    }
    %c0 = arith.constant 0 : index
    %c0_1 = arith.constant 0 : index
    %3 = vector.load %arg8[%c0, %c0_1] : memref<128x128xf32, #tpu.memory_space<vmem>>, vector<128x128xf32>
    %c0_2 = arith.constant 0 : index
    %c0_3 = arith.constant 0 : index
    %4 = vector.load %arg3[%c0_2, %c0_3] : memref<128x128xbf16, #tpu.memory_space<vmem>>, vector<128x128xbf16>
    %c0_4 = arith.constant 0 : index
    %c0_5 = arith.constant 0 : index
    %5 = vector.load %arg4[%c0_4, %c0_5] : memref<128x128xbf16, #tpu.memory_space<vmem>>, vector<128x128xbf16>
    %cst = arith.constant dense<0.000000e+00> : vector<128x128xf32>
    %6 = tpu.matmul %4, %5, %cst {dimension_numbers = #tpu.dot_dimension_numbers<[1], [0], [0], [1], [0, 0, 1, 1], [], []>} : vector<128x128xbf16>, vector<128x128xbf16>, vector<128x128xf32> -> vector<128x128xf32>
    %7 = arith.addf %3, %6 : vector<128x128xf32>
    %c0_6 = arith.constant 0 : index
    %c0_7 = arith.constant 0 : index
    %8 = vector.load %arg8[%c0_6, %c0_7] : memref<128x128xf32, #tpu.memory_space<vmem>>, vector<128x128xf32>
    tpu.vector_store %arg8[%c0_6, %c0_7], %7 {strides = array<i32>} : memref<128x128xf32, #tpu.memory_space<vmem>>, vector<128x128xf32>,
    %c0_i32_8 = arith.constant 0 : i32
    %9 = arith.cmpi eq, %arg2, %c0_i32_8 : i32
    %10 = arith.extui %9 : i1 to i32
    %c0_i32_9 = arith.constant 0 : i32
    %11 = arith.cmpi ne, %10, %c0_i32_9 : i32
    scf.if %11 {
      %c0_10 = arith.constant 0 : index
      %c0_11 = arith.constant 0 : index
      %12 = vector.load %arg8[%c0_10, %c0_11] : memref<128x128xf32, #tpu.memory_space<vmem>>, vector<128x128xf32>
      %c0_12 = arith.constant 0 : index
      %c0_13 = arith.constant 0 : index
      %13 = vector.load %arg5[%c0_12, %c0_13] : memref<1x128xf32, #tpu.memory_space<vmem>>, vector<1x128xf32>
      %14 = vector.broadcast %13 : vector<1x128xf32> to vector<128x128xf32>
      %15 = arith.mulf %12, %14 : vector<128x128xf32>
      %c0_14 = arith.constant 0 : index
      %c0_15 = arith.constant 0 : index
      %16 = vector.load %arg6[%c0_14, %c0_15] : memref<1x128xf32, #tpu.memory_space<vmem>>, vector<1x128xf32>
      %17 = vector.broadcast %16 : vector<1x128xf32> to vector<128x128xf32>
      %18 = arith.addf %15, %17 : vector<128x128xf32>
      %19 = math.roundeven %18 : vector<128x128xf32>
      %cst_16 = arith.constant 0.000000e+00 : f32
      %cst_17 = arith.constant 1.500000e+01 : f32
      %20 = vector.broadcast %cst_16 : f32 to vector<128x128xf32>
      %21 = arith.maximumf %20, %19 : vector<128x128xf32>
      %22 = vector.broadcast %cst_17 : f32 to vector<128x128xf32>
      %23 = arith.minimumf %22, %21 : vector<128x128xf32>
      %24 = arith.truncf %23 : vector<128x128xf32> to vector<128x128xbf16>
      %c0_18 = arith.constant 0 : index
      %c0_19 = arith.constant 0 : index
      %25 = vector.load %arg7[%c0_18, %c0_19] : memref<128x128xbf16, #tpu.memory_space<vmem>>, vector<128x128xbf16>
      tpu.vector_store %arg7[%c0_18, %c0_19], %24 {strides = array<i32>} : memref<128x128xbf16, #tpu.memory_space<vmem>>, vector<128x128xbf16>,
    } else {
    }
    return
  }
  func.func @transform_0(%arg0: i32, %arg1: i32, %arg2: i32) -> (i32, i32) {
    %c0_i32 = arith.constant 0 : i32
    return %arg0, %arg2 : i32, i32
  }
  func.func @transform_1(%arg0: i32, %arg1: i32, %arg2: i32) -> (i32, i32) {
    %c0_i32 = arith.constant 0 : i32
    return %arg2, %arg1 : i32, i32
  }
  func.func @transform_2(%arg0: i32, %arg1: i32, %arg2: i32) -> (i32, i32) {
    %c0_i32 = arith.constant 0 : i32
    %c0_i32_0 = arith.constant 0 : i32
    return %c0_i32, %arg1 : i32, i32
  }
  func.func @transform_3(%arg0: i32, %arg1: i32, %arg2: i32) -> (i32, i32) {
    %c0_i32 = arith.constant 0 : i32
    %c0_i32_0 = arith.constant 0 : i32
    return %c0_i32, %arg1 : i32, i32
  }
  func.func @transform_4(%arg0: i32, %arg1: i32, %arg2: i32) -> (i32, i32) {
    %c0_i32 = arith.constant 0 : i32
    return %arg0, %arg1 : i32, i32
  }
}

module attributes {stable_mosaic.version = 11 : i64} {
  func.func @_conv_mm_kernel(%arg0: i32, %arg1: i32, %arg2: i32, %arg3: memref<128x128xbf16, #tpu.memory_space<vmem>>, %arg4: memref<128x128xbf16, #tpu.memory_space<vmem>>, %arg5: memref<1x128xf32, #tpu.memory_space<vmem>>, %arg6: memref<128x128xf32, #tpu.memory_space<vmem>>, %arg7: memref<128x128xf32, #tpu.memory_space<vmem>>, %arg8: memref<128x128xf32, #tpu.memory_space<vmem>>) attributes {dimension_semantics = [#tpu.dimension_semantics<parallel>, #tpu.dimension_semantics<parallel>, #tpu.dimension_semantics<arbitrary>], iteration_bounds = array<i64: 1, 1, 1>, scalar_prefetch = 0 : i64, scratch_operands = 1 : i64, tpu.core_type = #tpu.core_type<tc>, window_params = [{transform_indices = @transform_0, window_bounds = array<i64: 128, 128>}, {transform_indices = @transform_1, window_bounds = array<i64: 128, 128>}, {transform_indices = @transform_2, window_bounds = array<i64: 1, 128>}, {transform_indices = @transform_3, window_bounds = array<i64: 128, 128>}, {transform_indices = @transform_4, window_bounds = array<i64: 128, 128>}]} {
    %c0_i32 = arith.constant 0 : i32
    %0 = arith.cmpi eq, %arg2, %c0_i32 : i32
    %1 = arith.extui %0 : i1 to i32
    %c0_i32_0 = arith.constant 0 : i32
    %2 = arith.cmpi ne, %1, %c0_i32_0 : i32
    scf.if %2 {
      %cst_10 = arith.constant 0.000000e+00 : f32
      %12 = vector.broadcast %cst_10 : f32 to vector<128x128xf32>
      %c0_11 = arith.constant 0 : index
      %c0_12 = arith.constant 0 : index
      %13 = vector.load %arg8[%c0_11, %c0_12] : memref<128x128xf32, #tpu.memory_space<vmem>>, vector<128x128xf32>
      tpu.vector_store %arg8[%c0_11, %c0_12], %12 {strides = array<i32>} : memref<128x128xf32, #tpu.memory_space<vmem>>, vector<128x128xf32>,
    } else {
    }
    %c0 = arith.constant 0 : index
    %c0_1 = arith.constant 0 : index
    %3 = vector.load %arg8[%c0, %c0_1] : memref<128x128xf32, #tpu.memory_space<vmem>>, vector<128x128xf32>
    %c0_2 = arith.constant 0 : index
    %c0_3 = arith.constant 0 : index
    %4 = vector.load %arg3[%c0_2, %c0_3] : memref<128x128xbf16, #tpu.memory_space<vmem>>, vector<128x128xbf16>
    %c0_4 = arith.constant 0 : index
    %c0_5 = arith.constant 0 : index
    %5 = vector.load %arg4[%c0_4, %c0_5] : memref<128x128xbf16, #tpu.memory_space<vmem>>, vector<128x128xbf16>
    %cst = arith.constant dense<0.000000e+00> : vector<128x128xf32>
    %6 = tpu.matmul %4, %5, %cst {dimension_numbers = #tpu.dot_dimension_numbers<[1], [0], [0], [1], [0, 0, 1, 1], [], []>} : vector<128x128xbf16>, vector<128x128xbf16>, vector<128x128xf32> -> vector<128x128xf32>
    %7 = arith.addf %3, %6 : vector<128x128xf32>
    %c0_6 = arith.constant 0 : index
    %c0_7 = arith.constant 0 : index
    %8 = vector.load %arg8[%c0_6, %c0_7] : memref<128x128xf32, #tpu.memory_space<vmem>>, vector<128x128xf32>
    tpu.vector_store %arg8[%c0_6, %c0_7], %7 {strides = array<i32>} : memref<128x128xf32, #tpu.memory_space<vmem>>, vector<128x128xf32>,
    %c0_i32_8 = arith.constant 0 : i32
    %9 = arith.cmpi eq, %arg2, %c0_i32_8 : i32
    %10 = arith.extui %9 : i1 to i32
    %c0_i32_9 = arith.constant 0 : i32
    %11 = arith.cmpi ne, %10, %c0_i32_9 : i32
    scf.if %11 {
      %c0_10 = arith.constant 0 : index
      %c0_11 = arith.constant 0 : index
      %12 = vector.load %arg8[%c0_10, %c0_11] : memref<128x128xf32, #tpu.memory_space<vmem>>, vector<128x128xf32>
      %c0_12 = arith.constant 0 : index
      %c0_13 = arith.constant 0 : index
      %13 = vector.load %arg5[%c0_12, %c0_13] : memref<1x128xf32, #tpu.memory_space<vmem>>, vector<1x128xf32>
      %14 = vector.broadcast %13 : vector<1x128xf32> to vector<128x128xf32>
      %15 = arith.mulf %12, %14 : vector<128x128xf32>
      %c0_14 = arith.constant 0 : index
      %c0_15 = arith.constant 0 : index
      %16 = vector.load %arg6[%c0_14, %c0_15] : memref<128x128xf32, #tpu.memory_space<vmem>>, vector<128x128xf32>
      %17 = arith.addf %15, %16 : vector<128x128xf32>
      %c0_16 = arith.constant 0 : index
      %c0_17 = arith.constant 0 : index
      %18 = vector.load %arg7[%c0_16, %c0_17] : memref<128x128xf32, #tpu.memory_space<vmem>>, vector<128x128xf32>
      tpu.vector_store %arg7[%c0_16, %c0_17], %17 {strides = array<i32>} : memref<128x128xf32, #tpu.memory_space<vmem>>, vector<128x128xf32>,
    } else {
    }
    return
  }
  func.func @transform_0(%arg0: i32, %arg1: i32, %arg2: i32) -> (i32, i32) {
    %c0_i32 = arith.constant 0 : i32
    return %arg0, %arg2 : i32, i32
  }
  func.func @transform_1(%arg0: i32, %arg1: i32, %arg2: i32) -> (i32, i32) {
    %c0_i32 = arith.constant 0 : i32
    return %arg2, %arg1 : i32, i32
  }
  func.func @transform_2(%arg0: i32, %arg1: i32, %arg2: i32) -> (i32, i32) {
    %c0_i32 = arith.constant 0 : i32
    %c0_i32_0 = arith.constant 0 : i32
    return %c0_i32, %arg1 : i32, i32
  }
  func.func @transform_3(%arg0: i32, %arg1: i32, %arg2: i32) -> (i32, i32) {
    %c0_i32 = arith.constant 0 : i32
    return %arg0, %arg1 : i32, i32
  }
  func.func @transform_4(%arg0: i32, %arg1: i32, %arg2: i32) -> (i32, i32) {
    %c0_i32 = arith.constant 0 : i32
    return %arg0, %arg1 : i32, i32
  }
}

</mosaic_0001>

<bundles_post_ra>
// kernel: tpu_custom_call.1
= control target key start
LH: loop header
LB: loop body
LE: loop exit
PB: predicated region body
PF: predicated region fallthrough
CT: control target
= control target key end

     0   :  { %7 = vsyncpa [#allocation3], 0  ;;  %s468_s0 = inlined_call_operand.hbm [shape: s8[256,128], index: 0, kind: input, shape index: {}]   ;;  %s469_s1 = inlined_call_operand.hbm [shape: s8[128,128], index: 1, kind: input, shape index: {}]   ;;  %s470_s2 = inlined_call_operand.hbm [shape: s8[256,128], index: 2, kind: output, shape index: {}]  }
   0x1   :  { %8 = vsyncpa [#allocation6], 0 }
   0x2   :  { %9 = vsyncpa [#allocation4], 0  ;;  %s14_s11 = sshll.u32 %s468_s0, 4  ;;  %s408_s12 = smov [#allocation2]   ;;  %s15_s11 = int_to_ptr.hbm [resolvable:$true] %s14_s11 }
   0x3   :  { %s16_s13 = sshll.u32 %s408_s12, 4  ;;  %s27_s16 = sshll.u32 %s469_s1, 4  ;;  %s17_s13 = int_to_ptr.vmem [resolvable:$true] %s16_s13  ;;  %s28_s16 = int_to_ptr.hbm [resolvable:$true] %s27_s16 }
   0x4   :  { %s409_s17 = smov 128   ;;  %s410_s18 = smov 8  }
   0x5   :  { %22 = dma.hbm_to_vmem [thread:$0]  %s15_s11, 1024, %s17_s13, [#allocation3], %s409_s17, %s409_s17, %s410_s18  }
   0x6   :  { %s411_s19 = smov [#allocation5]  }
   0x7   :  { %s29_s20 = sshll.u32 %s411_s19, 4  ;;  %s30_s20 = int_to_ptr.vmem [resolvable:$true] %s29_s20 }
   0x8   :  { %35 = dma.hbm_to_vmem [thread:$0]  %s28_s16, 512, %s30_s20, [#allocation6], %s409_s17, %s409_s17, %s410_s18  }
   0x9   :  { %402 = dma.done.wait [#allocation3], 1024  }
   0xa   :  { %403 = vsyncadd [#allocation3], 4294966272 }
   0xb   :  { %404 = dma.done.wait [#allocation6], 512  }
   0xc   :  { %405 = vsyncadd [#allocation6], 4294966784  ;;  %v55_v0 = vld [vmem:[#allocation5 + $0x18] sm:$0xff]  ;;  %v54_v1 = vld [vmem:[#allocation5 + $0x10] sm:$0xff]  ;;  %s412_s0 = smov [#allocation7]   ;;  %s299_s23 = sshll.u32 %s470_s2, 4  ;;  %s300_s23 = int_to_ptr.hbm [resolvable:$true] %s299_s23 }
   0xd   :  { %56 = vmatpush.s8.msra.mxu0 %v55_v0  ;;  %313 = vmatpush.s8.msra.mxu1 %v55_v0  ;;  %v53_v2 = vld [vmem:[#allocation5 + $0x8] sm:$0xff]  ;;  %v52_v3 = vld [vmem:[#allocation5] sm:$0xff]  ;;  %v46_v5 = vld [vmem:[#allocation2 + $0x10] sm:$0xff]  ;;  %s297_s1 = sshll.u32 %s412_s0, 4  ;;  %s298_s1 = int_to_ptr.vmem [resolvable:$true] %s297_s1 }
   0xe   :  { %314 = vmatpush.s8.msra.mxu2 %v55_v0  ;;  %315 = vmatpush.s8.msra.mxu3 %v55_v0  ;;  %v44_v4 = vld [vmem:[#allocation2] sm:$0xff]  ;;  %v50_v7 = vld [vmem:[#allocation2 + $0x30] sm:$0xff]  ;;  %v45_v8 = vld [vmem:[#allocation2 + $0x8] sm:$0xff] }
   0xf   :  { %v48_v6 = vld [vmem:[#allocation2 + $0x20] sm:$0xff]  ;;  %v47_v9 = vld [vmem:[#allocation2 + $0x18] sm:$0xff]  ;;  %v49_v10 = vld [vmem:[#allocation2 + $0x28] sm:$0xff] }
  0x10   :  { %v51_v11 = vld [vmem:[#allocation2 + $0x38] sm:$0xff] }
  0x11   :  { %57 = vmatpush.s8.msra.mxu0 %v54_v1  ;;  %316 = vmatpush.s8.msra.mxu1 %v54_v1 }
  0x12   :  { %317 = vmatpush.s8.msra.mxu2 %v54_v1  ;;  %318 = vmatpush.s8.msra.mxu3 %v54_v1 }
  0x15   :  { %58 = vmatpush.s8.msra.mxu0 %v53_v2  ;;  %319 = vmatpush.s8.msra.mxu1 %v53_v2 }
  0x16   :  { %320 = vmatpush.s8.msra.mxu2 %v53_v2  ;;  %321 = vmatpush.s8.msra.mxu3 %v53_v2 }
  0x19   :  { %59 = vmatpush.s8.msra.mxu0 %v52_v3  ;;  %322 = vmatpush.s8.msra.mxu1 %v52_v3 }
  0x1a   :  { %323 = vmatpush.s8.msra.mxu2 %v52_v3  ;;  %324 = vmatpush.s8.msra.mxu3 %v52_v3 }
  0x1c   :  { %60 = vmatmul.s8.vlgmr.msra.gmra.mxu0 %v44_v4  ;;  %78 = vmatmul.s8.vlgmr.msra.gmra.mxu1 %v46_v5 }
  0x1d   :  { %96 = vmatmul.s8.vlgmr.msra.gmra.mxu2 %v48_v6  ;;  %114 = vmatmul.s8.vlgmr.msra.gmra.mxu3 %v50_v7 }
  0x2c   :  { %69 = vmatmul.s8.gmra.mxu0 %v45_v8  ;;  %87 = vmatmul.s8.gmra.mxu1 %v47_v9 }
  0x2d   :  { %105 = vmatmul.s8.gmra.mxu2 %v49_v10  ;;  %123 = vmatmul.s8.gmra.mxu3 %v51_v11 }
  0x8f   :  { %v61_v12 = vpop.s32.mrf.mxu0  ;;  %v79_v13 = vpop.s32.mrf.mxu1 }
  0x90   :  { %vm133_vm0 = vcmp.gt.s32.totalorder %v61_v12, 4294967169  ;;  %vm149_vm1 = vcmp.gt.s32.totalorder %v79_v13, 4294967169 }
  0x91   :  { %v134_v14 = vsel %vm133_vm0, %v61_v12, 4294967169  ;;  %v150_v15 = vsel %vm149_vm1, %v79_v13, 4294967169 }
  0x92   :  { %vm197_vm2 = vcmp.lt.s32.totalorder %v134_v14, 127  ;;  %vm213_vm3 = vcmp.lt.s32.totalorder %v150_v15, 127 }
  0x93   :  { %v63_v16 = vpop.s32.mrf.mxu0  ;;  %v81_v17 = vpop.s32.mrf.mxu1  ;;  %v440_v20 = vsel %vm197_vm2, %v134_v14, 127  ;;  %v442_v21 = vsel %vm213_vm3, %v150_v15, 127 }
  0x94   :  { %vm135_vm4 = vcmp.gt.s32.totalorder %v63_v16, 4294967169  ;;  %vm151_vm5 = vcmp.gt.s32.totalorder %v81_v17, 4294967169 }
  0x95   :  { %v136_v18 = vsel %vm135_vm4, %v63_v16, 4294967169  ;;  %v152_v19 = vsel %vm151_vm5, %v81_v17, 4294967169 }
  0x96   :  { %vm199_vm6 = vcmp.lt.s32.totalorder %v136_v18, 127  ;;  %vm215_vm7 = vcmp.lt.s32.totalorder %v152_v19, 127  ;;  %v97_v22 = vpop.s32.mrf.mxu2  ;;  %v115_v23 = vpop.s32.mrf.mxu3 }
  0x97   :  { %v200_v24 = vsel %vm199_vm6, %v136_v18, 127  ;;  %v216_v25 = vsel %vm215_vm7, %v152_v19, 127  ;;  %vm165_vm8 = vcmp.gt.s32.totalorder %v97_v22, 4294967169  ;;  %vm181_vm9 = vcmp.gt.s32.totalorder %v115_v23, 4294967169  ;;  %v65_v26 = vpop.s32.mrf.mxu0  ;;  %v83_v27 = vpop.s32.mrf.mxu1 }
  0x98   :  { %v166_v28 = vsel %vm165_vm8, %v97_v22, 4294967169  ;;  %v182_v29 = vsel %vm181_vm9, %v115_v23, 4294967169  ;;  %vm137_vm12 = vcmp.gt.s32.totalorder %v65_v26, 4294967169  ;;  %vm153_vm13 = vcmp.gt.s32.totalorder %v83_v27, 4294967169 }
  0x99   :  { %vm229_vm10 = vcmp.lt.s32.totalorder %v166_v28, 127  ;;  %vm245_vm11 = vcmp.lt.s32.totalorder %v182_v29, 127  ;;  %v261_v30 = vpack.c.b16 %v200_v24, %v440_v20  ;;  %v267_v31 = vpack.c.b16 %v216_v25, %v442_v21 }
  0x9a   :  { %v138_v32 = vsel %vm137_vm12, %v65_v26, 4294967169  ;;  %v154_v33 = vsel %vm153_vm13, %v83_v27, 4294967169  ;;  %v99_v34 = vpop.s32.mrf.mxu2  ;;  %v117_v35 = vpop.s32.mrf.mxu3  ;;  %v447_v38 = vsel %vm229_vm10, %v166_v28, 127  ;;  %v450_v39 = vsel %vm245_vm11, %v182_v29, 127 }
  0x9b   :  { %vm201_vm14 = vcmp.lt.s32.totalorder %v138_v32, 127  ;;  %vm217_vm15 = vcmp.lt.s32.totalorder %v154_v33, 127  ;;  %vm167_vm0 = vcmp.gt.s32.totalorder %v99_v34, 4294967169  ;;  %vm183_vm1 = vcmp.gt.s32.totalorder %v117_v35, 4294967169  ;;  %v67_v36 = vpop.s32.mrf.mxu0  ;;  %v85_v37 = vpop.s32.mrf.mxu1 }
  0x9c   :  { %v168_v40 = vsel %vm167_vm0, %v99_v34, 4294967169  ;;  %v184_v41 = vsel %vm183_vm1, %v117_v35, 4294967169  ;;  %vm139_vm4 = vcmp.gt.s32.totalorder %v67_v36, 4294967169  ;;  %vm155_vm5 = vcmp.gt.s32.totalorder %v85_v37, 4294967169 }
  0x9d   :  { %vm231_vm2 = vcmp.lt.s32.totalorder %v168_v40, 127  ;;  %vm247_vm3 = vcmp.lt.s32.totalorder %v184_v41, 127  ;;  %v202_v42 = vsel %vm201_vm14, %v138_v32, 127  ;;  %v218_v43 = vsel %vm217_vm15, %v154_v33, 127 }
  0x9e   :  { %v140_v44 = vsel %vm139_vm4, %v67_v36, 4294967169  ;;  %v156_v45 = vsel %vm155_vm5, %v85_v37, 4294967169  ;;  %v101_v46 = vpop.s32.mrf.mxu2  ;;  %v119_v47 = vpop.s32.mrf.mxu3  ;;  %v232_v48 = vsel %vm231_vm2, %v168_v40, 127  ;;  %v248_v49 = vsel %vm247_vm3, %v184_v41, 127 }
  0x9f   :  { %vm203_vm6 = vcmp.lt.s32.totalorder %v140_v44, 127  ;;  %vm219_vm7 = vcmp.lt.s32.totalorder %v156_v45, 127  ;;  %v70_v50 = vpop.s32.mrf.mxu0  ;;  %v88_v51 = vpop.s32.mrf.mxu1  ;;  %vm169_vm8 = vcmp.gt.s32.totalorder %v101_v46, 4294967169  ;;  %vm185_vm9 = vcmp.gt.s32.totalorder %v119_v47, 4294967169 }
  0xa0   :  { %v204_v52 = vsel %vm203_vm6, %v140_v44, 127  ;;  %v220_v53 = vsel %vm219_vm7, %v156_v45, 127  ;;  %v170_v56 = vsel %vm169_vm8, %v101_v46, 4294967169  ;;  %v186_v57 = vsel %vm185_vm9, %v119_v47, 4294967169 }
  0xa1   :  { %v262_v54 = vpack.c.b16 %v204_v52, %v202_v42  ;;  %v268_v55 = vpack.c.b16 %v220_v53, %v218_v43  ;;  %vm233_vm10 = vcmp.lt.s32.totalorder %v170_v56, 127  ;;  %vm249_vm11 = vcmp.lt.s32.totalorder %v186_v57, 127 }
  0xa2   :  { %vm141_vm12 = vcmp.gt.s32.totalorder %v70_v50, 4294967169  ;;  %vm157_vm13 = vcmp.gt.s32.totalorder %v88_v51, 4294967169  ;;  %v103_v58 = vpop.s32.mrf.mxu2  ;;  %v121_v59 = vpop.s32.mrf.mxu3  ;;  %v273_v60 = vpack.c.b16 %v232_v48, %v447_v38  ;;  %v279_v61 = vpack.c.b16 %v248_v49, %v450_v39 }
  0xa3   :  { %v263_v62 = vpack.c.b8 %v262_v54, %v261_v30  ;;  %v269_v63 = vpack.c.b8 %v268_v55, %v267_v31  ;;  %v72_v0 = vpop.s32.mrf.mxu0  ;;  %v90_v1 = vpop.s32.mrf.mxu1  ;;  %v142_v2 = vsel %vm141_vm12, %v70_v50, 4294967169  ;;  %v158_v3 = vsel %vm157_vm13, %v88_v51, 4294967169 }
  0xa4   :  { %vm171_vm14 = vcmp.gt.s32.totalorder %v103_v58, 4294967169  ;;  %vm187_vm15 = vcmp.gt.s32.totalorder %v121_v59, 4294967169  ;;  %v234_v4 = vsel %vm233_vm10, %v170_v56, 127  ;;  %v250_v5 = vsel %vm249_vm11, %v186_v57, 127 }
  0xa5   :  { %285 = vst [vmem:[#allocation7] sm:$0xff] %v263_v62  ;;  %v172_v6 = vsel %vm171_vm14, %v103_v58, 4294967169  ;;  %v188_v7 = vsel %vm187_vm15, %v121_v59, 4294967169  ;;  %vm205_vm0 = vcmp.lt.s32.totalorder %v142_v2, 127  ;;  %vm221_vm1 = vcmp.lt.s32.totalorder %v158_v3, 127 }
  0xa6   :  { %287 = vst [vmem:[#allocation7 + $0x10] sm:$0xff] %v269_v63  ;;  %vm235_vm2 = vcmp.lt.s32.totalorder %v172_v6, 127  ;;  %vm251_vm3 = vcmp.lt.s32.totalorder %v188_v7, 127  ;;  %v106_v8 = vpop.s32.mrf.mxu2  ;;  %v124_v9 = vpop.s32.mrf.mxu3  ;;  %vm143_vm4 = vcmp.gt.s32.totalorder %v72_v0, 4294967169  ;;  %vm159_vm5 = vcmp.gt.s32.totalorder %v90_v1, 4294967169 }
  0xa7   :  { %v236_v10 = vsel %vm235_vm2, %v172_v6, 127  ;;  %v252_v11 = vsel %vm251_vm3, %v188_v7, 127  ;;  %v74_v12 = vpop.s32.mrf.mxu0  ;;  %v92_v13 = vpop.s32.mrf.mxu1  ;;  %v144_v16 = vsel %vm143_vm4, %v72_v0, 4294967169  ;;  %v160_v17 = vsel %vm159_vm5, %v90_v1, 4294967169 }
  0xa8   :  { %v274_v14 = vpack.c.b16 %v236_v10, %v234_v4  ;;  %v280_v15 = vpack.c.b16 %v252_v11, %v250_v5  ;;  %vm207_vm6 = vcmp.lt.s32.totalorder %v144_v16, 127  ;;  %vm223_vm7 = vcmp.lt.s32.totalorder %v160_v17, 127 }
  0xa9   :  { %v206_v22 = vsel %vm205_vm0, %v142_v2, 127  ;;  %v222_v23 = vsel %vm221_vm1, %v158_v3, 127  ;;  %v208_v24 = vsel %vm207_vm6, %v144_v16, 127  ;;  %v224_v25 = vsel %vm223_vm7, %v160_v17, 127 }
  0xaa   :  { %v275_v18 = vpack.c.b8 %v274_v14, %v273_v60  ;;  %v281_v19 = vpack.c.b8 %v280_v15, %v279_v61  ;;  %v108_v20 = vpop.s32.mrf.mxu2  ;;  %v126_v21 = vpop.s32.mrf.mxu3  ;;  %vm145_vm8 = vcmp.gt.s32.totalorder %v74_v12, 4294967169  ;;  %vm161_vm9 = vcmp.gt.s32.totalorder %v92_v13, 4294967169 }
  0xab   :  { %vm173_vm10 = vcmp.gt.s32.totalorder %v106_v8, 4294967169  ;;  %vm189_vm11 = vcmp.gt.s32.totalorder %v124_v9, 4294967169  ;;  %v146_v26 = vsel %vm145_vm8, %v74_v12, 4294967169  ;;  %v162_v27 = vsel %vm161_vm9, %v92_v13, 4294967169  ;;  %v76_v28 = vpop.s32.mrf.mxu0  ;;  %v94_v29 = vpop.s32.mrf.mxu1 }
  0xac   :  { %289 = vst [vmem:[#allocation7 + $0x20] sm:$0xff] %v275_v18  ;;  %vm209_vm12 = vcmp.lt.s32.totalorder %v146_v26, 127  ;;  %vm225_vm13 = vcmp.lt.s32.totalorder %v162_v27, 127  ;;  %vm175_vm14 = vcmp.gt.s32.totalorder %v108_v20, 4294967169  ;;  %vm191_vm15 = vcmp.gt.s32.totalorder %v126_v21, 4294967169 }
  0xad   :  { %291 = vst [vmem:[#allocation7 + $0x30] sm:$0xff] %v281_v19  ;;  %v264_v32 = vpack.c.b16 %v208_v24, %v206_v22  ;;  %v270_v33 = vpack.c.b16 %v224_v25, %v222_v23  ;;  %v176_v34 = vsel %vm175_vm14, %v108_v20, 4294967169  ;;  %v192_v35 = vsel %vm191_vm15, %v126_v21, 4294967169 }
  0xae   :  { %v110_v30 = vpop.s32.mrf.mxu2  ;;  %v128_v31 = vpop.s32.mrf.mxu3  ;;  %v174_v36 = vsel %vm173_vm10, %v106_v8, 4294967169  ;;  %v190_v37 = vsel %vm189_vm11, %v124_v9, 4294967169  ;;  %vm147_vm0 = vcmp.gt.s32.totalorder %v76_v28, 4294967169  ;;  %vm163_vm1 = vcmp.gt.s32.totalorder %v94_v29, 4294967169 }
  0xaf   :  { %v210_v38 = vsel %vm209_vm12, %v146_v26, 127  ;;  %v226_v39 = vsel %vm225_vm13, %v162_v27, 127  ;;  %v148_v40 = vsel %vm147_vm0, %v76_v28, 4294967169  ;;  %v164_v41 = vsel %vm163_vm1, %v94_v29, 4294967169 }
  0xb0   :  { %vm239_vm2 = vcmp.lt.s32.totalorder %v176_v34, 127  ;;  %vm255_vm3 = vcmp.lt.s32.totalorder %v192_v35, 127  ;;  %vm211_vm4 = vcmp.lt.s32.totalorder %v148_v40, 127  ;;  %vm227_vm5 = vcmp.lt.s32.totalorder %v164_v41, 127 }
  0xb1   :  { %v212_v44 = vsel %vm211_vm4, %v148_v40, 127  ;;  %v228_v45 = vsel %vm227_vm5, %v164_v41, 127  ;;  %vm177_vm6 = vcmp.gt.s32.totalorder %v110_v30, 4294967169  ;;  %vm193_vm7 = vcmp.gt.s32.totalorder %v128_v31, 4294967169 }
  0xb2   :  { %v112_v42 = vpop.s32.mrf.mxu2  ;;  %v130_v43 = vpop.s32.mrf.mxu3  ;;  %v265_v46 = vpack.c.b16 %v212_v44, %v210_v38  ;;  %v271_v47 = vpack.c.b16 %v228_v45, %v226_v39  ;;  %v178_v48 = vsel %vm177_vm6, %v110_v30, 4294967169  ;;  %v194_v49 = vsel %vm193_vm7, %v128_v31, 4294967169 }
  0xb3   :  { %vm237_vm8 = vcmp.lt.s32.totalorder %v174_v36, 127  ;;  %vm253_vm9 = vcmp.lt.s32.totalorder %v190_v37, 127  ;;  %vm179_vm10 = vcmp.gt.s32.totalorder %v112_v42, 4294967169  ;;  %vm195_vm11 = vcmp.gt.s32.totalorder %v130_v43, 4294967169 }
  0xb4   :  { %v266_v50 = vpack.c.b8 %v265_v46, %v264_v32  ;;  %v272_v51 = vpack.c.b8 %v271_v47, %v270_v33  ;;  %vm241_vm12 = vcmp.lt.s32.totalorder %v178_v48, 127  ;;  %vm257_vm13 = vcmp.lt.s32.totalorder %v194_v49, 127 }
  0xb5   :  { %v240_v52 = vsel %vm239_vm2, %v176_v34, 127  ;;  %v256_v53 = vsel %vm255_vm3, %v192_v35, 127  ;;  %v180_v54 = vsel %vm179_vm10, %v112_v42, 4294967169  ;;  %v196_v55 = vsel %vm195_vm11, %v130_v43, 4294967169 }
  0xb6   :  { %v238_v56 = vsel %vm237_vm8, %v174_v36, 127  ;;  %v254_v57 = vsel %vm253_vm9, %v190_v37, 127  ;;  %286 = vst [vmem:[#allocation7 + $0x8] sm:$0xff] %v266_v50  ;;  %vm243_vm14 = vcmp.lt.s32.totalorder %v180_v54, 127  ;;  %vm259_vm15 = vcmp.lt.s32.totalorder %v196_v55, 127 }
  0xb7   :  { %288 = vst [vmem:[#allocation7 + $0x18] sm:$0xff] %v272_v51  ;;  %v242_v58 = vsel %vm241_vm12, %v178_v48, 127  ;;  %v258_v59 = vsel %vm257_vm13, %v194_v49, 127  ;;  %v244_v60 = vsel %vm243_vm14, %v180_v54, 127  ;;  %v260_v61 = vsel %vm259_vm15, %v196_v55, 127 }
  0xb8   :  { %v276_v62 = vpack.c.b16 %v240_v52, %v238_v56  ;;  %v282_v63 = vpack.c.b16 %v256_v53, %v254_v57  ;;  %v277_v0 = vpack.c.b16 %v244_v60, %v242_v58  ;;  %v283_v1 = vpack.c.b16 %v260_v61, %v258_v59 }
  0xba   :  { %v278_v2 = vpack.c.b8 %v277_v0, %v276_v62  ;;  %v284_v3 = vpack.c.b8 %v283_v1, %v282_v63 }
  0xbc   :  { %290 = vst [vmem:[#allocation7 + $0x28] sm:$0xff] %v278_v2 }
  0xbd   :  { %292 = vst [vmem:[#allocation7 + $0x38] sm:$0xff] %v284_v3 }
  0xbe   :  { %305 = dma.vmem_to_hbm [thread:$0]  %s298_s1, 1024, %s300_s23, [#allocation4], %s409_s17, %s409_s17, %s410_s18  }
  0xbf   :  { %406 = dma.done.wait [#allocation4], 1024  }
  0xc0   :  { %407 = vsyncadd [#allocation4], 4294966272 }
  0xc1   :  { %310 = vsyncpa [#allocation3], 1 }
  0xc2   :  { %311 = vsyncpa [#allocation6], 1 }
  0xc3   :  { %312 = vsyncpa [#allocation4], 1 }

// kernel: _lambda_.5
= control target key start
LH: loop header
LB: loop body
LE: loop exit
PB: predicated region body
PF: predicated region fallthrough
CT: control target
= control target key end

     0   :  { %s894_s12 = smov 0   ;;  %s1221_s0 = inlined_call_operand.vmem [shape: f32[512,128], index: 0, kind: input, shape index: {}]   ;;  %s1222_s1 = inlined_call_operand.vmem [shape: f32[1,128], index: 1, kind: input, shape index: {}]   ;;  %s1223_s2 = inlined_call_operand.vmem [shape: f32[1,128], index: 2, kind: input, shape index: {}]   ;;  %s1224_s3 = inlined_call_operand.vmem [shape: bf16[512,128], index: 3, kind: output, shape index: {}]  }
   0x1 LB: > { %s494_s13 = sadd.s32 4294967295, %s872_s12   ;;  %p498_p0 = scmp.ge.s32.totalorder %s872_s12, 1  ;;  %s872_s12 = sphi %s894_s12, %s13_s12  }
   0x2   : > { %p138_p1 = scmp.lt.s32.totalorder %s872_s12, 3 }
   0x4   : > { %p139_p2 = pnand %p498_p0, %p138_p1 }
   0x5   : > { %s499_s14 = sshll.u32 (!%p139_p2), %s494_s13, 5 }
   0x6   : > { %142 = sbr.rel (%p139_p2) target bundleno = 124 (0x7c), region = 32  ;;  %p163_p3 = scmp.lt.s32.totalorder (!%p139_p2), %s499_s14, 63 }
   0xb   : > { %s1284_s14 = smov (!%p163_p3, %s499_s14), 63  ;;  %v907_v0 = vld [vmem:[%s1222_s1] ss:$0 sm:$0xff] }
   0xc   : > { %s500_s17 = sshll.u32 %s1284_s14, 3  ;;  %v918_v1 = vld [vmem:[%s1223_s2] ss:$0 sm:$0xff]  ;;  %s502_s23 = sshll.u32 %s1284_s14, 2 }
   0xd   : > { %s913_s20 = scalar_lea.vmem %s1221_s0, %s500_s17  ;;  %s985_s26 = scalar_lea.vmem %s1224_s3, %s502_s23 }
   0xe   : > { %v174_v2 = vld [vmem:[%s913_s20] sm:$0xff]  ;;  %v175_v3 = vld [vmem:[%s913_s20 + $0x8] sm:$0xff]  ;;  %v176_v4 = vld [vmem:[%s913_s20 + $0x10] sm:$0xff] }
   0xf   : > { %v210_v5 = vmul.f32 %v907_v0, %v174_v2  ;;  %v211_v6 = vmul.f32 %v907_v0, %v175_v3  ;;  %v177_v7 = vld [vmem:[%s913_s20 + $0x18] sm:$0xff]  ;;  %v212_v8 = vmul.f32 %v907_v0, %v176_v4  ;;  %v178_v9 = vld [vmem:[%s913_s20 + $0x20] sm:$0xff]  ;;  %v179_v10 = vld [vmem:[%s913_s20 + $0x28] sm:$0xff] }
  0x10   : > { %v213_v11 = vmul.f32 %v907_v0, %v177_v7  ;;  %v214_v12 = vmul.f32 %v907_v0, %v178_v9  ;;  %v215_v13 = vmul.f32 %v907_v0, %v179_v10  ;;  %v180_v14 = vld [vmem:[%s913_s20 + $0x30] sm:$0xff]  ;;  %v181_v15 = vld [vmem:[%s913_s20 + $0x38] sm:$0xff] }
  0x11   : > { %v246_v16 = vadd.f32 %v918_v1, %v210_v5  ;;  %v247_v17 = vadd.f32 %v918_v1, %v211_v6  ;;  %v248_v18 = vadd.f32 %v918_v1, %v212_v8  ;;  %v216_v19 = vmul.f32 %v907_v0, %v180_v14  ;;  %v185_v34 = vld [vmem:[%s913_s20 + $0x58] sm:$0xff] }
  0x12   : > { %v249_v20 = vadd.f32 %v918_v1, %v213_v11  ;;  %v250_v21 = vadd.f32 %v918_v1, %v214_v12  ;;  %v941_v22 = vadd.f32 %v918_v1, %v215_v13  ;;  %v217_v23 = vmul.f32 %v907_v0, %v181_v15 }
  0x13   : > { %v600_v24 = vand.u32 2147483647, %v246_v16  ;;  %v602_v25 = vcvt.f32.s32 %v246_v16  ;;  %v605_v26 = vand.u32 2147483648, %v246_v16  ;;  %v608_v27 = vand.u32 2147483647, %v247_v17 }
  0x14   : > { %v610_v28 = vcvt.f32.s32 %v247_v17  ;;  %v613_v29 = vand.u32 2147483648, %v247_v17  ;;  %v616_v30 = vand.u32 2147483647, %v248_v18  ;;  %v618_v31 = vcvt.f32.s32 %v248_v18 }
  0x15   : > { %vm944_vm0 = vcmp.lt.f32.partialorder %v600_v24, 8388608.0  ;;  %v603_v33 = vcvt.s32.f32 %v602_v25  ;;  %vm948_vm1 = vcmp.lt.f32.partialorder %v608_v27, 8388608.0  ;;  %v621_v35 = vand.u32 2147483648, %v248_v18 }
  0x16   : > { %v611_v36 = vcvt.s32.f32 %v610_v28  ;;  %vm952_vm2 = vcmp.lt.f32.partialorder %v616_v30, 8388608.0  ;;  %v619_v38 = vcvt.s32.f32 %v618_v31  ;;  %v624_v39 = vand.u32 2147483647, %v249_v20 }
  0x17   : > { %v604_v40 = vand.u32 2147483647, %v603_v33  ;;  %v626_v41 = vcvt.f32.s32 %v249_v20  ;;  %v629_v42 = vand.u32 2147483648, %v249_v20  ;;  %v632_v43 = vand.u32 2147483647, %v250_v21  ;;  %v184_v33 = vld [vmem:[%s913_s20 + $0x50] sm:$0xff] }
  0x18   : > { %v612_v44 = vand.u32 2147483647, %v611_v36  ;;  %v620_v45 = vand.u32 2147483647, %v619_v38  ;;  %vm956_vm3 = vcmp.lt.f32.partialorder %v624_v39, 8388608.0  ;;  %v634_v47 = vcvt.f32.s32 %v250_v21 }
  0x19   : > { %v606_v48 = vor.u32 %v605_v26, %v604_v40  ;;  %v627_v49 = vcvt.s32.f32 %v626_v41  ;;  %vm960_vm4 = vcmp.lt.f32.partialorder %v632_v43, 8388608.0  ;;  %v637_v51 = vand.u32 2147483648, %v250_v21 }
  0x1a   : > { %v614_v52 = vor.u32 %v613_v29, %v612_v44  ;;  %v622_v53 = vor.u32 %v621_v35, %v620_v45  ;;  %v635_v54 = vcvt.s32.f32 %v634_v47  ;;  %v640_v55 = vand.u32 2147483647, %v941_v22  ;;  %v183_v29 = vld [vmem:[%s913_s20 + $0x48] sm:$0xff]  ;;  %v186_v35 = vld [vmem:[%s913_s20 + $0x60] sm:$0xff] }
  0x1b   : > { %v607_v56 = vsel %vm944_vm0, %v606_v48, %v246_v16  ;;  %v628_v57 = vand.u32 2147483647, %v627_v49  ;;  %v642_v58 = vcvt.f32.s32 %v941_v22  ;;  %v645_v59 = vand.u32 2147483648, %v941_v22 }
  0x1c   : > { %v615_v60 = vsel %vm948_vm1, %v614_v52, %v247_v17  ;;  %v310_v61 = vmax.f32 %v607_v56, 0.0  ;;  %v623_v62 = vsel %vm952_vm2, %v622_v53, %v248_v18  ;;  %v636_v63 = vand.u32 2147483647, %v635_v54 }
  0x1d   : > { %v311_v2 = vmax.f32 %v615_v60, 0.0  ;;  %v630_v3 = vor.u32 %v629_v42, %v628_v57  ;;  %v312_v4 = vmax.f32 %v623_v62, 0.0  ;;  %vm974_vm5 = vcmp.lt.f32.partialorder %v640_v55, 8388608.0 }
  0x1e   : > { %v342_v6 = vmin.f32 %v310_v61, 15.0  ;;  %v638_v7 = vor.u32 %v637_v51, %v636_v63  ;;  %v643_v8 = vcvt.s32.f32 %v642_v58  ;;  %v252_v9 = vadd.f32 %v918_v1, %v216_v19 }
  0x1f   : > { %v343_v10 = vmin.f32 %v311_v2, 15.0  ;;  %v631_v11 = vsel %vm956_vm3, %v630_v3, %v249_v20  ;;  %v344_v12 = vmin.f32 %v312_v4, 15.0  ;;  %v253_v13 = vadd.f32 %v918_v1, %v217_v23  ;;  %v182_v23 = vld [vmem:[%s913_s20 + $0x40] sm:$0xff] }
  0x20   : > { %v313_v14 = vmax.f32 %v631_v11, 0.0  ;;  %v639_v15 = vsel %vm960_vm4, %v638_v7, %v250_v21  ;;  %v644_v16 = vand.u32 2147483647, %v643_v8  ;;  %v648_v17 = vand.u32 2147483647, %v252_v9 }
  0x21   : > { %v508_v18 = vpack.c.bf16 %v343_v10, %v342_v6  ;;  %v314_v19 = vmax.f32 %v639_v15, 0.0  ;;  %v650_v20 = vcvt.f32.s32 %v252_v9  ;;  %v653_v24 = vand.u32 2147483648, %v252_v9 }
  0x22   : > { %v345_v25 = vmin.f32 %v313_v14, 15.0  ;;  %v646_v26 = vor.u32 %v645_v59, %v644_v16  ;;  %vm990_vm6 = vcmp.lt.f32.partialorder %v648_v17, 8388608.0  ;;  %v656_v28 = vand.u32 2147483647, %v253_v13  ;;  %v187_v17 = vld [vmem:[%s913_s20 + $0x68] sm:$0xff] }
  0x23   : > { %509 = vst [vmem:[%s985_s26] sm:$0xff] %v508_v18   ;;  %v346_v21 = vmin.f32 %v314_v19, 15.0  ;;  %v651_v30 = vcvt.s32.f32 %v650_v20  ;;  %v658_v31 = vcvt.f32.s32 %v253_v13  ;;  %v661_v32 = vand.u32 2147483648, %v253_v13 }
  0x24   : > { %v513_v36 = vpack.c.bf16 %v345_v25, %v344_v12  ;;  %v647_v37 = vsel %vm974_vm5, %v646_v26, %v941_v22  ;;  %vm1002_vm7 = vcmp.lt.f32.partialorder %v656_v28, 8388608.0  ;;  %v218_v39 = vmul.f32 %v907_v0, %v182_v23  ;;  %v188_v23 = vld [vmem:[%s913_s20 + $0x70] sm:$0xff]  ;;  %v189_v25 = vld [vmem:[%s913_s20 + $0x78] sm:$0xff] }
  0x25   : > { %v315_v40 = vmax.f32 %v647_v37, 0.0  ;;  %v652_v41 = vand.u32 2147483647, %v651_v30  ;;  %v659_v42 = vcvt.s32.f32 %v658_v31  ;;  %v219_v43 = vmul.f32 %v907_v0, %v183_v29 }
  0x26   : > { %585 = vst [vmem:[%s985_s26 + $0x8] sm:$0xff] %v513_v36   ;;  %v254_v44 = vadd.f32 %v918_v1, %v218_v39  ;;  %v220_v45 = vmul.f32 %v907_v0, %v184_v33  ;;  %v221_v46 = vmul.f32 %v907_v0, %v185_v34  ;;  %v222_v22 = vmul.f32 %v907_v0, %v186_v35 }
  0x27   : > { %v347_v47 = vmin.f32 %v315_v40, 15.0  ;;  %v654_v48 = vor.u32 %v653_v24, %v652_v41  ;;  %v660_v49 = vand.u32 2147483647, %v659_v42  ;;  %v255_v50 = vadd.f32 %v918_v1, %v219_v43 }
  0x28   : > { %v664_v51 = vand.u32 2147483647, %v254_v44  ;;  %v666_v52 = vcvt.f32.s32 %v254_v44  ;;  %v669_v53 = vand.u32 2147483648, %v254_v44  ;;  %v256_v54 = vadd.f32 %v918_v1, %v220_v45 }
  0x29   : > { %v518_v55 = vpack.c.bf16 %v347_v47, %v346_v21  ;;  %v655_v56 = vsel %vm990_vm6, %v654_v48, %v252_v9  ;;  %v662_v57 = vor.u32 %v661_v32, %v660_v49  ;;  %v672_v58 = vand.u32 2147483647, %v255_v50 }
  0x2a   : > { %v316_v59 = vmax.f32 %v655_v56, 0.0  ;;  %vm1017_vm8 = vcmp.lt.f32.partialorder %v664_v51, 8388608.0  ;;  %v667_v61 = vcvt.s32.f32 %v666_v52  ;;  %v674_v62 = vcvt.f32.s32 %v255_v50  ;;  %v190_v52 = vld [vmem:[%s913_s20 + $0x80] sm:$0xff] }
  0x2b   : > { %586 = vst [vmem:[%s985_s26 + $0x10] sm:$0xff] %v518_v55   ;;  %v663_v63 = vsel %vm1002_vm7, %v662_v57, %v253_v13  ;;  %vm1024_vm9 = vcmp.lt.f32.partialorder %v672_v58, 8388608.0  ;;  %v677_v3 = vand.u32 2147483648, %v255_v50  ;;  %v257_v4 = vadd.f32 %v918_v1, %v221_v46 }
  0x2c   : > { %v317_v5 = vmax.f32 %v663_v63, 0.0  ;;  %v348_v6 = vmin.f32 %v316_v59, 15.0  ;;  %v668_v7 = vand.u32 2147483647, %v667_v61  ;;  %v675_v8 = vcvt.s32.f32 %v674_v62 }
  0x2d   : > { %v680_v9 = vand.u32 2147483647, %v256_v54  ;;  %v682_v10 = vcvt.f32.s32 %v256_v54  ;;  %v685_v11 = vand.u32 2147483648, %v256_v54  ;;  %v688_v12 = vand.u32 2147483647, %v257_v4 }
  0x2e   : > { %v349_v14 = vmin.f32 %v317_v5, 15.0  ;;  %v670_v13 = vor.u32 %v669_v53, %v668_v7  ;;  %v676_v15 = vand.u32 2147483647, %v675_v8  ;;  %v690_v16 = vcvt.f32.s32 %v257_v4 }
  0x2f   : > { %vm1030_vm10 = vcmp.lt.f32.partialorder %v680_v9, 8388608.0  ;;  %v683_v19 = vcvt.s32.f32 %v682_v10  ;;  %vm1034_vm11 = vcmp.lt.f32.partialorder %v688_v12, 8388608.0  ;;  %v693_v24 = vand.u32 2147483648, %v257_v4 }
  0x30   : > { %v523_v26 = vpack.c.bf16 %v349_v14, %v348_v6  ;;  %v671_v27 = vsel %vm1017_vm8, %v670_v13, %v254_v44  ;;  %v678_v28 = vor.u32 %v677_v3, %v676_v15  ;;  %v691_v29 = vcvt.s32.f32 %v690_v16  ;;  %v192_v16 = vld [vmem:[%s913_s20 + $0x90] sm:$0xff] }
  0x31   : > { %v318_v21 = vmax.f32 %v671_v27, 0.0  ;;  %v684_v30 = vand.u32 2147483647, %v683_v19  ;;  %v223_v31 = vmul.f32 %v907_v0, %v187_v17  ;;  %v258_v32 = vadd.f32 %v918_v1, %v222_v22  ;;  %v193_v17 = vld [vmem:[%s913_s20 + $0x98] sm:$0xff] }
  0x32   : > { %587 = vst [vmem:[%s985_s26 + $0x18] sm:$0xff] %v523_v26   ;;  %v679_v33 = vsel %vm1024_vm9, %v678_v28, %v255_v50  ;;  %v692_v34 = vand.u32 2147483647, %v691_v29  ;;  %v224_v35 = vmul.f32 %v907_v0, %v188_v23  ;;  %v225_v36 = vmul.f32 %v907_v0, %v189_v25 }
  0x33   : > { %v319_v37 = vmax.f32 %v679_v33, 0.0  ;;  %v350_v38 = vmin.f32 %v318_v21, 15.0  ;;  %v686_v39 = vor.u32 %v685_v11, %v684_v30  ;;  %v259_v40 = vadd.f32 %v918_v1, %v223_v31  ;;  %v191_v11 = vld [vmem:[%s913_s20 + $0x88] sm:$0xff] }
  0x34   : > { %v694_v41 = vor.u32 %v693_v24, %v692_v34  ;;  %v696_v42 = vand.u32 2147483647, %v258_v32  ;;  %v698_v43 = vcvt.f32.s32 %v258_v32  ;;  %v701_v44 = vand.u32 2147483648, %v258_v32 }
  0x35   : > { %v351_v45 = vmin.f32 %v319_v37, 15.0  ;;  %v687_v46 = vsel %vm1030_vm10, %v686_v39, %v256_v54  ;;  %v704_v22 = vand.u32 2147483647, %v259_v40  ;;  %v706_v47 = vcvt.f32.s32 %v259_v40 }
  0x36   : > { %v695_v48 = vsel %vm1034_vm11, %v694_v41, %v257_v4  ;;  %v320_v49 = vmax.f32 %v687_v46, 0.0  ;;  %vm1054_vm12 = vcmp.lt.f32.partialorder %v696_v42, 8388608.0  ;;  %v699_v51 = vcvt.s32.f32 %v698_v43 }
  0x37   : > { %v528_v53 = vpack.c.bf16 %v351_v45, %v350_v38  ;;  %v321_v55 = vmax.f32 %v695_v48, 0.0  ;;  %vm1059_vm13 = vcmp.lt.f32.partialorder %v704_v22, 8388608.0  ;;  %v707_v54 = vcvt.s32.f32 %v706_v47 }
  0x38   : > { %v352_v57 = vmin.f32 %v320_v49, 15.0  ;;  %v700_v58 = vand.u32 2147483647, %v699_v51  ;;  %v709_v59 = vand.u32 2147483648, %v259_v40  ;;  %v260_v60 = vadd.f32 %v918_v1, %v224_v35 }
  0x39   : > { %588 = vst [vmem:[%s985_s26 + $0x20] sm:$0xff] %v528_v53   ;;  %v353_v61 = vmin.f32 %v321_v55, 15.0  ;;  %v708_v62 = vand.u32 2147483647, %v707_v54  ;;  %v261_v63 = vadd.f32 %v918_v1, %v225_v36  ;;  %v226_v2 = vmul.f32 %v907_v0, %v190_v52 }
  0x3a   : > { %v702_v3 = vor.u32 %v701_v44, %v700_v58  ;;  %v712_v4 = vand.u32 2147483647, %v260_v60  ;;  %v714_v5 = vcvt.f32.s32 %v260_v60  ;;  %v717_v6 = vand.u32 2147483648, %v260_v60  ;;  %v194_v58 = vld [vmem:[%s913_s20 + $0xa0] sm:$0xff] }
  0x3b   : > { %v533_v7 = vpack.c.bf16 %v353_v61, %v352_v57  ;;  %v710_v8 = vor.u32 %v709_v59, %v708_v62  ;;  %v720_v9 = vand.u32 2147483647, %v261_v63  ;;  %v722_v10 = vcvt.f32.s32 %v261_v63 }
  0x3c   : > { %v703_v12 = vsel %vm1054_vm12, %v702_v3, %v258_v32  ;;  %vm1070_vm14 = vcmp.lt.f32.partialorder %v712_v4, 8388608.0  ;;  %v715_v13 = vcvt.s32.f32 %v714_v5  ;;  %v725_v15 = vand.u32 2147483648, %v261_v63 }
  0x3d   : > { %589 = vst [vmem:[%s985_s26 + $0x28] sm:$0xff] %v533_v7   ;;  %v711_v18 = vsel %vm1059_vm13, %v710_v8, %v259_v40  ;;  %v322_v19 = vmax.f32 %v703_v12, 0.0  ;;  %vm1079_vm15 = vcmp.lt.f32.partialorder %v720_v9, 8388608.0  ;;  %v723_v24 = vcvt.s32.f32 %v722_v10  ;;  %v197_v7 = vld [vmem:[%s913_s20 + $0xb8] sm:$0xff] }
  0x3e   : > { %v323_v23 = vmax.f32 %v711_v18, 0.0  ;;  %v716_v25 = vand.u32 2147483647, %v715_v13  ;;  %v227_v26 = vmul.f32 %v907_v0, %v191_v11  ;;  %v262_v27 = vadd.f32 %v918_v1, %v226_v2  ;;  %v196_v2 = vld [vmem:[%s913_s20 + $0xb0] sm:$0xff] }
  0x3f   : > { %v354_v28 = vmin.f32 %v322_v19, 15.0  ;;  %v724_v29 = vand.u32 2147483647, %v723_v24  ;;  %v228_v21 = vmul.f32 %v907_v0, %v192_v16  ;;  %v229_v30 = vmul.f32 %v907_v0, %v193_v17 }
  0x40   : > { %v355_v31 = vmin.f32 %v323_v23, 15.0  ;;  %v718_v32 = vor.u32 %v717_v6, %v716_v25  ;;  %v263_v33 = vadd.f32 %v918_v1, %v227_v26  ;;  %v728_v34 = vand.u32 2147483647, %v262_v27 }
  0x41   : > { %v726_v35 = vor.u32 %v725_v15, %v724_v29  ;;  %v730_v36 = vcvt.f32.s32 %v262_v27  ;;  %v733_v37 = vand.u32 2147483648, %v262_v27  ;;  %v264_v38 = vadd.f32 %v918_v1, %v228_v21 }
  0x42   : > { %v538_v39 = vpack.c.bf16 %v355_v31, %v354_v28  ;;  %v719_v40 = vsel %vm1070_vm14, %v718_v32, %v260_v60  ;;  %vm1091_vm0 = vcmp.lt.f32.partialorder %v728_v34, 8388608.0  ;;  %v736_v42 = vand.u32 2147483647, %v263_v33 }
  0x43   : > { %v727_v43 = vsel %vm1079_vm15, %v726_v35, %v261_v63  ;;  %v324_v44 = vmax.f32 %v719_v40, 0.0  ;;  %v731_v45 = vcvt.s32.f32 %v730_v36  ;;  %v738_v46 = vcvt.f32.s32 %v263_v33  ;;  %v195_v63 = vld [vmem:[%s913_s20 + $0xa8] sm:$0xff] }
  0x44   : > { %590 = vst [vmem:[%s985_s26 + $0x30] sm:$0xff] %v538_v39   ;;  %v325_v22 = vmax.f32 %v727_v43, 0.0  ;;  %vm1098_vm1 = vcmp.lt.f32.partialorder %v736_v42, 8388608.0  ;;  %v741_v48 = vand.u32 2147483648, %v263_v33  ;;  %v265_v49 = vadd.f32 %v918_v1, %v229_v30 }
  0x45   : > { %v356_v50 = vmin.f32 %v324_v44, 15.0  ;;  %v732_v51 = vand.u32 2147483647, %v731_v45  ;;  %v739_v52 = vcvt.s32.f32 %v738_v46  ;;  %v744_v53 = vand.u32 2147483647, %v264_v38 }
  0x46   : > { %v357_v55 = vmin.f32 %v325_v22, 15.0  ;;  %v746_v56 = vcvt.f32.s32 %v264_v38  ;;  %v749_v54 = vand.u32 2147483648, %v264_v38  ;;  %v752_v57 = vand.u32 2147483647, %v265_v49 }
  0x47   : > { %v734_v59 = vor.u32 %v733_v37, %v732_v51  ;;  %v740_v60 = vand.u32 2147483647, %v739_v52  ;;  %vm1104_vm2 = vcmp.lt.f32.partialorder %v744_v53, 8388608.0  ;;  %v754_v62 = vcvt.f32.s32 %v265_v49  ;;  %v198_v37 = vld [vmem:[%s913_s20 + $0xc0] sm:$0xff] }
  0x48   : > { %v543_v3 = vpack.c.bf16 %v357_v55, %v356_v50  ;;  %v747_v4 = vcvt.s32.f32 %v746_v56  ;;  %vm1110_vm3 = vcmp.lt.f32.partialorder %v752_v57, 8388608.0  ;;  %v757_v6 = vand.u32 2147483648, %v265_v49  ;;  %v199_v57 = vld [vmem:[%s913_s20 + $0xc8] sm:$0xff] }
  0x49   : > { %v735_v8 = vsel %vm1091_vm0, %v734_v59, %v262_v27  ;;  %v742_v9 = vor.u32 %v741_v48, %v740_v60  ;;  %v755_v10 = vcvt.s32.f32 %v754_v62  ;;  %v230_v11 = vmul.f32 %v907_v0, %v194_v58  ;;  %v200_v62 = vld [vmem:[%s913_s20 + $0xd0] sm:$0xff] }
  0x4a   : > { %591 = vst [vmem:[%s985_s26 + $0x38] sm:$0xff] %v543_v3   ;;  %v326_v12 = vmax.f32 %v735_v8, 0.0  ;;  %v748_v14 = vand.u32 2147483647, %v747_v4  ;;  %v231_v13 = vmul.f32 %v907_v0, %v195_v63  ;;  %v232_v15 = vmul.f32 %v907_v0, %v196_v2  ;;  %v201_v63 = vld [vmem:[%s913_s20 + $0xd8] sm:$0xff] }
  0x4b   : > { %v743_v16 = vsel %vm1098_vm1, %v742_v9, %v263_v33  ;;  %v756_v17 = vand.u32 2147483647, %v755_v10  ;;  %v266_v18 = vadd.f32 %v918_v1, %v230_v11  ;;  %v233_v19 = vmul.f32 %v907_v0, %v197_v7 }
  0x4c   : > { %v327_v20 = vmax.f32 %v743_v16, 0.0  ;;  %v358_v24 = vmin.f32 %v326_v12, 15.0  ;;  %v750_v23 = vor.u32 %v749_v54, %v748_v14  ;;  %v267_v25 = vadd.f32 %v918_v1, %v231_v13 }
  0x4d   : > { %v758_v26 = vor.u32 %v757_v6, %v756_v17  ;;  %v760_v27 = vand.u32 2147483647, %v266_v18  ;;  %v762_v28 = vcvt.f32.s32 %v266_v18  ;;  %v765_v29 = vand.u32 2147483648, %v266_v18 }
  0x4e   : > { %v359_v21 = vmin.f32 %v327_v20, 15.0  ;;  %v751_v30 = vsel %vm1104_vm2, %v750_v23, %v264_v38  ;;  %v768_v31 = vand.u32 2147483647, %v267_v25  ;;  %v770_v32 = vcvt.f32.s32 %v267_v25 }
  0x4f   : > { %v759_v33 = vsel %vm1110_vm3, %v758_v26, %v265_v49  ;;  %v328_v34 = vmax.f32 %v751_v30, 0.0  ;;  %vm1130_vm4 = vcmp.lt.f32.partialorder %v760_v27, 8388608.0  ;;  %v763_v36 = vcvt.s32.f32 %v762_v28 }
  0x50   : > { %v548_v39 = vpack.c.bf16 %v359_v21, %v358_v24  ;;  %v329_v40 = vmax.f32 %v759_v33, 0.0  ;;  %vm1135_vm5 = vcmp.lt.f32.partialorder %v768_v31, 8388608.0  ;;  %v771_v38 = vcvt.s32.f32 %v770_v32 }
  0x51   : > { %v360_v42 = vmin.f32 %v328_v34, 15.0  ;;  %v764_v43 = vand.u32 2147483647, %v763_v36  ;;  %v773_v44 = vand.u32 2147483648, %v267_v25  ;;  %v268_v45 = vadd.f32 %v918_v1, %v232_v15 }
  0x52   : > { %592 = vst [vmem:[%s985_s26 + $0x40] sm:$0xff] %v548_v39   ;;  %v361_v46 = vmin.f32 %v329_v40, 15.0  ;;  %v772_v22 = vand.u32 2147483647, %v771_v38  ;;  %v269_v47 = vadd.f32 %v918_v1, %v233_v19  ;;  %v234_v48 = vmul.f32 %v907_v0, %v198_v37 }
  0x53   : > { %v766_v49 = vor.u32 %v765_v29, %v764_v43  ;;  %v776_v50 = vand.u32 2147483647, %v268_v45  ;;  %v778_v51 = vcvt.f32.s32 %v268_v45  ;;  %v781_v52 = vand.u32 2147483648, %v268_v45 }
  0x54   : > { %v553_v53 = vpack.c.bf16 %v361_v46, %v360_v42  ;;  %v774_v55 = vor.u32 %v773_v44, %v772_v22  ;;  %v784_v56 = vand.u32 2147483647, %v269_v47  ;;  %v786_v54 = vcvt.f32.s32 %v269_v47  ;;  %v202_v42 = vld [vmem:[%s913_s20 + $0xe0] sm:$0xff]  ;;  %v203_v22 = vld [vmem:[%s913_s20 + $0xe8] sm:$0xff] }
  0x55   : > { %v767_v58 = vsel %vm1130_vm4, %v766_v49, %v266_v18  ;;  %vm1146_vm6 = vcmp.lt.f32.partialorder %v776_v50, 8388608.0  ;;  %v779_v60 = vcvt.s32.f32 %v778_v51  ;;  %v789_v61 = vand.u32 2147483648, %v269_v47  ;;  %v204_v51 = vld [vmem:[%s913_s20 + $0xf0] sm:$0xff] }
  0x56   : > { %593 = vst [vmem:[%s985_s26 + $0x48] sm:$0xff] %v553_v53   ;;  %v775_v2 = vsel %vm1135_vm5, %v774_v55, %v267_v25  ;;  %v330_v3 = vmax.f32 %v767_v58, 0.0  ;;  %vm1155_vm7 = vcmp.lt.f32.partialorder %v784_v56, 8388608.0  ;;  %v787_v5 = vcvt.s32.f32 %v786_v54 }
  0x57   : > { %v331_v6 = vmax.f32 %v775_v2, 0.0  ;;  %v780_v7 = vand.u32 2147483647, %v779_v60  ;;  %v235_v8 = vmul.f32 %v907_v0, %v199_v57  ;;  %v270_v9 = vadd.f32 %v918_v1, %v234_v48  ;;  %v205_v60 = vld [vmem:[%s913_s20 + $0xf8] sm:$0xff] }
  0x58   : > { %v362_v10 = vmin.f32 %v330_v3, 15.0  ;;  %v788_v11 = vand.u32 2147483647, %v787_v5  ;;  %v236_v12 = vmul.f32 %v907_v0, %v200_v62  ;;  %v237_v14 = vmul.f32 %v907_v0, %v201_v63 }
  0x59   : > { %v363_v13 = vmin.f32 %v331_v6, 15.0  ;;  %v782_v15 = vor.u32 %v781_v52, %v780_v7  ;;  %v271_v16 = vadd.f32 %v918_v1, %v235_v8  ;;  %v792_v17 = vand.u32 2147483647, %v270_v9 }
  0x5a   : > { %v790_v18 = vor.u32 %v789_v61, %v788_v11  ;;  %v794_v19 = vcvt.f32.s32 %v270_v9  ;;  %v797_v20 = vand.u32 2147483648, %v270_v9  ;;  %v272_v26 = vadd.f32 %v918_v1, %v236_v12 }
  0x5b   : > { %v558_v24 = vpack.c.bf16 %v363_v13, %v362_v10  ;;  %v783_v23 = vsel %vm1146_vm6, %v782_v15, %v268_v45  ;;  %v800_v25 = vand.u32 2147483647, %v271_v16  ;;  %v802_v21 = vcvt.f32.s32 %v271_v16 }
  0x5c   : > { %v791_v27 = vsel %vm1155_vm7, %v790_v18, %v269_v47  ;;  %v332_v28 = vmax.f32 %v783_v23, 0.0  ;;  %v795_v29 = vcvt.s32.f32 %v794_v19  ;;  %vm1170_vm8 = vcmp.lt.f32.partialorder %v792_v17, 8388608.0 }
  0x5d   : > { %594 = vst [vmem:[%s985_s26 + $0x50] sm:$0xff] %v558_v24   ;;  %v333_v30 = vmax.f32 %v791_v27, 0.0  ;;  %v805_v32 = vand.u32 2147483648, %v271_v16  ;;  %v273_v33 = vadd.f32 %v918_v1, %v237_v14  ;;  %v803_v36 = vcvt.s32.f32 %v802_v21 }
  0x5e   : > { %v364_v34 = vmin.f32 %v332_v28, 15.0  ;;  %v796_v35 = vand.u32 2147483647, %v795_v29  ;;  %v808_v37 = vand.u32 2147483647, %v272_v26  ;;  %vm1175_vm9 = vcmp.lt.f32.partialorder %v800_v25, 8388608.0 }
  0x5f   : > { %v365_v39 = vmin.f32 %v333_v30, 15.0  ;;  %v810_v41 = vcvt.f32.s32 %v272_v26  ;;  %v816_v38 = vand.u32 2147483647, %v273_v33  ;;  %v804_v44 = vand.u32 2147483647, %v803_v36 }
  0x60   : > { %v798_v43 = vor.u32 %v797_v20, %v796_v35  ;;  %v813_v45 = vand.u32 2147483648, %v272_v26  ;;  %v818_v46 = vcvt.f32.s32 %v273_v33  ;;  %vm1181_vm10 = vcmp.lt.f32.partialorder %v808_v37, 8388608.0 }
  0x61   : > { %v563_v47 = vpack.c.bf16 %v365_v39, %v364_v34  ;;  %v811_v49 = vcvt.s32.f32 %v810_v41  ;;  %v821_v50 = vand.u32 2147483648, %v273_v33  ;;  %v806_v53 = vor.u32 %v805_v32, %v804_v44 }
  0x62   : > { %v799_v52 = vsel %vm1170_vm8, %v798_v43, %v270_v9  ;;  %v819_v55 = vcvt.s32.f32 %v818_v46  ;;  %v238_v56 = vmul.f32 %v907_v0, %v202_v42  ;;  %vm1190_vm11 = vcmp.lt.f32.partialorder %v816_v38, 8388608.0 }
  0x63   : > { %595 = vst [vmem:[%s985_s26 + $0x58] sm:$0xff] %v563_v47   ;;  %v334_v54 = vmax.f32 %v799_v52, 0.0  ;;  %v812_v57 = vand.u32 2147483647, %v811_v49  ;;  %v239_v59 = vmul.f32 %v907_v0, %v203_v22  ;;  %v807_v61 = vsel %vm1175_vm9, %v806_v53, %v271_v16 }
  0x64   : > { %v820_v62 = vand.u32 2147483647, %v819_v55  ;;  %v274_v63 = vadd.f32 %v918_v1, %v238_v56  ;;  %v240_v2 = vmul.f32 %v907_v0, %v204_v51  ;;  %v335_v3 = vmax.f32 %v807_v61, 0.0 }
  0x65   : > { %v366_v4 = vmin.f32 %v334_v54, 15.0  ;;  %v814_v5 = vor.u32 %v813_v45, %v812_v57  ;;  %v275_v6 = vadd.f32 %v918_v1, %v239_v59  ;;  %v241_v10 = vmul.f32 %v907_v0, %v205_v60 }
  0x66   : > { %v822_v7 = vor.u32 %v821_v50, %v820_v62  ;;  %v824_v8 = vand.u32 2147483647, %v274_v63  ;;  %v826_v9 = vcvt.f32.s32 %v274_v63  ;;  %v367_v11 = vmin.f32 %v335_v3, 15.0 }
  0x67   : > { %v815_v12 = vsel %vm1181_vm10, %v814_v5, %v272_v26  ;;  %v829_v14 = vand.u32 2147483648, %v274_v63  ;;  %v834_v13 = vcvt.f32.s32 %v275_v6  ;;  %v832_v18 = vand.u32 2147483647, %v275_v6 }
  0x68   : > { %v823_v15 = vsel %vm1190_vm11, %v822_v7, %v273_v33  ;;  %v336_v16 = vmax.f32 %v815_v12, 0.0  ;;  %v827_v17 = vcvt.s32.f32 %v826_v9  ;;  %v568_v19 = vpack.c.bf16 %v367_v11, %v366_v4 }
  0x69   : > { %v337_v20 = vmax.f32 %v823_v15, 0.0  ;;  %v835_v24 = vcvt.s32.f32 %v834_v13  ;;  %v837_v27 = vand.u32 2147483648, %v275_v6  ;;  %v276_v0 = vadd.f32 %v918_v1, %v240_v2 }
  0x6a   : > { %v368_v23 = vmin.f32 %v336_v16, 15.0  ;;  %v828_v25 = vand.u32 2147483647, %v827_v17  ;;  %596 = vst [vmem:[%s985_s26 + $0x60] sm:$0xff] %v568_v19   ;;  %vm1208_vm12 = vcmp.lt.f32.partialorder %v824_v8, 8388608.0  ;;  %v277_v21 = vadd.f32 %v918_v1, %v241_v10 }
  0x6b   : > { %v369_v28 = vmin.f32 %v337_v20, 15.0  ;;  %v836_v29 = vand.u32 2147483647, %v835_v24  ;;  %vm833_vm13 = vcmp.lt.f32.partialorder %v832_v18, 8388608.0  ;;  %v842_v31 = vcvt.f32.s32 %v276_v0 }
  0x6c   : > { %v830_v30 = vor.u32 %v829_v14, %v828_v25  ;;  %v840_v34 = vand.u32 2147483647, %v276_v0  ;;  %v850_v35 = vcvt.f32.s32 %v277_v21  ;;  %v845_v39 = vand.u32 2147483648, %v276_v0 }
  0x6d   : > { %v573_v32 = vpack.c.bf16 %v369_v28, %v368_v23  ;;  %v838_v33 = vor.u32 %v837_v27, %v836_v29  ;;  %v843_v37 = vcvt.s32.f32 %v842_v31  ;;  %v848_v40 = vand.u32 2147483647, %v277_v21 }
  0x6e   : > { %v831_v36 = vsel %vm1208_vm12, %v830_v30, %v274_v63  ;;  %v851_v42 = vcvt.s32.f32 %v850_v35  ;;  %v853_v43 = vand.u32 2147483648, %v277_v21  ;;  %vm841_vm14 = vcmp.lt.f32.partialorder %v840_v34, 8388608.0 }
  0x6f   : > { %597 = vst [vmem:[%s985_s26 + $0x68] sm:$0xff] %v573_v32   ;;  %v839_v41 = vsel %vm833_vm13, %v838_v33, %v275_v6  ;;  %v338_v38 = vmax.f32 %v831_v36, 0.0  ;;  %v844_v44 = vand.u32 2147483647, %v843_v37  ;;  %vm849_vm15 = vcmp.lt.f32.partialorder %v848_v40, 8388608.0 }
  0x70   : > { %v339_v1 = vmax.f32 %v839_v41, 0.0  ;;  %v852_v46 = vand.u32 2147483647, %v851_v42 }
  0x71   : > { %v370_v45 = vmin.f32 %v338_v38, 15.0  ;;  %v846_v47 = vor.u32 %v845_v39, %v844_v44 }
  0x72   : > { %v371_v22 = vmin.f32 %v339_v1, 15.0  ;;  %v854_v48 = vor.u32 %v853_v43, %v852_v46 }
  0x73   : > { %v847_v50 = vsel %vm841_vm14, %v846_v47, %v276_v0 }
  0x74   : > { %v578_v49 = vpack.c.bf16 %v371_v22, %v370_v45  ;;  %v855_v51 = vsel %vm849_vm15, %v854_v48, %v277_v21  ;;  %v340_v52 = vmax.f32 %v847_v50, 0.0 }
  0x75   : > { %v341_v53 = vmax.f32 %v855_v51, 0.0 }
  0x76   : > { %598 = vst [vmem:[%s985_s26 + $0x70] sm:$0xff] %v578_v49   ;;  %v372_v55 = vmin.f32 %v340_v52, 15.0 }
  0x77   : > { %v373_v56 = vmin.f32 %v341_v53, 15.0 }
  0x79   : > { %v583_v54 = vpack.c.bf16 %v373_v56, %v372_v55 }
  0x7b   : > { %599 = vst [vmem:[%s985_s26 + $0x78] sm:$0xff] %v583_v54  }
  0x7c PF: > { %s13_s12 = sadd.s32 1, %s872_s12  }
  0x7d   : > { %p10_p4 = scmp.ge.s32.totalorder %s13_s12, 4  }
  0x7f   :  { %12 = sbr.rel (!%p10_p4) target bundleno = 1 (0x1), region = 62 }

// kernel: _lambda_.6
= control target key start
LH: loop header
LB: loop body
LE: loop exit
PB: predicated region body
PF: predicated region fallthrough
CT: control target
= control target key end

     0   :  { %s542_s1 = inlined_call_operand.vmem [shape: bf16[128,128], index: 1, kind: input, shape index: {}]   ;;  %s543_s2 = inlined_call_operand.vmem [shape: f32[1,128], index: 2, kind: input, shape index: {}]   ;;  %s544_s0 = inlined_call_operand.vmem [shape: bf16[128,128], index: 0, kind: input, shape index: {}]   ;;  %s545_s3 = inlined_call_operand.vmem [shape: f32[128,128], index: 3, kind: output, shape index: {}]  }
   0x1   :  { %v397_v0 = vld [vmem:[%s542_s1 + $0x38] sm:$0xff]  ;;  %v396_v1 = vld [vmem:[%s542_s1 + $0x30] sm:$0xff]  ;;  %v395_v2 = vld [vmem:[%s542_s1 + $0x28] sm:$0xff] }
   0x2   :  { %178 = vmatpush.bf16.msra.mxu0 %v397_v0  ;;  %398 = vmatpush.bf16.msra.mxu1 %v397_v0  ;;  %v394_v3 = vld [vmem:[%s542_s1 + $0x20] sm:$0xff]  ;;  %v393_v4 = vld [vmem:[%s542_s1 + $0x18] sm:$0xff]  ;;  %v392_v5 = vld [vmem:[%s542_s1 + $0x10] sm:$0xff] }
   0x3   :  { %399 = vmatpush.bf16.msra.mxu2 %v397_v0  ;;  %400 = vmatpush.bf16.msra.mxu3 %v397_v0  ;;  %v391_v6 = vld [vmem:[%s542_s1 + $0x8] sm:$0xff]  ;;  %v390_v7 = vld [vmem:[%s542_s1] sm:$0xff]  ;;  %v384_v9 = vld [vmem:[%s544_s0 + $0x10] sm:$0xff] }
   0x4   :  { %v382_v8 = vld [vmem:[%s544_s0] sm:$0xff]  ;;  %v388_v11 = vld [vmem:[%s544_s0 + $0x30] sm:$0xff]  ;;  %v383_v12 = vld [vmem:[%s544_s0 + $0x8] sm:$0xff] }
   0x5   :  { %v386_v10 = vld [vmem:[%s544_s0 + $0x20] sm:$0xff]  ;;  %v385_v13 = vld [vmem:[%s544_s0 + $0x18] sm:$0xff]  ;;  %v387_v14 = vld [vmem:[%s544_s0 + $0x28] sm:$0xff] }
   0x6   :  { %179 = vmatpush.bf16.msra.mxu0 %v396_v1  ;;  %401 = vmatpush.bf16.msra.mxu1 %v396_v1  ;;  %v389_v15 = vld [vmem:[%s544_s0 + $0x38] sm:$0xff]  ;;  %v422_v16 = vld [vmem:[%s543_s2] ss:$0 sm:$0xff] }
   0x7   :  { %402 = vmatpush.bf16.msra.mxu2 %v396_v1  ;;  %403 = vmatpush.bf16.msra.mxu3 %v396_v1 }
   0xa   :  { %180 = vmatpush.bf16.msra.mxu0 %v395_v2  ;;  %404 = vmatpush.bf16.msra.mxu1 %v395_v2 }
   0xb   :  { %405 = vmatpush.bf16.msra.mxu2 %v395_v2  ;;  %406 = vmatpush.bf16.msra.mxu3 %v395_v2 }
   0xe   :  { %181 = vmatpush.bf16.msra.mxu0 %v394_v3  ;;  %407 = vmatpush.bf16.msra.mxu1 %v394_v3 }
   0xf   :  { %408 = vmatpush.bf16.msra.mxu2 %v394_v3  ;;  %409 = vmatpush.bf16.msra.mxu3 %v394_v3 }
  0x12   :  { %182 = vmatpush.bf16.msra.mxu0 %v393_v4  ;;  %410 = vmatpush.bf16.msra.mxu1 %v393_v4 }
  0x13   :  { %411 = vmatpush.bf16.msra.mxu2 %v393_v4  ;;  %412 = vmatpush.bf16.msra.mxu3 %v393_v4 }
  0x16   :  { %183 = vmatpush.bf16.msra.mxu0 %v392_v5  ;;  %413 = vmatpush.bf16.msra.mxu1 %v392_v5 }
  0x17   :  { %414 = vmatpush.bf16.msra.mxu2 %v392_v5  ;;  %415 = vmatpush.bf16.msra.mxu3 %v392_v5 }
  0x1a   :  { %184 = vmatpush.bf16.msra.mxu0 %v391_v6  ;;  %416 = vmatpush.bf16.msra.mxu1 %v391_v6 }
  0x1b   :  { %417 = vmatpush.bf16.msra.mxu2 %v391_v6  ;;  %418 = vmatpush.bf16.msra.mxu3 %v391_v6 }
  0x1e   :  { %185 = vmatpush.bf16.msra.mxu0 %v390_v7  ;;  %419 = vmatpush.bf16.msra.mxu1 %v390_v7 }
  0x1f   :  { %420 = vmatpush.bf16.msra.mxu2 %v390_v7  ;;  %421 = vmatpush.bf16.msra.mxu3 %v390_v7 }
  0x21   :  { %186 = vmatmul.bf16.vlgmr.msra.gmra.mxu0 %v382_v8  ;;  %196 = vmatmul.bf16.vlgmr.msra.gmra.mxu1 %v384_v9 }
  0x22   :  { %206 = vmatmul.bf16.vlgmr.msra.gmra.mxu2 %v386_v10  ;;  %216 = vmatmul.bf16.vlgmr.msra.gmra.mxu3 %v388_v11 }
  0x31   :  { %191 = vmatmul.bf16.gmra.mxu0 %v383_v12  ;;  %201 = vmatmul.bf16.gmra.mxu1 %v385_v13 }
  0x32   :  { %211 = vmatmul.bf16.gmra.mxu2 %v387_v14  ;;  %221 = vmatmul.bf16.gmra.mxu3 %v389_v15 }
  0x9e   :  { %v187_v17 = vpop.f32.mrf.mxu0  ;;  %v197_v18 = vpop.f32.mrf.mxu1 }
  0x9f   :  { %v282_v19 = vmul.f32 %v422_v16, %v187_v17  ;;  %v286_v20 = vmul.f32 %v422_v16, %v197_v18 }
  0xa1   :  { %298 = vst [vmem:[%s545_s3] sm:$0xff] %v282_v19 }
  0xa2   :  { %302 = vst [vmem:[%s545_s3 + $0x20] sm:$0xff] %v286_v20 }
  0xa5   :  { %v207_v21 = vpop.f32.mrf.mxu2  ;;  %v217_v22 = vpop.f32.mrf.mxu3 }
  0xa6   :  { %v290_v23 = vmul.f32 %v422_v16, %v207_v21  ;;  %v294_v24 = vmul.f32 %v422_v16, %v217_v22  ;;  %v189_v25 = vpop.f32.mrf.mxu0  ;;  %v199_v26 = vpop.f32.mrf.mxu1 }
  0xa7   :  { %v283_v27 = vmul.f32 %v422_v16, %v189_v25  ;;  %v287_v28 = vmul.f32 %v422_v16, %v199_v26 }
  0xa8   :  { %306 = vst [vmem:[%s545_s3 + $0x40] sm:$0xff] %v290_v23 }
  0xa9   :  { %310 = vst [vmem:[%s545_s3 + $0x60] sm:$0xff] %v294_v24 }
  0xaa   :  { %299 = vst [vmem:[%s545_s3 + $0x8] sm:$0xff] %v283_v27 }
  0xab   :  { %303 = vst [vmem:[%s545_s3 + $0x28] sm:$0xff] %v287_v28 }
  0xad   :  { %v209_v29 = vpop.f32.mrf.mxu2  ;;  %v219_v30 = vpop.f32.mrf.mxu3 }
  0xae   :  { %v291_v31 = vmul.f32 %v422_v16, %v209_v29  ;;  %v295_v32 = vmul.f32 %v422_v16, %v219_v30  ;;  %v192_v33 = vpop.f32.mrf.mxu0  ;;  %v202_v34 = vpop.f32.mrf.mxu1 }
  0xaf   :  { %v284_v35 = vmul.f32 %v422_v16, %v192_v33  ;;  %v288_v36 = vmul.f32 %v422_v16, %v202_v34 }
  0xb0   :  { %307 = vst [vmem:[%s545_s3 + $0x48] sm:$0xff] %v291_v31 }
  0xb1   :  { %311 = vst [vmem:[%s545_s3 + $0x68] sm:$0xff] %v295_v32 }
  0xb2   :  { %300 = vst [vmem:[%s545_s3 + $0x10] sm:$0xff] %v284_v35 }
  0xb3   :  { %304 = vst [vmem:[%s545_s3 + $0x30] sm:$0xff] %v288_v36 }
  0xb5   :  { %v212_v37 = vpop.f32.mrf.mxu2  ;;  %v222_v38 = vpop.f32.mrf.mxu3 }
  0xb6   :  { %v292_v39 = vmul.f32 %v422_v16, %v212_v37  ;;  %v296_v40 = vmul.f32 %v422_v16, %v222_v38  ;;  %v194_v41 = vpop.f32.mrf.mxu0  ;;  %v204_v42 = vpop.f32.mrf.mxu1 }
  0xb7   :  { %v285_v43 = vmul.f32 %v422_v16, %v194_v41  ;;  %v289_v44 = vmul.f32 %v422_v16, %v204_v42 }
  0xb8   :  { %308 = vst [vmem:[%s545_s3 + $0x50] sm:$0xff] %v292_v39 }
  0xb9   :  { %312 = vst [vmem:[%s545_s3 + $0x70] sm:$0xff] %v296_v40 }
  0xba   :  { %301 = vst [vmem:[%s545_s3 + $0x18] sm:$0xff] %v285_v43 }
  0xbb   :  { %305 = vst [vmem:[%s545_s3 + $0x38] sm:$0xff] %v289_v44 }
  0xbd   :  { %v214_v45 = vpop.f32.mrf.mxu2  ;;  %v224_v46 = vpop.f32.mrf.mxu3 }
  0xbe   :  { %v293_v47 = vmul.f32 %v422_v16, %v214_v45  ;;  %v297_v48 = vmul.f32 %v422_v16, %v224_v46 }
  0xc0   :  { %309 = vst [vmem:[%s545_s3 + $0x58] sm:$0xff] %v293_v47 }
  0xc1   :  { %313 = vst [vmem:[%s545_s3 + $0x78] sm:$0xff] %v297_v48 }

// kernel: _lambda_.7
= control target key start
LH: loop header
LB: loop body
LE: loop exit
PB: predicated region body
PF: predicated region fallthrough
CT: control target
= control target key end

     0   :  { %s1687_s15 = smov 0   ;;  %s1689_s16 = smov 0   ;;  %s2077_s0 = inlined_call_operand.vmem [shape: bf16[512,128], index: 0, kind: input, shape index: {}]   ;;  %s2078_s1 = inlined_call_operand.vmem [shape: bf16[128,128], index: 1, kind: input, shape index: {}]   ;;  %s2079_s2 = inlined_call_operand.vmem [shape: f32[1,128], index: 2, kind: input, shape index: {}]   ;;  %s2080_s3 = inlined_call_operand.vmem [shape: f32[1,128], index: 3, kind: input, shape index: {}]   ;;  %s2081_s4 = inlined_call_operand.vmem [shape: bf16[512,128], index: 4, kind: output, shape index: {}]  }
   0x1   :  { %s1691_s17 = smov 0  }
   0x2 LB: > { %s33_s18 = sadd.s32 1, %s1656_s16  ;;  %p1110_p0 = scmp.ge.s32.totalorder %s1660_s17, 1  ;;  %s1660_s17 = sphi %s1691_s17, %s14_s17   ;;  %s1656_s16 = sphi %s1689_s16, %s2131_s16   ;;  %s1652_s15 = sphi %s1687_s15, %s2130_s15  }
   0x3   : > { %p35_p1 = scmp.ge.s32.totalorder %s33_s18, 2  ;;  %p221_p2 = scmp.lt.s32.totalorder %s1660_s17, 3 }
   0x5   : > { %s2133_s18 = smov (%p35_p1, %s33_s18), 0  ;;  %p222_p3 = pnand %p1110_p0, %p221_p2 }
   0x6   : > { %s1111_s27 = sshll.u32 (!%p222_p3), %s1652_s15, 5 }
   0x7   : > { %225 = sbr.rel (%p222_p3) target bundleno = 280 (0x118), region = 36  ;;  %p268_p4 = scmp.lt.s32.totalorder (!%p222_p3), %s1111_s27, 63 }
   0xc   : > { %v1236_v0 = vld [vmem:[%s2078_s1 + $0x38] sm:$0xff]  ;;  %v1235_v1 = vld [vmem:[%s2078_s1 + $0x30] sm:$0xff]  ;;  %v1234_v2 = vld [vmem:[%s2078_s1 + $0x28] sm:$0xff]  ;;  %s2135_s27 = smov (!%p268_p4, %s1111_s27), 63 }
   0xd   : > { %560 = vmatpush.bf16.msra.mxu0 %v1236_v0  ;;  %1332 = vmatpush.bf16.msra.mxu1 %v1236_v0  ;;  %v1233_v3 = vld [vmem:[%s2078_s1 + $0x20] sm:$0xff]  ;;  %v1232_v4 = vld [vmem:[%s2078_s1 + $0x18] sm:$0xff]  ;;  %v1231_v5 = vld [vmem:[%s2078_s1 + $0x10] sm:$0xff]  ;;  %s1112_s8 = sshll.u32 %s2135_s27, 2 }
   0xe   : > { %1333 = vmatpush.bf16.msra.mxu2 %v1236_v0  ;;  %1334 = vmatpush.bf16.msra.mxu3 %v1236_v0  ;;  %v1230_v6 = vld [vmem:[%s2078_s1 + $0x8] sm:$0xff]  ;;  %v1229_v7 = vld [vmem:[%s2078_s1] sm:$0xff]  ;;  %s1740_s13 = scalar_lea.vmem %s2077_s0, %s1112_s8  ;;  %s1833_s23 = scalar_lea.vmem %s2081_s4, %s1112_s8 }
   0xf   : > { %v1213_v8 = vld [vmem:[%s1740_s13] sm:$0xff]  ;;  %v1214_v12 = vld [vmem:[%s1740_s13 + $0x8] sm:$0xff]  ;;  %v1215_v16 = vld [vmem:[%s1740_s13 + $0x10] sm:$0xff] }
  0x10   : > { %v1217_v9 = vld [vmem:[%s1740_s13 + $0x20] sm:$0xff]  ;;  %v1218_v13 = vld [vmem:[%s1740_s13 + $0x28] sm:$0xff]  ;;  %v1219_v17 = vld [vmem:[%s1740_s13 + $0x30] sm:$0xff] }
  0x11   : > { %561 = vmatpush.bf16.msra.mxu0 %v1235_v1  ;;  %1335 = vmatpush.bf16.msra.mxu1 %v1235_v1  ;;  %v1221_v10 = vld [vmem:[%s1740_s13 + $0x40] sm:$0xff]  ;;  %v1222_v14 = vld [vmem:[%s1740_s13 + $0x48] sm:$0xff]  ;;  %v1223_v18 = vld [vmem:[%s1740_s13 + $0x50] sm:$0xff] }
  0x12   : > { %1336 = vmatpush.bf16.msra.mxu2 %v1235_v1  ;;  %1337 = vmatpush.bf16.msra.mxu3 %v1235_v1  ;;  %v1225_v11 = vld [vmem:[%s1740_s13 + $0x60] sm:$0xff]  ;;  %v1226_v15 = vld [vmem:[%s1740_s13 + $0x68] sm:$0xff]  ;;  %v1227_v19 = vld [vmem:[%s1740_s13 + $0x70] sm:$0xff] }
  0x13   : > { %v1216_v20 = vld [vmem:[%s1740_s13 + $0x18] sm:$0xff]  ;;  %v1761_v24 = vld [vmem:[%s2079_s2] ss:$0 sm:$0xff] }
  0x14   : > { %v1220_v21 = vld [vmem:[%s1740_s13 + $0x38] sm:$0xff]  ;;  %v1766_v25 = vld [vmem:[%s2080_s3] ss:$0 sm:$0xff] }
  0x15   : > { %562 = vmatpush.bf16.msra.mxu0 %v1234_v2  ;;  %1338 = vmatpush.bf16.msra.mxu1 %v1234_v2  ;;  %v1224_v22 = vld [vmem:[%s1740_s13 + $0x58] sm:$0xff] }
  0x16   : > { %1339 = vmatpush.bf16.msra.mxu2 %v1234_v2  ;;  %1340 = vmatpush.bf16.msra.mxu3 %v1234_v2  ;;  %v1228_v23 = vld [vmem:[%s1740_s13 + $0x78] sm:$0xff] }
  0x19   : > { %563 = vmatpush.bf16.msra.mxu0 %v1233_v3  ;;  %1341 = vmatpush.bf16.msra.mxu1 %v1233_v3 }
  0x1a   : > { %1342 = vmatpush.bf16.msra.mxu2 %v1233_v3  ;;  %1343 = vmatpush.bf16.msra.mxu3 %v1233_v3 }
  0x1d   : > { %564 = vmatpush.bf16.msra.mxu0 %v1232_v4  ;;  %1344 = vmatpush.bf16.msra.mxu1 %v1232_v4 }
  0x1e   : > { %1345 = vmatpush.bf16.msra.mxu2 %v1232_v4  ;;  %1346 = vmatpush.bf16.msra.mxu3 %v1232_v4 }
  0x21   : > { %565 = vmatpush.bf16.msra.mxu0 %v1231_v5  ;;  %1347 = vmatpush.bf16.msra.mxu1 %v1231_v5 }
  0x22   : > { %1348 = vmatpush.bf16.msra.mxu2 %v1231_v5  ;;  %1349 = vmatpush.bf16.msra.mxu3 %v1231_v5 }
  0x25   : > { %566 = vmatpush.bf16.msra.mxu0 %v1230_v6  ;;  %1350 = vmatpush.bf16.msra.mxu1 %v1230_v6 }
  0x26   : > { %1351 = vmatpush.bf16.msra.mxu2 %v1230_v6  ;;  %1352 = vmatpush.bf16.msra.mxu3 %v1230_v6 }
  0x29   : > { %567 = vmatpush.bf16.msra.mxu0 %v1229_v7  ;;  %1353 = vmatpush.bf16.msra.mxu1 %v1229_v7 }
  0x2a   : > { %1354 = vmatpush.bf16.msra.mxu2 %v1229_v7  ;;  %1355 = vmatpush.bf16.msra.mxu3 %v1229_v7 }
  0x2c   : > { %568 = vmatmul.bf16.vlgmr.msra.gmra.mxu0 %v1213_v8  ;;  %588 = vmatmul.bf16.vlgmr.msra.gmra.mxu1 %v1217_v9 }
  0x2d   : > { %608 = vmatmul.bf16.vlgmr.msra.gmra.mxu2 %v1221_v10  ;;  %628 = vmatmul.bf16.vlgmr.msra.gmra.mxu3 %v1225_v11 }
  0x3c   : > { %573 = vmatmul.bf16.gmra.mxu0 %v1214_v12  ;;  %593 = vmatmul.bf16.gmra.mxu1 %v1218_v13 }
  0x3d   : > { %613 = vmatmul.bf16.gmra.mxu2 %v1222_v14  ;;  %633 = vmatmul.bf16.gmra.mxu3 %v1226_v15 }
  0x4c   : > { %578 = vmatmul.bf16.gmra.mxu0 %v1215_v16  ;;  %598 = vmatmul.bf16.gmra.mxu1 %v1219_v17 }
  0x4d   : > { %618 = vmatmul.bf16.gmra.mxu2 %v1223_v18  ;;  %638 = vmatmul.bf16.gmra.mxu3 %v1227_v19 }
  0x5c   : > { %583 = vmatmul.bf16.gmra.mxu0 %v1216_v20  ;;  %603 = vmatmul.bf16.gmra.mxu1 %v1220_v21 }
  0x5d   : > { %623 = vmatmul.bf16.gmra.mxu2 %v1224_v22  ;;  %643 = vmatmul.bf16.gmra.mxu3 %v1228_v23 }
  0xa9   : > { %v569_v26 = vpop.f32.mrf.mxu0  ;;  %v589_v27 = vpop.f32.mrf.mxu1 }
  0xaa   : > { %v752_v28 = vmul.f32 %v1761_v24, %v569_v26  ;;  %v760_v29 = vmul.f32 %v1761_v24, %v589_v27 }
  0xac   : > { %v788_v30 = vadd.f32 %v1766_v25, %v752_v28  ;;  %v796_v31 = vadd.f32 %v1766_v25, %v760_v29 }
  0xae   : > { %v1358_v32 = vcvt.f32.s32 %v788_v30  ;;  %v1356_v33 = vand.u32 2147483647, %v788_v30  ;;  %v1422_v34 = vcvt.f32.s32 %v796_v31  ;;  %v1361_v36 = vand.u32 2147483648, %v788_v30 }
  0xaf   : > { %v1420_v37 = vand.u32 2147483647, %v796_v31  ;;  %v1425_v41 = vand.u32 2147483648, %v796_v31 }
  0xb0   : > { %v1359_v35 = vcvt.s32.f32 %v1358_v32  ;;  %v609_v38 = vpop.f32.mrf.mxu2  ;;  %v629_v39 = vpop.f32.mrf.mxu3  ;;  %v1423_v40 = vcvt.s32.f32 %v1422_v34  ;;  %vm1357_vm0 = vcmp.lt.f32.partialorder %v1356_v33, 8388608.0 }
  0xb1   : > { %v768_v42 = vmul.f32 %v1761_v24, %v609_v38  ;;  %v776_v43 = vmul.f32 %v1761_v24, %v629_v39  ;;  %v571_v44 = vpop.f32.mrf.mxu0  ;;  %v591_v45 = vpop.f32.mrf.mxu1  ;;  %vm1421_vm1 = vcmp.lt.f32.partialorder %v1420_v37, 8388608.0 }
  0xb2   : > { %v1360_v46 = vand.u32 2147483647, %v1359_v35  ;;  %v753_v47 = vmul.f32 %v1761_v24, %v571_v44  ;;  %v761_v48 = vmul.f32 %v1761_v24, %v591_v45  ;;  %v1424_v49 = vand.u32 2147483647, %v1423_v40 }
  0xb3   : > { %v804_v50 = vadd.f32 %v1766_v25, %v768_v42  ;;  %v812_v51 = vadd.f32 %v1766_v25, %v776_v43 }
  0xb4   : > { %v1362_v52 = vor.u32 %v1361_v36, %v1360_v46  ;;  %v789_v53 = vadd.f32 %v1766_v25, %v753_v47  ;;  %v1426_v54 = vor.u32 %v1425_v41, %v1424_v49  ;;  %v797_v60 = vadd.f32 %v1766_v25, %v761_v48 }
  0xb5   : > { %v1484_v55 = vand.u32 2147483647, %v804_v50  ;;  %v1486_v56 = vcvt.f32.s32 %v804_v50  ;;  %v1548_v58 = vand.u32 2147483647, %v812_v51  ;;  %v1550_v59 = vcvt.f32.s32 %v812_v51 }
  0xb6   : > { %v1363_v57 = vsel %vm1357_vm0, %v1362_v52, %v788_v30  ;;  %v1427_v62 = vsel %vm1421_vm1, %v1426_v54, %v796_v31  ;;  %v1489_v0 = vand.u32 2147483648, %v804_v50  ;;  %v1553_v3 = vand.u32 2147483648, %v812_v51 }
  0xb7   : > { %v1780_v61 = vmax.f32 %v1363_v57, 0.0  ;;  %v1487_v63 = vcvt.s32.f32 %v1486_v56  ;;  %v1782_v1 = vmax.f32 %v1427_v62, 0.0  ;;  %v1551_v2 = vcvt.s32.f32 %v1550_v59 }
  0xb8   : > { %v1364_v4 = vand.u32 2147483647, %v789_v53  ;;  %vm1784_vm2 = vcmp.lt.f32.partialorder %v1484_v55, 8388608.0  ;;  %vm1788_vm3 = vcmp.lt.f32.partialorder %v1548_v58, 8388608.0  ;;  %v1366_v8 = vcvt.f32.s32 %v789_v53  ;;  %v611_v9 = vpop.f32.mrf.mxu2  ;;  %v631_v10 = vpop.f32.mrf.mxu3 }
  0xb9   : > { %v1488_v6 = vand.u32 2147483647, %v1487_v63  ;;  %v884_v11 = vmin.f32 %v1780_v61, 15.0  ;;  %v892_v12 = vmin.f32 %v1782_v1, 15.0  ;;  %v1552_v13 = vand.u32 2147483647, %v1551_v2  ;;  %v574_v15 = vpop.f32.mrf.mxu0 }
  0xba   : > { %v1369_v14 = vand.u32 2147483648, %v789_v53  ;;  %vm1794_vm4 = vcmp.lt.f32.partialorder %v1364_v4, 8388608.0  ;;  %v1367_v18 = vcvt.s32.f32 %v1366_v8  ;;  %v1430_v19 = vcvt.f32.s32 %v797_v60 }
  0xbb   : > { %v1490_v16 = vor.u32 %v1489_v0, %v1488_v6  ;;  %v1554_v20 = vor.u32 %v1553_v3, %v1552_v13  ;;  %v1428_v21 = vand.u32 2147483647, %v797_v60  ;;  %v769_v22 = vmul.f32 %v1761_v24, %v611_v9 }
  0xbc   : > { %v777_v23 = vmul.f32 %v1761_v24, %v631_v10  ;;  %v1368_v27 = vand.u32 2147483647, %v1367_v18  ;;  %v1431_v28 = vcvt.s32.f32 %v1430_v19  ;;  %v754_v29 = vmul.f32 %v1761_v24, %v574_v15 }
  0xbd   : > { %v1491_v26 = vsel %vm1784_vm2, %v1490_v16, %v804_v50  ;;  %v1555_v31 = vsel %vm1788_vm3, %v1554_v20, %v812_v51  ;;  %v805_v32 = vadd.f32 %v1766_v25, %v769_v22  ;;  %v1433_v37 = vand.u32 2147483648, %v797_v60  ;;  %v594_v50 = vpop.f32.mrf.mxu1 }
  0xbe   : > { %v1803_v30 = vmax.f32 %v1491_v26, 0.0  ;;  %v813_v33 = vadd.f32 %v1766_v25, %v777_v23  ;;  %v1809_v34 = vmax.f32 %v1555_v31, 0.0  ;;  %v1370_v35 = vor.u32 %v1369_v14, %v1368_v27 }
  0xbf   : > { %v1432_v36 = vand.u32 2147483647, %v1431_v28  ;;  %vm1811_vm5 = vcmp.lt.f32.partialorder %v1428_v21, 8388608.0  ;;  %v1492_v39 = vand.u32 2147483647, %v805_v32  ;;  %v1494_v40 = vcvt.f32.s32 %v805_v32 }
  0xc0   : > { %v1816_v41 = vadd.f32 %v1766_v25, %v754_v29  ;;  %v900_v42 = vmin.f32 %v1803_v30, 15.0  ;;  %v1371_v43 = vsel %vm1794_vm4, %v1370_v35, %v789_v53  ;;  %v1497_v45 = vand.u32 2147483648, %v805_v32  ;;  %v614_v59 = vpop.f32.mrf.mxu2  ;;  %v634_v61 = vpop.f32.mrf.mxu3 }
  0xc1   : > { %v1434_v44 = vor.u32 %v1433_v37, %v1432_v36  ;;  %v908_v46 = vmin.f32 %v1809_v34, 15.0  ;;  %v853_v47 = vmax.f32 %v1371_v43, 0.0  ;;  %v1495_v48 = vcvt.s32.f32 %v1494_v40  ;;  %v576_v14 = vpop.f32.mrf.mxu0 }
  0xc2   : > { %v1558_v49 = vcvt.f32.s32 %v813_v33  ;;  %vm1824_vm6 = vcmp.lt.f32.partialorder %v1492_v39, 8388608.0  ;;  %v1556_v54 = vand.u32 2147483647, %v813_v33  ;;  %v1561_v55 = vand.u32 2147483648, %v813_v33 }
  0xc3   : > { %v1435_v51 = vsel %vm1811_vm5, %v1434_v44, %v797_v60  ;;  %v885_v56 = vmin.f32 %v853_v47, 15.0  ;;  %v1496_v57 = vand.u32 2147483647, %v1495_v48  ;;  %v1372_v60 = vand.u32 2147483647, %v1816_v41 }
  0xc4   : > { %v861_v53 = vmax.f32 %v1435_v51, 0.0  ;;  %v1559_v58 = vcvt.s32.f32 %v1558_v49  ;;  %v1374_v62 = vcvt.f32.s32 %v1816_v41  ;;  %v1377_v63 = vand.u32 2147483648, %v1816_v41 }
  0xc5   : > { %v762_v0 = vmul.f32 %v1761_v24, %v594_v50  ;;  %v1240_v1 = vpack.c.bf16 %v885_v56, %v884_v11  ;;  %v1498_v3 = vor.u32 %v1497_v45, %v1496_v57  ;;  %v770_v7 = vmul.f32 %v1761_v24, %v614_v59  ;;  %v596_v35 = vpop.f32.mrf.mxu1 }
  0xc6   : > { %v893_v2 = vmin.f32 %v861_v53, 15.0  ;;  %v1560_v4 = vand.u32 2147483647, %v1559_v58  ;;  %v1375_v5 = vcvt.s32.f32 %v1374_v62  ;;  %v778_v8 = vmul.f32 %v1761_v24, %v634_v61 }
  0xc7   : > { %v798_v6 = vadd.f32 %v1766_v25, %v762_v0  ;;  %1241 = vst [vmem:[%s1833_s23] sm:$0xff] %v1240_v1   ;;  %v1499_v10 = vsel %vm1824_vm6, %v1498_v3, %v805_v32  ;;  %vm1557_vm7 = vcmp.lt.f32.partialorder %v1556_v54, 8388608.0  ;;  %vm1845_vm8 = vcmp.lt.f32.partialorder %v1372_v60, 8388608.0 }
  0xc8   : > { %v1260_v9 = vpack.c.bf16 %v893_v2, %v892_v12  ;;  %v1562_v13 = vor.u32 %v1561_v55, %v1560_v4  ;;  %v869_v11 = vmax.f32 %v1499_v10, 0.0  ;;  %v1376_v16 = vand.u32 2147483647, %v1375_v5  ;;  %v616_v40 = vpop.f32.mrf.mxu2  ;;  %v636_v54 = vpop.f32.mrf.mxu3 }
  0xc9   : > { %v1438_v17 = vcvt.f32.s32 %v798_v6  ;;  %v1436_v19 = vand.u32 2147483647, %v798_v6  ;;  %v806_v20 = vadd.f32 %v1766_v25, %v770_v7  ;;  %v1852_v12 = vadd.f32 %v1766_v25, %v778_v8  ;;  %v579_v10 = vpop.f32.mrf.mxu0 }
  0xca   : > { %1320 = vst [vmem:[%s1833_s23 + $0x20] sm:$0xff] %v1260_v9   ;;  %v1563_v18 = vsel %vm1557_vm7, %v1562_v13, %v813_v33  ;;  %v901_v21 = vmin.f32 %v869_v11, 15.0  ;;  %v1378_v23 = vor.u32 %v1377_v63, %v1376_v16  ;;  %v755_v26 = vmul.f32 %v1761_v24, %v576_v14 }
  0xcb   : > { %v877_v22 = vmax.f32 %v1563_v18, 0.0  ;;  %v1439_v27 = vcvt.s32.f32 %v1438_v17  ;;  %v1441_v28 = vand.u32 2147483648, %v798_v6  ;;  %v1500_v29 = vand.u32 2147483647, %v806_v20 }
  0xcc   : > { %v1502_v30 = vcvt.f32.s32 %v806_v20  ;;  %v1280_v31 = vpack.c.bf16 %v901_v21, %v900_v42  ;;  %v1379_v33 = vsel %vm1845_vm8, %v1378_v23, %v1816_v41  ;;  %v1564_v34 = vand.u32 2147483647, %v1852_v12 }
  0xcd   : > { %v909_v32 = vmin.f32 %v877_v22, 15.0  ;;  %vm1859_vm9 = vcmp.lt.f32.partialorder %v1436_v19, 8388608.0  ;;  %v1440_v37 = vand.u32 2147483647, %v1439_v27  ;;  %v1505_v39 = vand.u32 2147483648, %v806_v20  ;;  %v599_v16 = vpop.f32.mrf.mxu1 }
  0xce   : > { %v1503_v38 = vcvt.s32.f32 %v1502_v30  ;;  %1324 = vst [vmem:[%s1833_s23 + $0x40] sm:$0xff] %v1280_v31   ;;  %v1864_v42 = vmax.f32 %v1379_v33, 0.0  ;;  %vm1866_vm10 = vcmp.lt.f32.partialorder %v1500_v29, 8388608.0  ;;  %v1566_v41 = vcvt.f32.s32 %v1852_v12 }
  0xcf   : > { %v1300_v43 = vpack.c.bf16 %v909_v32, %v908_v46  ;;  %v1442_v45 = vor.u32 %v1441_v28, %v1440_v37  ;;  %vm1871_vm11 = vcmp.lt.f32.partialorder %v1564_v34, 8388608.0  ;;  %v791_v49 = vadd.f32 %v1766_v25, %v755_v26 }
  0xd0   : > { %v1504_v47 = vand.u32 2147483647, %v1503_v38  ;;  %v1567_v50 = vcvt.s32.f32 %v1566_v41  ;;  %v1569_v46 = vand.u32 2147483648, %v1852_v12  ;;  %v763_v51 = vmul.f32 %v1761_v24, %v596_v35 }
  0xd1   : > { %1328 = vst [vmem:[%s1833_s23 + $0x60] sm:$0xff] %v1300_v43   ;;  %v771_v52 = vmul.f32 %v1761_v24, %v616_v40  ;;  %v1443_v55 = vsel %vm1859_vm9, %v1442_v45, %v798_v6  ;;  %v1380_v53 = vand.u32 2147483647, %v791_v49  ;;  %v1382_v57 = vcvt.f32.s32 %v791_v49 }
  0xd2   : > { %v1506_v56 = vor.u32 %v1505_v39, %v1504_v47  ;;  %v886_v58 = vmin.f32 %v1864_v42, 15.0  ;;  %v1883_v59 = vmax.f32 %v1443_v55, 0.0  ;;  %v1568_v61 = vand.u32 2147483647, %v1567_v50 }
  0xd3   : > { %v799_v60 = vadd.f32 %v1766_v25, %v763_v51  ;;  %v1383_v63 = vcvt.s32.f32 %v1382_v57  ;;  %v807_v0 = vadd.f32 %v1766_v25, %v771_v52  ;;  %v779_v1 = vmul.f32 %v1761_v24, %v636_v54  ;;  %v639_v51 = vpop.f32.mrf.mxu3 }
  0xd4   : > { %v1507_v62 = vsel %vm1866_vm10, %v1506_v56, %v806_v20  ;;  %v1570_v3 = vor.u32 %v1569_v46, %v1568_v61  ;;  %v1385_v4 = vand.u32 2147483648, %v791_v49  ;;  %v894_v6 = vmin.f32 %v1883_v59, 15.0  ;;  %v619_v46 = vpop.f32.mrf.mxu2 }
  0xd5   : > { %v1890_v2 = vmax.f32 %v1507_v62, 0.0  ;;  %v1444_v5 = vand.u32 2147483647, %v799_v60  ;;  %vm1893_vm12 = vcmp.lt.f32.partialorder %v1380_v53, 8388608.0  ;;  %v1384_v8 = vand.u32 2147483647, %v1383_v63  ;;  %v581_v53 = vpop.f32.mrf.mxu0 }
  0xd6   : > { %v1446_v9 = vcvt.f32.s32 %v799_v60  ;;  %v1571_v13 = vsel %vm1871_vm11, %v1570_v3, %v1852_v12  ;;  %v1449_v14 = vand.u32 2147483648, %v799_v60  ;;  %v1508_v11 = vand.u32 2147483647, %v807_v0 }
  0xd7   : > { %v1510_v15 = vcvt.f32.s32 %v807_v0  ;;  %v902_v17 = vmin.f32 %v1890_v2, 15.0  ;;  %v1386_v18 = vor.u32 %v1385_v4, %v1384_v8  ;;  %vm1901_vm13 = vcmp.lt.f32.partialorder %v1444_v5, 8388608.0 }
  0xd8   : > { %v1447_v20 = vcvt.s32.f32 %v1446_v9  ;;  %v1905_v21 = vmax.f32 %v1571_v13, 0.0  ;;  %v815_v23 = vadd.f32 %v1766_v25, %v779_v1  ;;  %v756_v26 = vmul.f32 %v1761_v24, %v579_v10  ;;  %v601_v10 = vpop.f32.mrf.mxu1 }
  0xd9   : > { %v1511_v22 = vcvt.s32.f32 %v1510_v15  ;;  %v1387_v12 = vsel %vm1893_vm12, %v1386_v18, %v791_v49  ;;  %v1513_v28 = vand.u32 2147483648, %v807_v0  ;;  %v764_v29 = vmul.f32 %v1761_v24, %v599_v16 }
  0xda   : > { %v1448_v27 = vand.u32 2147483647, %v1447_v20  ;;  %v855_v30 = vmax.f32 %v1387_v12, 0.0  ;;  %v1572_v32 = vand.u32 2147483647, %v815_v23  ;;  %v1574_v33 = vcvt.f32.s32 %v815_v23 }
  0xdb   : > { %v1512_v31 = vand.u32 2147483647, %v1511_v22  ;;  %vm1912_vm14 = vcmp.lt.f32.partialorder %v1508_v11, 8388608.0  ;;  %v1577_v36 = vand.u32 2147483648, %v815_v23  ;;  %v792_v37 = vadd.f32 %v1766_v25, %v756_v26 }
  0xdc   : > { %v1450_v34 = vor.u32 %v1449_v14, %v1448_v27  ;;  %v887_v38 = vmin.f32 %v855_v30, 15.0  ;;  %v1575_v40 = vcvt.s32.f32 %v1574_v33  ;;  %v800_v43 = vadd.f32 %v1766_v25, %v764_v29  ;;  %v621_v29 = vpop.f32.mrf.mxu2  ;;  %v641_v30 = vpop.f32.mrf.mxu3 }
  0xdd   : > { %v1514_v39 = vor.u32 %v1513_v28, %v1512_v31  ;;  %vm1920_vm15 = vcmp.lt.f32.partialorder %v1572_v32, 8388608.0  ;;  %v1388_v41 = vand.u32 2147483647, %v792_v37  ;;  %v1390_v45 = vcvt.f32.s32 %v792_v37  ;;  %v584_v35 = vpop.f32.mrf.mxu0 }
  0xde   : > { %v1451_v42 = vsel %vm1901_vm13, %v1450_v34, %v799_v60  ;;  %v1245_v47 = vpack.c.bf16 %v887_v38, %v886_v58  ;;  %v1576_v50 = vand.u32 2147483647, %v1575_v40  ;;  %v1393_v56 = vand.u32 2147483648, %v792_v37 }
  0xdf   : > { %v863_v48 = vmax.f32 %v1451_v42, 0.0  ;;  %v1515_v49 = vsel %vm1912_vm14, %v1514_v39, %v807_v0  ;;  %vm1926_vm0 = vcmp.lt.f32.partialorder %v1388_v41, 8388608.0  ;;  %v1391_v55 = vcvt.s32.f32 %v1390_v45 }
  0xe0   : > { %v871_v52 = vmax.f32 %v1515_v49, 0.0  ;;  %1317 = vst [vmem:[%s1833_s23 + $0x8] sm:$0xff] %v1245_v47   ;;  %v1578_v59 = vor.u32 %v1577_v36, %v1576_v50  ;;  %v1452_v61 = vand.u32 2147483647, %v800_v43  ;;  %v1454_v58 = vcvt.f32.s32 %v800_v43 }
  0xe1   : > { %v895_v57 = vmin.f32 %v863_v48, 15.0  ;;  %v1392_v62 = vand.u32 2147483647, %v1391_v55  ;;  %v1457_v63 = vand.u32 2147483648, %v800_v43  ;;  %v772_v0 = vmul.f32 %v1761_v24, %v619_v46 }
  0xe2   : > { %v903_v60 = vmin.f32 %v871_v52, 15.0  ;;  %v1579_v2 = vsel %vm1920_vm15, %v1578_v59, %v815_v23  ;;  %v1455_v3 = vcvt.s32.f32 %v1454_v58  ;;  %v780_v4 = vmul.f32 %v1761_v24, %v639_v51 }
  0xe3   : > { %v1265_v1 = vpack.c.bf16 %v895_v57, %v894_v6  ;;  %v879_v7 = vmax.f32 %v1579_v2, 0.0  ;;  %v1394_v8 = vor.u32 %v1393_v56, %v1392_v62  ;;  %v808_v9 = vadd.f32 %v1766_v25, %v772_v0 }
  0xe4   : > { %v1285_v5 = vpack.c.bf16 %v903_v60, %v902_v17  ;;  %v910_v13 = vmin.f32 %v1905_v21, 15.0  ;;  %vm1938_vm1 = vcmp.lt.f32.partialorder %v1452_v61, 8388608.0  ;;  %v1456_v6 = vand.u32 2147483647, %v1455_v3 }
  0xe5   : > { %1321 = vst [vmem:[%s1833_s23 + $0x28] sm:$0xff] %v1265_v1   ;;  %v816_v11 = vadd.f32 %v1766_v25, %v780_v4  ;;  %v911_v15 = vmin.f32 %v879_v7, 15.0  ;;  %v1395_v16 = vsel %vm1926_vm0, %v1394_v8, %v792_v37  ;;  %v1518_v17 = vcvt.f32.s32 %v808_v9 }
  0xe6   : > { %1325 = vst [vmem:[%s1833_s23 + $0x48] sm:$0xff] %v1285_v5   ;;  %v757_v18 = vmul.f32 %v1761_v24, %v581_v53  ;;  %v1458_v19 = vor.u32 %v1457_v63, %v1456_v6  ;;  %v1516_v20 = vand.u32 2147483647, %v808_v9  ;;  %v765_v21 = vmul.f32 %v1761_v24, %v601_v10  ;;  %v604_v6 = vpop.f32.mrf.mxu1 }
  0xe7   : > { %v1305_v22 = vpack.c.bf16 %v911_v15, %v910_v13  ;;  %v1519_v23 = vcvt.s32.f32 %v1518_v17  ;;  %v1582_v26 = vcvt.f32.s32 %v816_v11  ;;  %v1948_v12 = vmax.f32 %v1395_v16, 0.0 }
  0xe8   : > { %v1459_v27 = vsel %vm1938_vm1, %v1458_v19, %v800_v43  ;;  %v1521_v28 = vand.u32 2147483648, %v808_v9  ;;  %v1580_v32 = vand.u32 2147483647, %v816_v11  ;;  %v793_v34 = vadd.f32 %v1766_v25, %v757_v18 }
  0xe9   : > { %1329 = vst [vmem:[%s1833_s23 + $0x68] sm:$0xff] %v1305_v22   ;;  %v1520_v31 = vand.u32 2147483647, %v1519_v23  ;;  %v1583_v33 = vcvt.s32.f32 %v1582_v26  ;;  %v1954_v36 = vmax.f32 %v1459_v27, 0.0  ;;  %vm1956_vm2 = vcmp.lt.f32.partialorder %v1516_v20, 8388608.0  ;;  %v624_v22 = vpop.f32.mrf.mxu2  ;;  %v644_v23 = vpop.f32.mrf.mxu3 }
  0xea   : > { %v1585_v38 = vand.u32 2147483648, %v816_v11  ;;  %v801_v39 = vadd.f32 %v1766_v25, %v765_v21  ;;  %v773_v42 = vmul.f32 %v1761_v24, %v621_v29  ;;  %v781_v44 = vmul.f32 %v1761_v24, %v641_v30 }
  0xeb   : > { %v1522_v40 = vor.u32 %v1521_v28, %v1520_v31  ;;  %v1584_v43 = vand.u32 2147483647, %v1583_v33  ;;  %v888_v41 = vmin.f32 %v1948_v12, 15.0  ;;  %v1398_v45 = vcvt.f32.s32 %v793_v34 }
  0xec   : > { %v1462_v47 = vcvt.f32.s32 %v801_v39  ;;  %v758_v48 = vmul.f32 %v1761_v24, %v584_v35  ;;  %v1396_v46 = vand.u32 2147483647, %v793_v34  ;;  %v1460_v51 = vand.u32 2147483647, %v801_v39 }
  0xed   : > { %v1523_v49 = vsel %vm1956_vm2, %v1522_v40, %v808_v9  ;;  %v1586_v50 = vor.u32 %v1585_v38, %v1584_v43  ;;  %v896_v52 = vmin.f32 %v1954_v36, 15.0  ;;  %vm1968_vm3 = vcmp.lt.f32.partialorder %v1580_v32, 8388608.0 }
  0xee   : > { %v1399_v55 = vcvt.s32.f32 %v1398_v45  ;;  %v1463_v56 = vcvt.s32.f32 %v1462_v47  ;;  %v1972_v53 = vmax.f32 %v1523_v49, 0.0  ;;  %v1401_v57 = vand.u32 2147483648, %v793_v34 }
  0xef   : > { %v809_v59 = vadd.f32 %v1766_v25, %v773_v42  ;;  %v817_v61 = vadd.f32 %v1766_v25, %v781_v44  ;;  %v1587_v58 = vsel %vm1968_vm3, %v1586_v50, %v816_v11  ;;  %v1465_v63 = vand.u32 2147483648, %v801_v39 }
  0xf0   : > { %v1400_v60 = vand.u32 2147483647, %v1399_v55  ;;  %v1464_v62 = vand.u32 2147483647, %v1463_v56  ;;  %vm1978_vm4 = vcmp.lt.f32.partialorder %v1396_v46, 8388608.0  ;;  %vm1982_vm5 = vcmp.lt.f32.partialorder %v1460_v51, 8388608.0 }
  0xf1   : > { %v1526_v2 = vcvt.f32.s32 %v809_v59  ;;  %v1987_v3 = vadd.f32 %v1766_v25, %v758_v48  ;;  %v1524_v7 = vand.u32 2147483647, %v809_v59  ;;  %v1590_v8 = vcvt.f32.s32 %v817_v61 }
  0xf2   : > { %v1402_v4 = vor.u32 %v1401_v57, %v1400_v60  ;;  %v1466_v5 = vor.u32 %v1465_v63, %v1464_v62  ;;  %v904_v9 = vmin.f32 %v1972_v53, 15.0  ;;  %v880_v10 = vmax.f32 %v1587_v58, 0.0  ;;  %v626_v62 = vpop.f32.mrf.mxu2  ;;  %v646_v63 = vpop.f32.mrf.mxu3 }
  0xf3   : > { %v1527_v13 = vcvt.s32.f32 %v1526_v2  ;;  %v1529_v14 = vand.u32 2147483648, %v809_v59  ;;  %v1588_v16 = vand.u32 2147483647, %v817_v61  ;;  %v1591_v17 = vcvt.s32.f32 %v1590_v8 }
  0xf4   : > { %v1403_v11 = vsel %vm1978_vm4, %v1402_v4, %v793_v34  ;;  %v1467_v15 = vsel %vm1982_vm5, %v1466_v5, %v801_v39  ;;  %v1406_v21 = vcvt.f32.s32 %v1987_v3  ;;  %vm1995_vm6 = vcmp.lt.f32.partialorder %v1524_v7, 8388608.0 }
  0xf5   : > { %v857_v18 = vmax.f32 %v1403_v11, 0.0  ;;  %v865_v19 = vmax.f32 %v1467_v15, 0.0  ;;  %v1528_v20 = vand.u32 2147483647, %v1527_v13  ;;  %v1592_v12 = vand.u32 2147483647, %v1591_v17 }
  0xf6   : > { %v1593_v27 = vand.u32 2147483648, %v817_v61  ;;  %v766_v28 = vmul.f32 %v1761_v24, %v604_v6  ;;  %v1407_v32 = vcvt.s32.f32 %v1406_v21  ;;  %v774_v35 = vmul.f32 %v1761_v24, %v624_v22 }
  0xf7   : > { %v889_v29 = vmin.f32 %v857_v18, 15.0  ;;  %v897_v30 = vmin.f32 %v865_v19, 15.0  ;;  %v1530_v31 = vor.u32 %v1529_v14, %v1528_v20  ;;  %v782_v36 = vmul.f32 %v1761_v24, %v644_v23 }
  0xf8   : > { %v1594_v33 = vor.u32 %v1593_v27, %v1592_v12  ;;  %v2001_v34 = vadd.f32 %v1766_v25, %v766_v28  ;;  %vm1589_vm7 = vcmp.lt.f32.partialorder %v1588_v16, 8388608.0  ;;  %v912_v40 = vmin.f32 %v880_v10, 15.0 }
  0xf9   : > { %v1250_v37 = vpack.c.bf16 %v889_v29, %v888_v41  ;;  %v1270_v38 = vpack.c.bf16 %v897_v30, %v896_v52  ;;  %v1531_v39 = vsel %vm1995_vm6, %v1530_v31, %v809_v59  ;;  %v1404_v47 = vand.u32 2147483647, %v1987_v3  ;;  %v586_v59 = vpop.f32.mrf.mxu0 }
  0xfa   : > { %v873_v43 = vmax.f32 %v1531_v39, 0.0  ;;  %v1595_v42 = vsel %vm1589_vm7, %v1594_v33, %v817_v61  ;;  %v1470_v44 = vcvt.f32.s32 %v2001_v34  ;;  %v1409_v48 = vand.u32 2147483648, %v1987_v3  ;;  %v606_v61 = vpop.f32.mrf.mxu1 }
  0xfb   : > { %1318 = vst [vmem:[%s1833_s23 + $0x10] sm:$0xff] %v1250_v37   ;;  %v881_v45 = vmax.f32 %v1595_v42, 0.0  ;;  %v2012_v49 = vadd.f32 %v1766_v25, %v774_v35  ;;  %v1408_v50 = vand.u32 2147483647, %v1407_v32  ;;  %v2016_v51 = vadd.f32 %v1766_v25, %v782_v36 }
  0xfc   : > { %1322 = vst [vmem:[%s1833_s23 + $0x30] sm:$0xff] %v1270_v38   ;;  %v905_v41 = vmin.f32 %v873_v43, 15.0  ;;  %v1471_v46 = vcvt.s32.f32 %v1470_v44  ;;  %v1468_v54 = vand.u32 2147483647, %v2001_v34  ;;  %v1473_v55 = vand.u32 2147483648, %v2001_v34 }
  0xfd   : > { %v913_v52 = vmin.f32 %v881_v45, 15.0  ;;  %v1534_v56 = vcvt.f32.s32 %v2012_v49  ;;  %vm2022_vm8 = vcmp.lt.f32.partialorder %v1404_v47, 8388608.0  ;;  %v1410_v1 = vor.u32 %v1409_v48, %v1408_v50 }
  0xfe   : > { %v1290_v53 = vpack.c.bf16 %v905_v41, %v904_v9  ;;  %v1472_v57 = vand.u32 2147483647, %v1471_v46  ;;  %v1598_v2 = vcvt.f32.s32 %v2016_v51  ;;  %vm2028_vm9 = vcmp.lt.f32.partialorder %v1468_v54, 8388608.0 }
  0xff   : > { %v1310_v58 = vpack.c.bf16 %v913_v52, %v912_v40  ;;  %v1535_v60 = vcvt.s32.f32 %v1534_v56  ;;  %v759_v7 = vmul.f32 %v1761_v24, %v586_v59  ;;  %v767_v8 = vmul.f32 %v1761_v24, %v606_v61 }
 0x100   : > { %1326 = vst [vmem:[%s1833_s23 + $0x50] sm:$0xff] %v1290_v53   ;;  %v1474_v5 = vor.u32 %v1473_v55, %v1472_v57  ;;  %v1599_v10 = vcvt.s32.f32 %v1598_v2  ;;  %v775_v13 = vmul.f32 %v1761_v24, %v626_v62  ;;  %v783_v14 = vmul.f32 %v1761_v24, %v646_v63 }
 0x101   : > { %1330 = vst [vmem:[%s1833_s23 + $0x70] sm:$0xff] %v1310_v58   ;;  %v1536_v9 = vand.u32 2147483647, %v1535_v60  ;;  %v1532_v6 = vand.u32 2147483647, %v2012_v49  ;;  %v795_v11 = vadd.f32 %v1766_v25, %v759_v7  ;;  %v803_v15 = vadd.f32 %v1766_v25, %v767_v8 }
 0x102   : > { %v1411_v16 = vsel %vm2022_vm8, %v1410_v1, %v1987_v3  ;;  %v1537_v17 = vand.u32 2147483648, %v2012_v49  ;;  %v1596_v18 = vand.u32 2147483647, %v2016_v51  ;;  %v1600_v19 = vand.u32 2147483647, %v1599_v10 }
 0x103   : > { %v1475_v20 = vsel %vm2028_vm9, %v1474_v5, %v2001_v34  ;;  %v1414_v24 = vcvt.f32.s32 %v795_v11  ;;  %v811_v21 = vadd.f32 %v1766_v25, %v775_v13  ;;  %v1601_v23 = vand.u32 2147483648, %v2016_v51 }
 0x104   : > { %v1538_v22 = vor.u32 %v1537_v17, %v1536_v9  ;;  %v1412_v26 = vand.u32 2147483647, %v795_v11  ;;  %v819_v12 = vadd.f32 %v1766_v25, %v783_v14  ;;  %v858_v27 = vmax.f32 %v1411_v16, 0.0 }
 0x105   : > { %v1415_v3 = vcvt.s32.f32 %v1414_v24  ;;  %v1478_v28 = vcvt.f32.s32 %v803_v15  ;;  %v866_v29 = vmax.f32 %v1475_v20, 0.0  ;;  %vm2050_vm10 = vcmp.lt.f32.partialorder %v1532_v6, 8388608.0 }
 0x106   : > { %vm2054_vm11 = vcmp.lt.f32.partialorder %v1596_v18, 8388608.0  ;;  %v1602_v32 = vor.u32 %v1601_v23, %v1600_v19  ;;  %v1417_v34 = vand.u32 2147483648, %v795_v11  ;;  %v1542_v36 = vcvt.f32.s32 %v811_v21 }
 0x107   : > { %v1416_v33 = vand.u32 2147483647, %v1415_v3  ;;  %v1479_v35 = vcvt.s32.f32 %v1478_v28  ;;  %v1539_v25 = vsel %vm2050_vm10, %v1538_v22, %v2012_v49  ;;  %vm1413_vm12 = vcmp.lt.f32.partialorder %v1412_v26, 8388608.0 }
 0x108   : > { %v1476_v37 = vand.u32 2147483647, %v803_v15  ;;  %v1606_v38 = vcvt.f32.s32 %v819_v12  ;;  %v1481_v43 = vand.u32 2147483648, %v803_v15  ;;  %v1543_v42 = vcvt.s32.f32 %v1542_v36 }
 0x109   : > { %v1418_v39 = vor.u32 %v1417_v34, %v1416_v33  ;;  %v1480_v40 = vand.u32 2147483647, %v1479_v35  ;;  %v1603_v44 = vsel %vm2054_vm11, %v1602_v32, %v2016_v51  ;;  %v1540_v45 = vand.u32 2147483647, %v811_v21 }
 0x10a   : > { %v1545_v47 = vand.u32 2147483648, %v811_v21  ;;  %v1607_v48 = vcvt.s32.f32 %v1606_v38  ;;  %v1544_v46 = vand.u32 2147483647, %v1543_v42  ;;  %v1604_v52 = vand.u32 2147483647, %v819_v12 }
 0x10b   : > { %v1419_v41 = vsel %vm1413_vm12, %v1418_v39, %v795_v11  ;;  %v1482_v50 = vor.u32 %v1481_v43, %v1480_v40  ;;  %vm1477_vm13 = vcmp.lt.f32.partialorder %v1476_v37, 8388608.0  ;;  %v1609_v55 = vand.u32 2147483648, %v819_v12 }
 0x10c   : > { %v859_v54 = vmax.f32 %v1419_v41, 0.0  ;;  %v1608_v49 = vand.u32 2147483647, %v1607_v48  ;;  %v890_v56 = vmin.f32 %v858_v27, 15.0  ;;  %v874_v53 = vmax.f32 %v1539_v25, 0.0 }
 0x10d   : > { %v1483_v57 = vsel %vm1477_vm13, %v1482_v50, %v803_v15  ;;  %v1546_v59 = vor.u32 %v1545_v47, %v1544_v46  ;;  %vm1541_vm14 = vcmp.lt.f32.partialorder %v1540_v45, 8388608.0  ;;  %v898_v60 = vmin.f32 %v866_v29, 15.0 }
 0x10e   : > { %v891_v61 = vmin.f32 %v859_v54, 15.0  ;;  %v867_v58 = vmax.f32 %v1483_v57, 0.0  ;;  %v1610_v51 = vor.u32 %v1609_v55, %v1608_v49  ;;  %v882_v62 = vmax.f32 %v1603_v44, 0.0 }
 0x10f   : > { %v1547_v63 = vsel %vm1541_vm14, %v1546_v59, %v811_v21  ;;  %vm1605_vm15 = vcmp.lt.f32.partialorder %v1604_v52, 8388608.0  ;;  %v906_v7 = vmin.f32 %v874_v53, 15.0 }
 0x110   : > { %v1255_v0 = vpack.c.bf16 %v891_v61, %v890_v56  ;;  %v899_v1 = vmin.f32 %v867_v58, 15.0  ;;  %v875_v2 = vmax.f32 %v1547_v63, 0.0  ;;  %v1611_v4 = vsel %vm1605_vm15, %v1610_v51, %v819_v12 }
 0x111   : > { %v883_v5 = vmax.f32 %v1611_v4, 0.0  ;;  %v914_v10 = vmin.f32 %v882_v62, 15.0 }
 0x112   : > { %1319 = vst [vmem:[%s1833_s23 + $0x18] sm:$0xff] %v1255_v0   ;;  %v1275_v8 = vpack.c.bf16 %v899_v1, %v898_v60  ;;  %v907_v9 = vmin.f32 %v875_v2, 15.0 }
 0x113   : > { %v915_v13 = vmin.f32 %v883_v5, 15.0 }
 0x114   : > { %1323 = vst [vmem:[%s1833_s23 + $0x38] sm:$0xff] %v1275_v8   ;;  %v1295_v14 = vpack.c.bf16 %v907_v9, %v906_v7 }
 0x115   : > { %v1315_v6 = vpack.c.bf16 %v915_v13, %v914_v10 }
 0x116   : > { %1327 = vst [vmem:[%s1833_s23 + $0x58] sm:$0xff] %v1295_v14  }
 0x117   : > { %1331 = vst [vmem:[%s1833_s23 + $0x78] sm:$0xff] %v1315_v6  }
 0x118 PF: > { %s14_s17 = sadd.s32 1, %s1660_s17   ;;  %s2130_s15 = smov %s1656_s16 }
 0x119   : > { %p11_p5 = scmp.ge.s32.totalorder %s14_s17, 4   ;;  %s2131_s16 = smov %s2133_s18 }
 0x11b   :  { %13 = sbr.rel (!%p11_p5) target bundleno = 2 (0x2), region = 83 }

// kernel: _lambda_.8
= control target key start
LH: loop header
LB: loop body
LE: loop exit
PB: predicated region body
PF: predicated region fallthrough
CT: control target
= control target key end

     0   :  { %s927_s1 = inlined_call_operand.vmem [shape: bf16[128,128], index: 1, kind: input, shape index: {}]   ;;  %s928_s2 = inlined_call_operand.vmem [shape: f32[1,128], index: 2, kind: input, shape index: {}]   ;;  %s929_s3 = inlined_call_operand.vmem [shape: f32[1,128], index: 3, kind: input, shape index: {}]   ;;  %s930_s0 = inlined_call_operand.vmem [shape: bf16[128,128], index: 0, kind: input, shape index: {}]   ;;  %s931_s4 = inlined_call_operand.vmem [shape: bf16[128,128], index: 4, kind: output, shape index: {}]  }
   0x1   :  { %v484_v0 = vld [vmem:[%s927_s1 + $0x38] sm:$0xff]  ;;  %v483_v1 = vld [vmem:[%s927_s1 + $0x30] sm:$0xff]  ;;  %v482_v2 = vld [vmem:[%s927_s1 + $0x28] sm:$0xff] }
   0x2   :  { %181 = vmatpush.bf16.msra.mxu0 %v484_v0  ;;  %532 = vmatpush.bf16.msra.mxu1 %v484_v0  ;;  %v481_v3 = vld [vmem:[%s927_s1 + $0x20] sm:$0xff]  ;;  %v480_v4 = vld [vmem:[%s927_s1 + $0x18] sm:$0xff]  ;;  %v479_v5 = vld [vmem:[%s927_s1 + $0x10] sm:$0xff] }
   0x3   :  { %533 = vmatpush.bf16.msra.mxu2 %v484_v0  ;;  %534 = vmatpush.bf16.msra.mxu3 %v484_v0  ;;  %v478_v6 = vld [vmem:[%s927_s1 + $0x8] sm:$0xff]  ;;  %v477_v7 = vld [vmem:[%s927_s1] sm:$0xff]  ;;  %v471_v9 = vld [vmem:[%s930_s0 + $0x10] sm:$0xff] }
   0x4   :  { %v469_v8 = vld [vmem:[%s930_s0] sm:$0xff]  ;;  %v475_v11 = vld [vmem:[%s930_s0 + $0x30] sm:$0xff]  ;;  %v470_v12 = vld [vmem:[%s930_s0 + $0x8] sm:$0xff] }
   0x5   :  { %v473_v10 = vld [vmem:[%s930_s0 + $0x20] sm:$0xff]  ;;  %v472_v13 = vld [vmem:[%s930_s0 + $0x18] sm:$0xff]  ;;  %v474_v14 = vld [vmem:[%s930_s0 + $0x28] sm:$0xff] }
   0x6   :  { %182 = vmatpush.bf16.msra.mxu0 %v483_v1  ;;  %535 = vmatpush.bf16.msra.mxu1 %v483_v1  ;;  %v476_v15 = vld [vmem:[%s930_s0 + $0x38] sm:$0xff]  ;;  %v762_v16 = vld [vmem:[%s928_s2] ss:$0 sm:$0xff] }
   0x7   :  { %536 = vmatpush.bf16.msra.mxu2 %v483_v1  ;;  %537 = vmatpush.bf16.msra.mxu3 %v483_v1  ;;  %v767_v17 = vld [vmem:[%s929_s3] ss:$0 sm:$0xff] }
   0xa   :  { %183 = vmatpush.bf16.msra.mxu0 %v482_v2  ;;  %538 = vmatpush.bf16.msra.mxu1 %v482_v2 }
   0xb   :  { %539 = vmatpush.bf16.msra.mxu2 %v482_v2  ;;  %540 = vmatpush.bf16.msra.mxu3 %v482_v2 }
   0xe   :  { %184 = vmatpush.bf16.msra.mxu0 %v481_v3  ;;  %541 = vmatpush.bf16.msra.mxu1 %v481_v3 }
   0xf   :  { %542 = vmatpush.bf16.msra.mxu2 %v481_v3  ;;  %543 = vmatpush.bf16.msra.mxu3 %v481_v3 }
  0x12   :  { %185 = vmatpush.bf16.msra.mxu0 %v480_v4  ;;  %544 = vmatpush.bf16.msra.mxu1 %v480_v4 }
  0x13   :  { %545 = vmatpush.bf16.msra.mxu2 %v480_v4  ;;  %546 = vmatpush.bf16.msra.mxu3 %v480_v4 }
  0x16   :  { %186 = vmatpush.bf16.msra.mxu0 %v479_v5  ;;  %547 = vmatpush.bf16.msra.mxu1 %v479_v5 }
  0x17   :  { %548 = vmatpush.bf16.msra.mxu2 %v479_v5  ;;  %549 = vmatpush.bf16.msra.mxu3 %v479_v5 }
  0x1a   :  { %187 = vmatpush.bf16.msra.mxu0 %v478_v6  ;;  %550 = vmatpush.bf16.msra.mxu1 %v478_v6 }
  0x1b   :  { %551 = vmatpush.bf16.msra.mxu2 %v478_v6  ;;  %552 = vmatpush.bf16.msra.mxu3 %v478_v6 }
  0x1e   :  { %188 = vmatpush.bf16.msra.mxu0 %v477_v7  ;;  %553 = vmatpush.bf16.msra.mxu1 %v477_v7 }
  0x1f   :  { %554 = vmatpush.bf16.msra.mxu2 %v477_v7  ;;  %555 = vmatpush.bf16.msra.mxu3 %v477_v7 }
  0x21   :  { %189 = vmatmul.bf16.vlgmr.msra.gmra.mxu0 %v469_v8  ;;  %199 = vmatmul.bf16.vlgmr.msra.gmra.mxu1 %v471_v9 }
  0x22   :  { %209 = vmatmul.bf16.vlgmr.msra.gmra.mxu2 %v473_v10  ;;  %219 = vmatmul.bf16.vlgmr.msra.gmra.mxu3 %v475_v11 }
  0x31   :  { %194 = vmatmul.bf16.gmra.mxu0 %v470_v12  ;;  %204 = vmatmul.bf16.gmra.mxu1 %v472_v13 }
  0x32   :  { %214 = vmatmul.bf16.gmra.mxu2 %v474_v14  ;;  %224 = vmatmul.bf16.gmra.mxu3 %v476_v15 }
  0x9e   :  { %v190_v18 = vpop.f32.mrf.mxu0  ;;  %v200_v19 = vpop.f32.mrf.mxu1 }
  0x9f   :  { %v285_v20 = vmul.f32 %v762_v16, %v190_v18  ;;  %v289_v21 = vmul.f32 %v762_v16, %v200_v19 }
  0xa1   :  { %v305_v22 = vadd.f32 %v767_v17, %v285_v20  ;;  %v309_v23 = vadd.f32 %v767_v17, %v289_v21 }
  0xa3   :  { %v556_v24 = vand.u32 2147483647, %v305_v22  ;;  %v558_v25 = vcvt.f32.s32 %v305_v22  ;;  %v590_v26 = vcvt.f32.s32 %v309_v23  ;;  %v561_v28 = vand.u32 2147483648, %v305_v22 }
  0xa4   :  { %v588_v29 = vand.u32 2147483647, %v309_v23  ;;  %v593_v33 = vand.u32 2147483648, %v309_v23 }
  0xa5   :  { %v559_v27 = vcvt.s32.f32 %v558_v25  ;;  %v210_v30 = vpop.f32.mrf.mxu2  ;;  %v220_v31 = vpop.f32.mrf.mxu3  ;;  %v591_v32 = vcvt.s32.f32 %v590_v26  ;;  %vm775_vm0 = vcmp.lt.f32.partialorder %v556_v24, 8388608.0 }
  0xa6   :  { %v293_v34 = vmul.f32 %v762_v16, %v210_v30  ;;  %v297_v35 = vmul.f32 %v762_v16, %v220_v31  ;;  %v192_v36 = vpop.f32.mrf.mxu0  ;;  %v202_v37 = vpop.f32.mrf.mxu1  ;;  %vm783_vm1 = vcmp.lt.f32.partialorder %v588_v29, 8388608.0 }
  0xa7   :  { %v560_v39 = vand.u32 2147483647, %v559_v27  ;;  %v286_v40 = vmul.f32 %v762_v16, %v192_v36  ;;  %v592_v41 = vand.u32 2147483647, %v591_v32  ;;  %v290_v44 = vmul.f32 %v762_v16, %v202_v37 }
  0xa8   :  { %v313_v42 = vadd.f32 %v767_v17, %v293_v34  ;;  %v317_v43 = vadd.f32 %v767_v17, %v297_v35 }
  0xa9   :  { %v562_v45 = vor.u32 %v561_v28, %v560_v39  ;;  %v594_v47 = vor.u32 %v593_v33, %v592_v41  ;;  %v306_v50 = vadd.f32 %v767_v17, %v286_v40  ;;  %v310_v57 = vadd.f32 %v767_v17, %v290_v44 }
  0xaa   :  { %v620_v48 = vand.u32 2147483647, %v313_v42  ;;  %v622_v49 = vcvt.f32.s32 %v313_v42  ;;  %v652_v52 = vand.u32 2147483647, %v317_v43  ;;  %v654_v53 = vcvt.f32.s32 %v317_v43 }
  0xab   :  { %v563_v51 = vsel %vm775_vm0, %v562_v45, %v305_v22  ;;  %v595_v55 = vsel %vm783_vm1, %v594_v47, %v309_v23  ;;  %v625_v58 = vand.u32 2147483648, %v313_v42  ;;  %v657_v62 = vand.u32 2147483648, %v317_v43 }
  0xac   :  { %v790_v54 = vmax.f32 %v563_v51, 0.0  ;;  %v623_v56 = vcvt.s32.f32 %v622_v49  ;;  %v655_v59 = vcvt.s32.f32 %v654_v53  ;;  %vm795_vm2 = vcmp.lt.f32.partialorder %v620_v48, 8388608.0 }
  0xad   :  { %v566_v63 = vcvt.f32.s32 %v306_v50  ;;  %v212_v0 = vpop.f32.mrf.mxu2  ;;  %v222_v1 = vpop.f32.mrf.mxu3  ;;  %v799_v2 = vmax.f32 %v595_v55, 0.0  ;;  %vm801_vm3 = vcmp.lt.f32.partialorder %v652_v52, 8388608.0  ;;  %v564_v5 = vand.u32 2147483647, %v306_v50 }
  0xae   :  { %v624_v61 = vand.u32 2147483647, %v623_v56  ;;  %v656_v4 = vand.u32 2147483647, %v655_v59  ;;  %v195_v6 = vpop.f32.mrf.mxu0  ;;  %v353_v7 = vmin.f32 %v790_v54, 15.0  ;;  %v598_v10 = vcvt.f32.s32 %v310_v57  ;;  %v205_v41 = vpop.f32.mrf.mxu1 }
  0xaf   :  { %v567_v9 = vcvt.s32.f32 %v566_v63  ;;  %v596_v12 = vand.u32 2147483647, %v310_v57  ;;  %v294_v13 = vmul.f32 %v762_v16, %v212_v0  ;;  %v298_v14 = vmul.f32 %v762_v16, %v222_v1 }
  0xb0   :  { %v626_v8 = vor.u32 %v625_v58, %v624_v61  ;;  %v658_v11 = vor.u32 %v657_v62, %v656_v4  ;;  %v569_v18 = vand.u32 2147483648, %v306_v50  ;;  %v599_v19 = vcvt.s32.f32 %v598_v10 }
  0xb1   :  { %v568_v15 = vand.u32 2147483647, %v567_v9  ;;  %v287_v20 = vmul.f32 %v762_v16, %v195_v6  ;;  %v357_v21 = vmin.f32 %v799_v2, 15.0  ;;  %vm810_vm4 = vcmp.lt.f32.partialorder %v564_v5, 8388608.0 }
  0xb2   :  { %v314_v23 = vadd.f32 %v767_v17, %v294_v13  ;;  %v318_v24 = vadd.f32 %v767_v17, %v298_v14  ;;  %v627_v25 = vsel %vm795_vm2, %v626_v8, %v313_v42  ;;  %v600_v27 = vand.u32 2147483647, %v599_v19 }
  0xb3   :  { %v570_v26 = vor.u32 %v569_v18, %v568_v15  ;;  %v601_v28 = vand.u32 2147483648, %v310_v57  ;;  %v659_v29 = vsel %vm801_vm3, %v658_v11, %v317_v43  ;;  %vm820_vm5 = vcmp.lt.f32.partialorder %v596_v12, 8388608.0 }
  0xb4   :  { %v628_v31 = vand.u32 2147483647, %v314_v23  ;;  %v630_v32 = vcvt.f32.s32 %v314_v23  ;;  %v660_v35 = vand.u32 2147483647, %v318_v24  ;;  %v827_v36 = vadd.f32 %v767_v17, %v287_v20 }
  0xb5   :  { %v571_v33 = vsel %vm810_vm4, %v570_v26, %v306_v50  ;;  %v602_v34 = vor.u32 %v601_v28, %v600_v27  ;;  %v345_v37 = vmax.f32 %v627_v25, 0.0  ;;  %v662_v40 = vcvt.f32.s32 %v318_v24  ;;  %v215_v50 = vpop.f32.mrf.mxu2  ;;  %v225_v51 = vpop.f32.mrf.mxu3 }
  0xb6   :  { %v338_v38 = vmax.f32 %v571_v33, 0.0  ;;  %v631_v39 = vcvt.s32.f32 %v630_v32  ;;  %v349_v42 = vmax.f32 %v659_v29, 0.0  ;;  %vm831_vm6 = vcmp.lt.f32.partialorder %v628_v31, 8388608.0  ;;  %v197_v8 = vpop.f32.mrf.mxu0  ;;  %v207_v27 = vpop.f32.mrf.mxu1 }
  0xb7   :  { %v603_v43 = vsel %vm820_vm5, %v602_v34, %v310_v57  ;;  %v633_v45 = vand.u32 2147483648, %v314_v23  ;;  %v663_v49 = vcvt.s32.f32 %v662_v40  ;;  %vm835_vm7 = vcmp.lt.f32.partialorder %v660_v35, 8388608.0 }
  0xb8   :  { %v354_v46 = vmin.f32 %v338_v38, 15.0  ;;  %v342_v47 = vmax.f32 %v603_v43, 0.0  ;;  %v632_v48 = vand.u32 2147483647, %v631_v39  ;;  %v665_v53 = vand.u32 2147483648, %v318_v24 }
  0xb9   :  { %v574_v54 = vcvt.f32.s32 %v827_v36  ;;  %v291_v55 = vmul.f32 %v762_v16, %v205_v41  ;;  %v664_v59 = vand.u32 2147483647, %v663_v49  ;;  %v295_v62 = vmul.f32 %v762_v16, %v215_v50 }
  0xba   :  { %v488_v56 = vpack.c.bf16 %v354_v46, %v353_v7  ;;  %v358_v57 = vmin.f32 %v342_v47, 15.0  ;;  %v634_v58 = vor.u32 %v633_v45, %v632_v48  ;;  %v299_v63 = vmul.f32 %v762_v16, %v225_v51 }
  0xbb   :  { %v575_v60 = vcvt.s32.f32 %v574_v54  ;;  %v842_v61 = vadd.f32 %v767_v17, %v291_v55  ;;  %v666_v2 = vor.u32 %v665_v53, %v664_v59  ;;  %v577_v3 = vand.u32 2147483648, %v827_v36 }
  0xbc   :  { %489 = vst [vmem:[%s931_s4] sm:$0xff] %v488_v56   ;;  %v498_v0 = vpack.c.bf16 %v358_v57, %v357_v21  ;;  %v635_v1 = vsel %vm831_vm6, %v634_v58, %v314_v23  ;;  %v572_v5 = vand.u32 2147483647, %v827_v36  ;;  %v860_v10 = vadd.f32 %v767_v17, %v295_v62 }
  0xbd   :  { %v346_v4 = vmax.f32 %v635_v1, 0.0  ;;  %v576_v6 = vand.u32 2147483647, %v575_v60  ;;  %v606_v7 = vcvt.f32.s32 %v842_v61  ;;  %v667_v9 = vsel %vm835_vm7, %v666_v2, %v318_v24  ;;  %v217_v28 = vpop.f32.mrf.mxu2  ;;  %v227_v43 = vpop.f32.mrf.mxu3 }
  0xbe   :  { %526 = vst [vmem:[%s931_s4 + $0x10] sm:$0xff] %v498_v0   ;;  %v361_v11 = vmin.f32 %v345_v37, 15.0  ;;  %v350_v13 = vmax.f32 %v667_v9, 0.0  ;;  %v863_v14 = vadd.f32 %v767_v17, %v299_v63  ;;  %v638_v19 = vcvt.f32.s32 %v860_v10 }
  0xbf   :  { %v362_v12 = vmin.f32 %v346_v4, 15.0  ;;  %v578_v15 = vor.u32 %v577_v3, %v576_v6  ;;  %v607_v18 = vcvt.s32.f32 %v606_v7  ;;  %v288_v20 = vmul.f32 %v762_v16, %v197_v8 }
  0xc0   :  { %v365_v21 = vmin.f32 %v349_v42, 15.0  ;;  %v366_v23 = vmin.f32 %v350_v13, 15.0  ;;  %vm867_vm8 = vcmp.lt.f32.partialorder %v572_v5, 8388608.0  ;;  %v604_v25 = vand.u32 2147483647, %v842_v61 }
  0xc1   :  { %v508_v22 = vpack.c.bf16 %v362_v12, %v361_v11  ;;  %v639_v26 = vcvt.s32.f32 %v638_v19  ;;  %v608_v30 = vand.u32 2147483647, %v607_v18  ;;  %v609_v31 = vand.u32 2147483648, %v842_v61 }
  0xc2   :  { %v518_v29 = vpack.c.bf16 %v366_v23, %v365_v21  ;;  %v670_v32 = vcvt.f32.s32 %v863_v14  ;;  %v579_v33 = vsel %vm867_vm8, %v578_v15, %v827_v36  ;;  %v308_v35 = vadd.f32 %v767_v17, %v288_v20 }
  0xc3   :  { %528 = vst [vmem:[%s931_s4 + $0x20] sm:$0xff] %v508_v22   ;;  %v640_v34 = vand.u32 2147483647, %v639_v26  ;;  %v636_v37 = vand.u32 2147483647, %v860_v10  ;;  %v292_v39 = vmul.f32 %v762_v16, %v207_v27  ;;  %v296_v40 = vmul.f32 %v762_v16, %v217_v28 }
  0xc4   :  { %530 = vst [vmem:[%s931_s4 + $0x30] sm:$0xff] %v518_v29   ;;  %v671_v38 = vcvt.s32.f32 %v670_v32  ;;  %vm887_vm9 = vcmp.lt.f32.partialorder %v604_v25, 8388608.0  ;;  %v641_v36 = vand.u32 2147483648, %v860_v10  ;;  %v582_v42 = vcvt.f32.s32 %v308_v35 }
  0xc5   :  { %v339_v44 = vmax.f32 %v579_v33, 0.0  ;;  %v610_v45 = vor.u32 %v609_v31, %v608_v30  ;;  %v668_v46 = vand.u32 2147483647, %v863_v14  ;;  %v312_v47 = vadd.f32 %v767_v17, %v292_v39 }
  0xc6   :  { %v642_v48 = vor.u32 %v641_v36, %v640_v34  ;;  %v672_v49 = vand.u32 2147483647, %v671_v38  ;;  %v583_v50 = vcvt.s32.f32 %v582_v42  ;;  %v316_v51 = vadd.f32 %v767_v17, %v296_v40 }
  0xc7   :  { %vm895_vm10 = vcmp.lt.f32.partialorder %v636_v37, 8388608.0  ;;  %v580_v53 = vand.u32 2147483647, %v308_v35  ;;  %v300_v54 = vmul.f32 %v762_v16, %v227_v43  ;;  %v673_v55 = vand.u32 2147483648, %v863_v14 }
  0xc8   :  { %v584_v56 = vand.u32 2147483647, %v583_v50  ;;  %v585_v57 = vand.u32 2147483648, %v308_v35  ;;  %v614_v58 = vcvt.f32.s32 %v312_v47  ;;  %v355_v59 = vmin.f32 %v339_v44, 15.0 }
  0xc9   :  { %v611_v60 = vsel %vm887_vm9, %v610_v45, %v842_v61  ;;  %vm904_vm11 = vcmp.lt.f32.partialorder %v668_v46, 8388608.0  ;;  %v646_v63 = vcvt.f32.s32 %v316_v51  ;;  %v643_v0 = vsel %vm895_vm10, %v642_v48, %v860_v10 }
  0xca   :  { %v674_v16 = vor.u32 %v673_v55, %v672_v49  ;;  %v586_v1 = vor.u32 %v585_v57, %v584_v56  ;;  %v615_v2 = vcvt.s32.f32 %v614_v58  ;;  %vm581_vm12 = vcmp.lt.f32.partialorder %v580_v53, 8388608.0 }
  0xcb   :  { %v612_v3 = vand.u32 2147483647, %v312_v47  ;;  %v647_v4 = vcvt.s32.f32 %v646_v63  ;;  %v320_v5 = vadd.f32 %v767_v17, %v300_v54  ;;  %v617_v61 = vand.u32 2147483648, %v312_v47 }
  0xcc   :  { %v587_v6 = vsel %vm581_vm12, %v586_v1, %v308_v35  ;;  %v616_v7 = vand.u32 2147483647, %v615_v2  ;;  %v644_v8 = vand.u32 2147483647, %v316_v51  ;;  %v649_v12 = vand.u32 2147483648, %v316_v51 }
  0xcd   :  { %v340_v9 = vmax.f32 %v587_v6, 0.0  ;;  %v648_v11 = vand.u32 2147483647, %v647_v4  ;;  %v678_v13 = vcvt.f32.s32 %v320_v5  ;;  %v343_v15 = vmax.f32 %v611_v60, 0.0 }
  0xce   :  { %v347_v18 = vmax.f32 %v643_v0, 0.0  ;;  %v675_v10 = vsel %vm904_vm11, %v674_v16, %v863_v14  ;;  %v618_v19 = vor.u32 %v617_v61, %v616_v7  ;;  %vm613_vm13 = vcmp.lt.f32.partialorder %v612_v3, 8388608.0 }
  0xcf   :  { %v356_v20 = vmin.f32 %v340_v9, 15.0  ;;  %v650_v21 = vor.u32 %v649_v12, %v648_v11  ;;  %v679_v22 = vcvt.s32.f32 %v678_v13  ;;  %vm645_vm14 = vcmp.lt.f32.partialorder %v644_v8, 8388608.0 }
  0xd0   :  { %v619_v17 = vsel %vm613_vm13, %v618_v19, %v312_v47  ;;  %v676_v23 = vand.u32 2147483647, %v320_v5  ;;  %v681_v24 = vand.u32 2147483648, %v320_v5  ;;  %v359_v30 = vmin.f32 %v343_v15, 15.0 }
  0xd1   :  { %v493_v25 = vpack.c.bf16 %v356_v20, %v355_v59  ;;  %v344_v26 = vmax.f32 %v619_v17, 0.0  ;;  %v651_v27 = vsel %vm645_vm14, %v650_v21, %v316_v51  ;;  %v680_v28 = vand.u32 2147483647, %v679_v22 }
  0xd2   :  { %v348_v29 = vmax.f32 %v651_v27, 0.0  ;;  %v363_v32 = vmin.f32 %v347_v18, 15.0  ;;  %v351_v33 = vmax.f32 %v675_v10, 0.0  ;;  %vm677_vm15 = vcmp.lt.f32.partialorder %v676_v23, 8388608.0 }
  0xd3   :  { %525 = vst [vmem:[%s931_s4 + $0x8] sm:$0xff] %v493_v25   ;;  %v360_v14 = vmin.f32 %v344_v26, 15.0  ;;  %v682_v31 = vor.u32 %v681_v24, %v680_v28 }
  0xd4   :  { %v364_v34 = vmin.f32 %v348_v29, 15.0  ;;  %v367_v40 = vmin.f32 %v351_v33, 15.0 }
  0xd5   :  { %v503_v35 = vpack.c.bf16 %v360_v14, %v359_v30  ;;  %v683_v37 = vsel %vm677_vm15, %v682_v31, %v320_v5 }
  0xd6   :  { %v513_v38 = vpack.c.bf16 %v364_v34, %v363_v32  ;;  %v352_v39 = vmax.f32 %v683_v37, 0.0 }
  0xd7   :  { %527 = vst [vmem:[%s931_s4 + $0x18] sm:$0xff] %v503_v35  }
  0xd8   :  { %529 = vst [vmem:[%s931_s4 + $0x28] sm:$0xff] %v513_v38   ;;  %v368_v41 = vmin.f32 %v352_v39, 15.0 }
  0xda   :  { %v523_v36 = vpack.c.bf16 %v368_v41, %v367_v40 }
  0xdc   :  { %531 = vst [vmem:[%s931_s4 + $0x38] sm:$0xff] %v523_v36  }

// kernel: _lambda_.9
= control target key start
LH: loop header
LB: loop body
LE: loop exit
PB: predicated region body
PF: predicated region fallthrough
CT: control target
= control target key end

     0   :  { %s648_s1 = inlined_call_operand.vmem [shape: bf16[128,128], index: 1, kind: input, shape index: {}]   ;;  %s649_s2 = inlined_call_operand.vmem [shape: f32[1,128], index: 2, kind: input, shape index: {}]   ;;  %s650_s0 = inlined_call_operand.vmem [shape: bf16[128,128], index: 0, kind: input, shape index: {}]   ;;  %s651_s3 = inlined_call_operand.vmem [shape: f32[128,128], index: 3, kind: input, shape index: {}]   ;;  %s652_s4 = inlined_call_operand.vmem [shape: f32[128,128], index: 4, kind: output, shape index: {}]  }
   0x1   :  { %v432_v0 = vld [vmem:[%s648_s1 + $0x38] sm:$0xff]  ;;  %v431_v1 = vld [vmem:[%s648_s1 + $0x30] sm:$0xff]  ;;  %v430_v2 = vld [vmem:[%s648_s1 + $0x28] sm:$0xff] }
   0x2   :  { %181 = vmatpush.bf16.msra.mxu0 %v432_v0  ;;  %433 = vmatpush.bf16.msra.mxu1 %v432_v0  ;;  %v429_v3 = vld [vmem:[%s648_s1 + $0x20] sm:$0xff]  ;;  %v428_v4 = vld [vmem:[%s648_s1 + $0x18] sm:$0xff]  ;;  %v427_v5 = vld [vmem:[%s648_s1 + $0x10] sm:$0xff] }
   0x3   :  { %434 = vmatpush.bf16.msra.mxu2 %v432_v0  ;;  %435 = vmatpush.bf16.msra.mxu3 %v432_v0  ;;  %v426_v6 = vld [vmem:[%s648_s1 + $0x8] sm:$0xff]  ;;  %v425_v7 = vld [vmem:[%s648_s1] sm:$0xff]  ;;  %v419_v9 = vld [vmem:[%s650_s0 + $0x10] sm:$0xff] }
   0x4   :  { %v417_v8 = vld [vmem:[%s650_s0] sm:$0xff]  ;;  %v423_v11 = vld [vmem:[%s650_s0 + $0x30] sm:$0xff]  ;;  %v418_v12 = vld [vmem:[%s650_s0 + $0x8] sm:$0xff] }
   0x5   :  { %v421_v10 = vld [vmem:[%s650_s0 + $0x20] sm:$0xff]  ;;  %v420_v13 = vld [vmem:[%s650_s0 + $0x18] sm:$0xff]  ;;  %v422_v14 = vld [vmem:[%s650_s0 + $0x28] sm:$0xff] }
   0x6   :  { %182 = vmatpush.bf16.msra.mxu0 %v431_v1  ;;  %436 = vmatpush.bf16.msra.mxu1 %v431_v1  ;;  %v424_v15 = vld [vmem:[%s650_s0 + $0x38] sm:$0xff]  ;;  %v534_v16 = vld [vmem:[%s649_s2] ss:$0 sm:$0xff]  ;;  %v302_v32 = vld [vmem:[%s651_s3 + $0x8] sm:$0xff] }
   0x7   :  { %437 = vmatpush.bf16.msra.mxu2 %v431_v1  ;;  %438 = vmatpush.bf16.msra.mxu3 %v431_v1  ;;  %v301_v18 = vld [vmem:[%s651_s3] sm:$0xff]  ;;  %v306_v34 = vld [vmem:[%s651_s3 + $0x28] sm:$0xff]  ;;  %v303_v48 = vld [vmem:[%s651_s3 + $0x10] sm:$0xff] }
   0x8   :  { %v305_v20 = vld [vmem:[%s651_s3 + $0x20] sm:$0xff]  ;;  %v310_v42 = vld [vmem:[%s651_s3 + $0x48] sm:$0xff]  ;;  %v307_v50 = vld [vmem:[%s651_s3 + $0x30] sm:$0xff] }
   0x9   :  { %v309_v26 = vld [vmem:[%s651_s3 + $0x40] sm:$0xff]  ;;  %v314_v44 = vld [vmem:[%s651_s3 + $0x68] sm:$0xff]  ;;  %v311_v58 = vld [vmem:[%s651_s3 + $0x50] sm:$0xff] }
   0xa   :  { %183 = vmatpush.bf16.msra.mxu0 %v430_v2  ;;  %439 = vmatpush.bf16.msra.mxu1 %v430_v2  ;;  %v313_v28 = vld [vmem:[%s651_s3 + $0x60] sm:$0xff]  ;;  %v315_v60 = vld [vmem:[%s651_s3 + $0x70] sm:$0xff]  ;;  %v304_v0 = vld [vmem:[%s651_s3 + $0x18] sm:$0xff] }
   0xb   :  { %440 = vmatpush.bf16.msra.mxu2 %v430_v2  ;;  %441 = vmatpush.bf16.msra.mxu3 %v430_v2  ;;  %v308_v2 = vld [vmem:[%s651_s3 + $0x38] sm:$0xff] }
   0xe   :  { %184 = vmatpush.bf16.msra.mxu0 %v429_v3  ;;  %442 = vmatpush.bf16.msra.mxu1 %v429_v3 }
   0xf   :  { %443 = vmatpush.bf16.msra.mxu2 %v429_v3  ;;  %444 = vmatpush.bf16.msra.mxu3 %v429_v3 }
  0x12   :  { %185 = vmatpush.bf16.msra.mxu0 %v428_v4  ;;  %445 = vmatpush.bf16.msra.mxu1 %v428_v4 }
  0x13   :  { %446 = vmatpush.bf16.msra.mxu2 %v428_v4  ;;  %447 = vmatpush.bf16.msra.mxu3 %v428_v4 }
  0x16   :  { %186 = vmatpush.bf16.msra.mxu0 %v427_v5  ;;  %448 = vmatpush.bf16.msra.mxu1 %v427_v5 }
  0x17   :  { %449 = vmatpush.bf16.msra.mxu2 %v427_v5  ;;  %450 = vmatpush.bf16.msra.mxu3 %v427_v5 }
  0x1a   :  { %187 = vmatpush.bf16.msra.mxu0 %v426_v6  ;;  %451 = vmatpush.bf16.msra.mxu1 %v426_v6 }
  0x1b   :  { %452 = vmatpush.bf16.msra.mxu2 %v426_v6  ;;  %453 = vmatpush.bf16.msra.mxu3 %v426_v6 }
  0x1e   :  { %188 = vmatpush.bf16.msra.mxu0 %v425_v7  ;;  %454 = vmatpush.bf16.msra.mxu1 %v425_v7 }
  0x1f   :  { %455 = vmatpush.bf16.msra.mxu2 %v425_v7  ;;  %456 = vmatpush.bf16.msra.mxu3 %v425_v7 }
  0x21   :  { %189 = vmatmul.bf16.vlgmr.msra.gmra.mxu0 %v417_v8  ;;  %199 = vmatmul.bf16.vlgmr.msra.gmra.mxu1 %v419_v9 }
  0x22   :  { %209 = vmatmul.bf16.vlgmr.msra.gmra.mxu2 %v421_v10  ;;  %219 = vmatmul.bf16.vlgmr.msra.gmra.mxu3 %v423_v11  ;;  %v312_v10 = vld [vmem:[%s651_s3 + $0x58] sm:$0xff] }
  0x31   :  { %194 = vmatmul.bf16.gmra.mxu0 %v418_v12  ;;  %204 = vmatmul.bf16.gmra.mxu1 %v420_v13  ;;  %v316_v12 = vld [vmem:[%s651_s3 + $0x78] sm:$0xff] }
  0x32   :  { %214 = vmatmul.bf16.gmra.mxu2 %v422_v14  ;;  %224 = vmatmul.bf16.gmra.mxu3 %v424_v15 }
  0x9e   :  { %v190_v17 = vpop.f32.mrf.mxu0  ;;  %v200_v19 = vpop.f32.mrf.mxu1 }
  0x9f   :  { %v285_v21 = vmul.f32 %v534_v16, %v190_v17  ;;  %v289_v22 = vmul.f32 %v534_v16, %v200_v19 }
  0xa1   :  { %v317_v23 = vadd.f32 %v301_v18, %v285_v21  ;;  %v321_v24 = vadd.f32 %v305_v20, %v289_v22 }
  0xa3   :  { %333 = vst [vmem:[%s652_s4] sm:$0xff] %v317_v23 }
  0xa4   :  { %337 = vst [vmem:[%s652_s4 + $0x20] sm:$0xff] %v321_v24 }
  0xa5   :  { %v210_v25 = vpop.f32.mrf.mxu2  ;;  %v220_v27 = vpop.f32.mrf.mxu3 }
  0xa6   :  { %v293_v29 = vmul.f32 %v534_v16, %v210_v25  ;;  %v297_v30 = vmul.f32 %v534_v16, %v220_v27  ;;  %v192_v31 = vpop.f32.mrf.mxu0  ;;  %v202_v33 = vpop.f32.mrf.mxu1 }
  0xa7   :  { %v286_v35 = vmul.f32 %v534_v16, %v192_v31  ;;  %v290_v36 = vmul.f32 %v534_v16, %v202_v33 }
  0xa8   :  { %v325_v37 = vadd.f32 %v309_v26, %v293_v29  ;;  %v329_v38 = vadd.f32 %v313_v28, %v297_v30 }
  0xa9   :  { %v318_v39 = vadd.f32 %v302_v32, %v286_v35  ;;  %v322_v40 = vadd.f32 %v306_v34, %v290_v36 }
  0xaa   :  { %341 = vst [vmem:[%s652_s4 + $0x40] sm:$0xff] %v325_v37 }
  0xab   :  { %345 = vst [vmem:[%s652_s4 + $0x60] sm:$0xff] %v329_v38 }
  0xac   :  { %334 = vst [vmem:[%s652_s4 + $0x8] sm:$0xff] %v318_v39 }
  0xad   :  { %338 = vst [vmem:[%s652_s4 + $0x28] sm:$0xff] %v322_v40  ;;  %v212_v41 = vpop.f32.mrf.mxu2  ;;  %v222_v43 = vpop.f32.mrf.mxu3 }
  0xae   :  { %v294_v45 = vmul.f32 %v534_v16, %v212_v41  ;;  %v298_v46 = vmul.f32 %v534_v16, %v222_v43  ;;  %v195_v47 = vpop.f32.mrf.mxu0  ;;  %v205_v49 = vpop.f32.mrf.mxu1 }
  0xaf   :  { %v287_v51 = vmul.f32 %v534_v16, %v195_v47  ;;  %v291_v52 = vmul.f32 %v534_v16, %v205_v49 }
  0xb0   :  { %v326_v53 = vadd.f32 %v310_v42, %v294_v45  ;;  %v330_v54 = vadd.f32 %v314_v44, %v298_v46 }
  0xb1   :  { %v319_v55 = vadd.f32 %v303_v48, %v287_v51  ;;  %v323_v56 = vadd.f32 %v307_v50, %v291_v52 }
  0xb2   :  { %342 = vst [vmem:[%s652_s4 + $0x48] sm:$0xff] %v326_v53 }
  0xb3   :  { %346 = vst [vmem:[%s652_s4 + $0x68] sm:$0xff] %v330_v54 }
  0xb4   :  { %335 = vst [vmem:[%s652_s4 + $0x10] sm:$0xff] %v319_v55 }
  0xb5   :  { %339 = vst [vmem:[%s652_s4 + $0x30] sm:$0xff] %v323_v56  ;;  %v215_v57 = vpop.f32.mrf.mxu2  ;;  %v225_v59 = vpop.f32.mrf.mxu3 }
  0xb6   :  { %v295_v61 = vmul.f32 %v534_v16, %v215_v57  ;;  %v299_v62 = vmul.f32 %v534_v16, %v225_v59  ;;  %v197_v63 = vpop.f32.mrf.mxu0  ;;  %v207_v1 = vpop.f32.mrf.mxu1 }
  0xb7   :  { %v288_v3 = vmul.f32 %v534_v16, %v197_v63  ;;  %v292_v4 = vmul.f32 %v534_v16, %v207_v1 }
  0xb8   :  { %v327_v5 = vadd.f32 %v311_v58, %v295_v61  ;;  %v331_v6 = vadd.f32 %v315_v60, %v299_v62 }
  0xb9   :  { %v320_v7 = vadd.f32 %v304_v0, %v288_v3  ;;  %v324_v8 = vadd.f32 %v308_v2, %v292_v4 }
  0xba   :  { %343 = vst [vmem:[%s652_s4 + $0x50] sm:$0xff] %v327_v5 }
  0xbb   :  { %347 = vst [vmem:[%s652_s4 + $0x70] sm:$0xff] %v331_v6 }
  0xbc   :  { %336 = vst [vmem:[%s652_s4 + $0x18] sm:$0xff] %v320_v7 }
  0xbd   :  { %340 = vst [vmem:[%s652_s4 + $0x38] sm:$0xff] %v324_v8  ;;  %v217_v9 = vpop.f32.mrf.mxu2  ;;  %v227_v11 = vpop.f32.mrf.mxu3 }
  0xbe   :  { %v296_v13 = vmul.f32 %v534_v16, %v217_v9  ;;  %v300_v14 = vmul.f32 %v534_v16, %v227_v11 }
  0xc0   :  { %v328_v15 = vadd.f32 %v312_v10, %v296_v13  ;;  %v332_v17 = vadd.f32 %v316_v12, %v300_v14 }
  0xc2   :  { %344 = vst [vmem:[%s652_s4 + $0x58] sm:$0xff] %v328_v15 }
  0xc3   :  { %348 = vst [vmem:[%s652_s4 + $0x78] sm:$0xff] %v332_v17 }

</bundles_post_ra>
